<compile_context>
chip_gen: v5e
topology: v5e:2x2
jax: 0.10.0
libtpu: 0.0.40
codegen_flags: <defaults>
</compile_context>

<pallas_src>
from functools import partial

import jax
import jax.numpy as jnp
from jax.experimental import pallas as pl
from jax.experimental.pallas import tpu as pltpu

HIDDEN = 32    # hidden_size
OUTPUT = 64    # output_size (vocab)
MAXLEN = 128   # max_length (attention span; DEFAULT_MAX_LENGTH shrunk for the demo)
VPAD = 128     # vocab padded to a full 128-lane block (lane-dense output stores)
GPAD = 128     # each GRU gate gets its own 128-lane slab (vreg-aligned slices)
HPAD = 128     # hidden state padded to a full 128-lane row (padded lanes stay exactly 0)


def _pad_cols(a, width):
    return jnp.concatenate(
        [a, jnp.zeros((a.shape[0], width - a.shape[1]), a.dtype)], axis=1)


def _fused_decoder_kernel(H, L, T,
                          emb_att_ref, emb_comb_ref, enc_proj_ref, h0_ref,
                          w_hid_ref, b_hid_ref, w_ih_ref, b_ih_ref,
                          w_out_ref, b_out_ref,
                          logp_ref, hout_ref, hs_ref):
    L2 = 2 * L
    # TODO(synk): nn.Dropout(p=0.1) is identity in eval mode; training-mode RNG dropout not implemented.

    def step(t, hid):
        # hid: (1, HPAD) with lanes [H:] exactly zero.
        # Single MXU pass for everything hidden-dependent:
        #   [attn0 logits (L) | attn1 logits (L) | gh_r (128) | gh_z (128) | gh_n (128)]
        y = jnp.dot(hid, w_hid_ref[...],
                    preferred_element_type=jnp.float32) + b_hid_ref[...]        # (1, 2L+3*GPAD)

        # Attention logits = precomputed embedding part (incl. bias) + hidden part.
        att = emb_att_ref[pl.ds(t, 1), :] + y[:, :L2]                            # (1, 2L)
        # Both heads' softmax in one (2, L) reduction (head per sublane).
        a2 = att.reshape(2, L)
        m = jnp.max(a2, axis=1, keepdims=True)
        e = jnp.exp(a2 - m)
        d = jnp.sum(e, axis=1, keepdims=True)
        r0 = pl.reciprocal(d, approx=True)              # EUP slot
        rcp = r0 * (2.0 - d * r0)                       # one Newton step -> ~f32 exact
        aw = (e * rcp).reshape(1, L2)                                            # (1, 2L)

        # Context for both heads fused with the (pre-averaged) combine projection: one MXU pass.
        ctx = jnp.dot(aw, enc_proj_ref[...], preferred_element_type=jnp.float32)  # (1, H)
        x = jnp.maximum(emb_comb_ref[pl.ds(t, 1), :] + ctx, 0.0)                  # (1, H)

        # Single-step GRU (PyTorch gate order r, z, n); all slices are 128-lane aligned slabs.
        gi = jnp.dot(x, w_ih_ref[...],
                     preferred_element_type=jnp.float32) + b_ih_ref[...]          # (1, 3*GPAD)
        gh = y[:, L2:]                                                             # (1, 3*GPAD)
        r = jax.nn.sigmoid(gi[:, 0:GPAD] + gh[:, 0:GPAD])
        z = jax.nn.sigmoid(gi[:, GPAD:2 * GPAD] + gh[:, GPAD:2 * GPAD])
        n = jnp.tanh(gi[:, 2 * GPAD:3 * GPAD] + r * gh[:, 2 * GPAD:3 * GPAD])
        h_new = (1.0 - z) * n + z * hid          # padded lanes: 0.5*0 + 0.5*0 -> stay exactly 0
        hs_ref[pl.ds(t, 1), :] = h_new           # stash for the batched vocab head
        return h_new

    if T <= 16:
        # Fully unrolled: static slices, lets the scheduler overlap off-chain work across steps.
        hid = h0_ref[...]
        for t in range(T):
            hid = step(t, hid)
        h_final = hid
    else:
        h_final = jax.lax.fori_loop(0, T, step, h0_ref[...], unroll=4)
    hout_ref[...] = h_final

    # Vocab head batched over all T steps: one matmul + one lane-wise log_softmax + one store.
    hs = hs_ref[...]                                                              # (T, HPAD)
    logits = jnp.dot(hs, w_out_ref[...],
                     preferred_element_type=jnp.float32) + b_out_ref[...]         # (T, VPAD)
    m = jnp.max(logits, axis=1, keepdims=True)
    s = logits - m
    lse = jnp.log(jnp.sum(jnp.exp(s), axis=1, keepdims=True))
    logp_ref[...] = s - lse


def fuse_params(p, H=HIDDEN, L=MAXLEN, V=OUTPUT):
    """Pack PyTorch-layout parameters into the fused, 128-lane-aligned kernel operands (once)."""
    f32 = jnp.float32
    # Embedding / hidden halves of the two attention heads.
    w_att_emb = jnp.concatenate([p["wa0"][:H], p["wa1"][:H]], axis=1)            # (H, 2L)
    w_att_hid = jnp.concatenate([p["wa0"][H:], p["wa1"][H:]], axis=1)            # (H, 2L)
    b_att = jnp.concatenate([p["ba0"], p["ba1"]], axis=1)                        # (1, 2L)
    # relu(mean(combine0, combine1)) -> pre-averaged weights; emb part precomputed per call.
    w_comb_emb = 0.5 * (p["wc0"][:H] + p["wc1"][:H])                             # (H, H)
    b_comb = 0.5 * (p["bc0"] + p["bc1"])                                         # (1, H)
    w_ctx0 = 0.5 * p["wc0"][H:]                                                  # (H, H)
    w_ctx1 = 0.5 * p["wc1"][H:]                                                  # (H, H)

    def gate_slabs(w, b):  # w: (H, 3H), b: (1, 3H) -> each gate in its own 128-lane slab
        ws = [_pad_cols(w[:, g * H:(g + 1) * H], GPAD) for g in range(3)]
        bs = [_pad_cols(b[:, g * H:(g + 1) * H], GPAD) for g in range(3)]
        return jnp.concatenate(ws, axis=1), jnp.concatenate(bs, axis=1)

    whh_slab, bhh_slab = gate_slabs(p["whh"], p["bhh"])
    wih_slab, bih_slab = gate_slabs(p["wih"], p["bih"])

    # Hidden-dependent packed weight: rows padded to HPAD so the padded hidden row multiplies
    # exact-zero rows (free on the MXU, keeps h 128-lane aligned across steps).
    w_hid = jnp.concatenate([w_att_hid, whh_slab], axis=1)                       # (H, 2L+3*GPAD)
    w_hid = jnp.concatenate(
        [w_hid, jnp.zeros((HPAD - H, w_hid.shape[1]), f32)], axis=0)             # (HPAD, 2L+3*GPAD)
    b_hid = jnp.concatenate([jnp.zeros((1, 2 * L), f32), bhh_slab], axis=1)      # (1, 2L+3*GPAD)

    # Vocab head padded to (HPAD, VPAD); padded logit columns get a -1e30 bias.
    w_out = _pad_cols(p["wout"], VPAD)
    w_out = jnp.concatenate([w_out, jnp.zeros((HPAD - H, VPAD), f32)], axis=0)   # (HPAD, VPAD)
    b_out = jnp.concatenate([p["bout"], jnp.full((1, VPAD - V), -1e30, f32)], axis=1)

    return {
        "embedding": p["embedding"].astype(f32),
        "w_att_emb": w_att_emb, "b_att": b_att,
        "w_comb_emb": w_comb_emb, "b_comb": b_comb,
        "w_ctx0": w_ctx0, "w_ctx1": w_ctx1,
        "w_hid": w_hid, "b_hid": b_hid,
        "w_ih": wih_slab, "b_ih": bih_slab,
        "w_out": w_out, "b_out": b_out,
    }


@jax.jit
def multi_attn_decode(fused, tokens, hidden, encoder_outputs):
    """Fused T-step decode.  tokens: (T,) int32; hidden: (1,1,H); enc: (L,H).
    Returns (log_probs (T, V), final_hidden (1,1,H)); each step matches
    MultiAttnDecoderRNN.forward (eval mode)."""
    H, L, V, VP = HIDDEN, MAXLEN, OUTPUT, VPAD
    T = tokens.shape[0]

    # Batched, off-the-serial-chain precompute (one XLA pass for all T steps / the encoder).
    embs = fused["embedding"][tokens].astype(jnp.float32)                        # (T, H)
    emb_att = embs @ fused["w_att_emb"] + fused["b_att"]                         # (T, 2L)
    emb_comb = embs @ fused["w_comb_emb"] + fused["b_comb"]                      # (T, H)
    enc = encoder_outputs.astype(jnp.float32)
    enc_proj = jnp.concatenate([enc @ fused["w_ctx0"], enc @ fused["w_ctx1"]],
                               axis=0)                                           # (2L, H)
    h0 = jnp.zeros((1, HPAD), jnp.float32).at[:, :H].set(
        hidden.reshape(1, H).astype(jnp.float32))                                # padded hidden

    operands = (emb_att, emb_comb, enc_proj, h0,
                fused["w_hid"], fused["b_hid"], fused["w_ih"], fused["b_ih"],
                fused["w_out"], fused["b_out"])

    def resident(a):  # whole array VMEM-resident for the single grid point (DMA'd once)
        return pl.BlockSpec(a.shape, lambda i, _n=a.ndim: (0,) * _n)

    grid_spec = pltpu.PrefetchScalarGridSpec(
        num_scalar_prefetch=0,
        grid=(1,),                                   # single invocation; step loop is in-kernel
        in_specs=[resident(a) for a in operands],
        out_specs=(pl.BlockSpec((T, VP), lambda i: (0, 0)),
                   pl.BlockSpec((1, HPAD), lambda i: (0, 0))),
        scratch_shapes=[pltpu.VMEM((T, HPAD), jnp.float32)],   # per-step hidden rows
    )

    logp_pad, h_pad = pl.pallas_call(
        partial(_fused_decoder_kernel, H, L, T),
        out_shape=(jax.ShapeDtypeStruct((T, VP), jnp.float32),
                   jax.ShapeDtypeStruct((1, HPAD), jnp.float32)),
        grid_spec=grid_spec,
        compiler_params=pltpu.CompilerParams(dimension_semantics=("arbitrary",)),
    )(*operands)

    return logp_pad[:, :V], h_pad[:, :H].reshape(1, 1, H)


def multi_attn_decoder_step(fused, token, hidden, encoder_outputs):
    """Single step with the PyTorch module's forward signature: -> (log_probs, hidden, None)."""
    tokens = jnp.asarray(token, jnp.int32).reshape(1)
    logp, h_new = multi_attn_decode(fused, tokens, hidden, encoder_outputs)
    return logp, h_new, None


def init_params(key, H=HIDDEN, L=MAXLEN, V=OUTPUT):
    ks = jax.random.split(key, 16)

    def lin(kw, kb, fan_in, fan_out):
        bound = 1.0 / float(fan_in) ** 0.5
        w = jax.random.uniform(kw, (fan_in, fan_out), jnp.float32, -bound, bound)
        b = jax.random.uniform(kb, (1, fan_out), jnp.float32, -bound, bound)
        return w, b

    p = {}
    p["embedding"] = jax.random.normal(ks[0], (V, H), jnp.float32)
    p["wa0"], p["ba0"] = lin(ks[1], ks[2], 2 * H, L)
    p["wa1"], p["ba1"] = lin(ks[3], ks[4], 2 * H, L)
    p["wc0"], p["bc0"] = lin(ks[5], ks[6], 2 * H, H)
    p["wc1"], p["bc1"] = lin(ks[7], ks[8], 2 * H, H)
    bound = 1.0 / float(H) ** 0.5
    p["wih"] = jax.random.uniform(ks[9], (H, 3 * H), jnp.float32, -bound, bound)
    p["whh"] = jax.random.uniform(ks[10], (H, 3 * H), jnp.float32, -bound, bound)
    p["bih"] = jax.random.uniform(ks[11], (1, 3 * H), jnp.float32, -bound, bound)
    p["bhh"] = jax.random.uniform(ks[12], (1, 3 * H), jnp.float32, -bound, bound)
    p["wout"], p["bout"] = lin(ks[13], ks[14], H, V)
    return p


def reference_step(params, token, hidden, encoder_outputs):
    """Pure-JAX mirror of the PyTorch forward (eval mode) for validation."""
    H = HIDDEN
    emb = params["embedding"][token].reshape(1, H)
    hid = hidden.reshape(1, H)
    cat_eh = jnp.concatenate([emb, hid], axis=1)
    aw0 = jax.nn.softmax(cat_eh @ params["wa0"] + params["ba0"], axis=1)
    aw1 = jax.nn.softmax(cat_eh @ params["wa1"] + params["ba1"], axis=1)
    ap0 = aw0 @ encoder_outputs
    ap1 = aw1 @ encoder_outputs
    l0 = jnp.concatenate([emb, ap0], axis=1) @ params["wc0"] + params["bc0"]
    l1 = jnp.concatenate([emb, ap1], axis=1) @ params["wc1"] + params["bc1"]
    x = jax.nn.relu(0.5 * (l0 + l1))
    gi = x @ params["wih"] + params["bih"]
    gh = hid @ params["whh"] + params["bhh"]
    r = jax.nn.sigmoid(gi[:, :H] + gh[:, :H])
    z = jax.nn.sigmoid(gi[:, H:2 * H] + gh[:, H:2 * H])
    n = jnp.tanh(gi[:, 2 * H:] + r * gh[:, 2 * H:])
    h_new = (1.0 - z) * n + z * hid
    logits = h_new @ params["wout"] + params["bout"]
    return jax.nn.log_softmax(logits, axis=1), h_new.reshape(1, 1, H)


def reference_decode(params, tokens, hidden, encoder_outputs):
    logps = []
    hid = hidden
    for t in range(tokens.shape[0]):
        lp, hid = reference_step(params, tokens[t], hid, encoder_outputs)
        logps.append(lp)
    return jnp.concatenate(logps, axis=0), hid


if __name__ == "__main__":
    key = jax.random.PRNGKey(0)
    pkey, ekey, tkey = jax.random.split(key, 3)
    params = init_params(pkey)
    fused = fuse_params(params)

    T = 8
    tokens = jax.random.randint(tkey, (T,), 0, OUTPUT, dtype=jnp.int32)
    hidden0 = jnp.zeros((1, 1, HIDDEN), jnp.float32)                 # initHidden()
    encoder_outputs = jax.random.normal(ekey, (MAXLEN, HIDDEN), jnp.float32)

    # Fused multi-step decode: ONE pallas_call for all T steps.
    logp_seq, h_final = multi_attn_decode(fused, tokens, hidden0, encoder_outputs)
    jax.block_until_ready((logp_seq, h_final))

    ref_logp, ref_hid = reference_decode(params, tokens, hidden0, encoder_outputs)
    assert logp_seq.shape == (T, OUTPUT) and h_final.shape == (1, 1, HIDDEN)
    assert jnp.allclose(logp_seq, ref_logp, atol=1e-4, rtol=1e-4), \
        float(jnp.max(jnp.abs(logp_seq - ref_logp)))
    assert jnp.allclose(h_final, ref_hid, atol=1e-4, rtol=1e-4)

    # Single-step API (mirrors MultiAttnDecoderRNN.forward outputs).
    logp1, h1, attn = multi_attn_decoder_step(fused, tokens[0], hidden0, encoder_outputs)
    jax.block_until_ready((logp1, h1))
    ref1_logp, ref1_hid = reference_step(params, tokens[0], hidden0, encoder_outputs)
    assert attn is None and logp1.shape == (1, OUTPUT) and h1.shape == (1, 1, HIDDEN)
    assert jnp.allclose(logp1, ref1_logp, atol=1e-4, rtol=1e-4)
    assert jnp.allclose(h1, ref1_hid, atol=1e-4, rtol=1e-4)

    print("KERNEL_OK")
</pallas_src>

<mosaic_0001>
module attributes {stable_mosaic.version = 11 : i64} {
  func.func @_fused_decoder_kernel(%arg0: i32, %arg1: memref<8x256xf32, #tpu.memory_space<vmem>>, %arg2: memref<8x32xf32, #tpu.memory_space<vmem>>, %arg3: memref<256x32xf32, #tpu.memory_space<vmem>>, %arg4: memref<1x128xf32, #tpu.memory_space<vmem>>, %arg5: memref<128x640xf32, #tpu.memory_space<vmem>>, %arg6: memref<1x640xf32, #tpu.memory_space<vmem>>, %arg7: memref<32x384xf32, #tpu.memory_space<vmem>>, %arg8: memref<1x384xf32, #tpu.memory_space<vmem>>, %arg9: memref<128x128xf32, #tpu.memory_space<vmem>>, %arg10: memref<1x128xf32, #tpu.memory_space<vmem>>, %arg11: memref<8x128xf32, #tpu.memory_space<vmem>>, %arg12: memref<1x128xf32, #tpu.memory_space<vmem>>, %arg13: memref<8x128xf32, #tpu.memory_space<vmem>>) attributes {dimension_semantics = [#tpu.dimension_semantics<arbitrary>], iteration_bounds = array<i64: 1>, scalar_prefetch = 0 : i64, scratch_operands = 1 : i64, tpu.core_type = #tpu.core_type<tc>, window_params = [{pipeline_mode = #tpu.pipeline_mode<synchronous>, transform_indices = @transform_0, window_bounds = array<i64: 8, 256>}, {pipeline_mode = #tpu.pipeline_mode<synchronous>, transform_indices = @transform_1, window_bounds = array<i64: 8, 32>}, {pipeline_mode = #tpu.pipeline_mode<synchronous>, transform_indices = @transform_2, window_bounds = array<i64: 256, 32>}, {pipeline_mode = #tpu.pipeline_mode<synchronous>, transform_indices = @transform_3, window_bounds = array<i64: 1, 128>}, {pipeline_mode = #tpu.pipeline_mode<synchronous>, transform_indices = @transform_4, window_bounds = array<i64: 128, 640>}, {pipeline_mode = #tpu.pipeline_mode<synchronous>, transform_indices = @transform_5, window_bounds = array<i64: 1, 640>}, {pipeline_mode = #tpu.pipeline_mode<synchronous>, transform_indices = @transform_6, window_bounds = array<i64: 32, 384>}, {pipeline_mode = #tpu.pipeline_mode<synchronous>, transform_indices = @transform_7, window_bounds = array<i64: 1, 384>}, {pipeline_mode = #tpu.pipeline_mode<synchronous>, transform_indices = @transform_8, window_bounds = array<i64: 128, 128>}, {pipeline_mode = #tpu.pipeline_mode<synchronous>, transform_indices = @transform_9, window_bounds = array<i64: 1, 128>}, {pipeline_mode = #tpu.pipeline_mode<synchronous>, transform_indices = @transform_10, window_bounds = array<i64: 8, 128>}, {pipeline_mode = #tpu.pipeline_mode<synchronous>, transform_indices = @transform_11, window_bounds = array<i64: 1, 128>}]} {
    %c0 = arith.constant 0 : index
    %c0_0 = arith.constant 0 : index
    %0 = vector.load %arg4[%c0, %c0_0] : memref<1x128xf32, #tpu.memory_space<vmem>>, vector<1x128xf32>
    %c0_1 = arith.constant 0 : index
    %c0_2 = arith.constant 0 : index
    %1 = vector.load %arg5[%c0_1, %c0_2] : memref<128x640xf32, #tpu.memory_space<vmem>>, vector<128x640xf32>
    %cst = arith.constant dense<0.000000e+00> : vector<1x640xf32>
    %2 = tpu.matmul %0, %1, %cst {dimension_numbers = #tpu.dot_dimension_numbers<[1], [0], [0], [1], [0, 0, 1, 1], [], []>} : vector<1x128xf32>, vector<128x640xf32>, vector<1x640xf32> -> vector<1x640xf32>
    %c0_3 = arith.constant 0 : index
    %c0_4 = arith.constant 0 : index
    %3 = vector.load %arg6[%c0_3, %c0_4] : memref<1x640xf32, #tpu.memory_space<vmem>>, vector<1x640xf32>
    %4 = arith.addf %2, %3 : vector<1x640xf32>
    %c0_5 = arith.constant 0 : index
    %c0_6 = arith.constant 0 : index
    %5 = vector.load %arg1[%c0_5, %c0_6] : memref<8x256xf32, #tpu.memory_space<vmem>>, vector<1x256xf32>
    %6 = vector.extract_strided_slice %4 {offsets = [0, 0], sizes = [1, 256], strides = [1, 1]} : vector<1x640xf32> to vector<1x256xf32>
    %7 = arith.addf %5, %6 : vector<1x256xf32>
    %8 = vector.shape_cast %7 : vector<1x256xf32> to vector<2x128xf32>
    %cst_7 = arith.constant dense<0xFF800000> : vector<2xf32>
    %9 = vector.multi_reduction <maximumf>, %8, %cst_7 [1] : vector<2x128xf32> to vector<2xf32>
    %10 = vector.shape_cast %9 : vector<2xf32> to vector<2x1xf32>
    %11 = vector.broadcast %10 : vector<2x1xf32> to vector<2x128xf32>
    %12 = arith.subf %8, %11 : vector<2x128xf32>
    %13 = math.exp %12 : vector<2x128xf32>
    %cst_8 = arith.constant dense<0.000000e+00> : vector<2xf32>
    %14 = vector.multi_reduction <add>, %13, %cst_8 [1] : vector<2x128xf32> to vector<2xf32>
    %15 = vector.shape_cast %14 : vector<2xf32> to vector<2x1xf32>
    %16 = tpu.reciprocal %15 {approx = true} : vector<2x1xf32> -> vector<2x1xf32>
    %17 = arith.mulf %15, %16 : vector<2x1xf32>
    %cst_9 = arith.constant 2.000000e+00 : f32
    %18 = vector.broadcast %cst_9 : f32 to vector<2x1xf32>
    %19 = arith.subf %18, %17 : vector<2x1xf32>
    %20 = arith.mulf %16, %19 : vector<2x1xf32>
    %21 = vector.broadcast %20 : vector<2x1xf32> to vector<2x128xf32>
    %22 = arith.mulf %13, %21 : vector<2x128xf32>
    %23 = vector.shape_cast %22 : vector<2x128xf32> to vector<1x256xf32>
    %c0_10 = arith.constant 0 : index
    %c0_11 = arith.constant 0 : index
    %24 = vector.load %arg3[%c0_10, %c0_11] : memref<256x32xf32, #tpu.memory_space<vmem>>, vector<256x32xf32>
    %cst_12 = arith.constant dense<0.000000e+00> : vector<1x32xf32>
    %25 = tpu.matmul %23, %24, %cst_12 {dimension_numbers = #tpu.dot_dimension_numbers<[1], [0], [0], [1], [0, 0, 1, 1], [], []>} : vector<1x256xf32>, vector<256x32xf32>, vector<1x32xf32> -> vector<1x32xf32>
    %c0_13 = arith.constant 0 : index
    %c0_14 = arith.constant 0 : index
    %26 = vector.load %arg2[%c0_13, %c0_14] : memref<8x32xf32, #tpu.memory_space<vmem>>, vector<1x32xf32>
    %27 = arith.addf %26, %25 : vector<1x32xf32>
    %cst_15 = arith.constant 0.000000e+00 : f32
    %28 = vector.broadcast %cst_15 : f32 to vector<1x32xf32>
    %29 = arith.maximumf %27, %28 : vector<1x32xf32>
    %c0_16 = arith.constant 0 : index
    %c0_17 = arith.constant 0 : index
    %30 = vector.load %arg7[%c0_16, %c0_17] : memref<32x384xf32, #tpu.memory_space<vmem>>, vector<32x384xf32>
    %cst_18 = arith.constant dense<0.000000e+00> : vector<1x384xf32>
    %31 = tpu.matmul %29, %30, %cst_18 {dimension_numbers = #tpu.dot_dimension_numbers<[1], [0], [0], [1], [0, 0, 1, 1], [], []>} : vector<1x32xf32>, vector<32x384xf32>, vector<1x384xf32> -> vector<1x384xf32>
    %c0_19 = arith.constant 0 : index
    %c0_20 = arith.constant 0 : index
    %32 = vector.load %arg8[%c0_19, %c0_20] : memref<1x384xf32, #tpu.memory_space<vmem>>, vector<1x384xf32>
    %33 = arith.addf %31, %32 : vector<1x384xf32>
    %34 = vector.extract_strided_slice %4 {offsets = [0, 256], sizes = [1, 384], strides = [1, 1]} : vector<1x640xf32> to vector<1x384xf32>
    %35 = vector.extract_strided_slice %33 {offsets = [0, 0], sizes = [1, 128], strides = [1, 1]} : vector<1x384xf32> to vector<1x128xf32>
    %36 = vector.extract_strided_slice %34 {offsets = [0, 0], sizes = [1, 128], strides = [1, 1]} : vector<1x384xf32> to vector<1x128xf32>
    %37 = arith.addf %35, %36 : vector<1x128xf32>
    %38 = arith.negf %37 : vector<1x128xf32>
    %39 = math.exp %38 : vector<1x128xf32>
    %cst_21 = arith.constant 1.000000e+00 : f32
    %40 = vector.broadcast %cst_21 : f32 to vector<1x128xf32>
    %41 = arith.addf %40, %39 : vector<1x128xf32>
    %42 = arith.divf %40, %41 : vector<1x128xf32>
    %43 = vector.extract_strided_slice %33 {offsets = [0, 128], sizes = [1, 128], strides = [1, 1]} : vector<1x384xf32> to vector<1x128xf32>
    %44 = vector.extract_strided_slice %34 {offsets = [0, 128], sizes = [1, 128], strides = [1, 1]} : vector<1x384xf32> to vector<1x128xf32>
    %45 = arith.addf %43, %44 : vector<1x128xf32>
    %46 = arith.negf %45 : vector<1x128xf32>
    %47 = math.exp %46 : vector<1x128xf32>
    %cst_22 = arith.constant 1.000000e+00 : f32
    %48 = vector.broadcast %cst_22 : f32 to vector<1x128xf32>
    %49 = arith.addf %48, %47 : vector<1x128xf32>
    %50 = arith.divf %48, %49 : vector<1x128xf32>
    %51 = vector.extract_strided_slice %33 {offsets = [0, 256], sizes = [1, 128], strides = [1, 1]} : vector<1x384xf32> to vector<1x128xf32>
    %52 = vector.extract_strided_slice %34 {offsets = [0, 256], sizes = [1, 128], strides = [1, 1]} : vector<1x384xf32> to vector<1x128xf32>
    %53 = arith.mulf %42, %52 : vector<1x128xf32>
    %54 = arith.addf %51, %53 : vector<1x128xf32>
    %55 = math.tanh %54 : vector<1x128xf32>
    %cst_23 = arith.constant 1.000000e+00 : f32
    %56 = vector.broadcast %cst_23 : f32 to vector<1x128xf32>
    %57 = arith.subf %56, %50 : vector<1x128xf32>
    %58 = arith.mulf %57, %55 : vector<1x128xf32>
    %59 = arith.mulf %50, %0 : vector<1x128xf32>
    %60 = arith.addf %58, %59 : vector<1x128xf32>
    %c0_24 = arith.constant 0 : index
    %c0_25 = arith.constant 0 : index
    %61 = vector.load %arg13[%c0_24, %c0_25] : memref<8x128xf32, #tpu.memory_space<vmem>>, vector<1x128xf32>
    tpu.vector_store %arg13[%c0_24, %c0_25], %60 {strides = array<i32>} : memref<8x128xf32, #tpu.memory_space<vmem>>, vector<1x128xf32>,
    %c0_26 = arith.constant 0 : index
    %c0_27 = arith.constant 0 : index
    %62 = vector.load %arg5[%c0_26, %c0_27] : memref<128x640xf32, #tpu.memory_space<vmem>>, vector<128x640xf32>
    %cst_28 = arith.constant dense<0.000000e+00> : vector<1x640xf32>
    %63 = tpu.matmul %60, %62, %cst_28 {dimension_numbers = #tpu.dot_dimension_numbers<[1], [0], [0], [1], [0, 0, 1, 1], [], []>} : vector<1x128xf32>, vector<128x640xf32>, vector<1x640xf32> -> vector<1x640xf32>
    %c0_29 = arith.constant 0 : index
    %c0_30 = arith.constant 0 : index
    %64 = vector.load %arg6[%c0_29, %c0_30] : memref<1x640xf32, #tpu.memory_space<vmem>>, vector<1x640xf32>
    %65 = arith.addf %63, %64 : vector<1x640xf32>
    %c1 = arith.constant 1 : index
    %c0_31 = arith.constant 0 : index
    %66 = vector.load %arg1[%c1, %c0_31] : memref<8x256xf32, #tpu.memory_space<vmem>>, vector<1x256xf32>
    %67 = vector.extract_strided_slice %65 {offsets = [0, 0], sizes = [1, 256], strides = [1, 1]} : vector<1x640xf32> to vector<1x256xf32>
    %68 = arith.addf %66, %67 : vector<1x256xf32>
    %69 = vector.shape_cast %68 : vector<1x256xf32> to vector<2x128xf32>
    %cst_32 = arith.constant dense<0xFF800000> : vector<2xf32>
    %70 = vector.multi_reduction <maximumf>, %69, %cst_32 [1] : vector<2x128xf32> to vector<2xf32>
    %71 = vector.shape_cast %70 : vector<2xf32> to vector<2x1xf32>
    %72 = vector.broadcast %71 : vector<2x1xf32> to vector<2x128xf32>
    %73 = arith.subf %69, %72 : vector<2x128xf32>
    %74 = math.exp %73 : vector<2x128xf32>
    %cst_33 = arith.constant dense<0.000000e+00> : vector<2xf32>
    %75 = vector.multi_reduction <add>, %74, %cst_33 [1] : vector<2x128xf32> to vector<2xf32>
    %76 = vector.shape_cast %75 : vector<2xf32> to vector<2x1xf32>
    %77 = tpu.reciprocal %76 {approx = true} : vector<2x1xf32> -> vector<2x1xf32>
    %78 = arith.mulf %76, %77 : vector<2x1xf32>
    %cst_34 = arith.constant 2.000000e+00 : f32
    %79 = vector.broadcast %cst_34 : f32 to vector<2x1xf32>
    %80 = arith.subf %79, %78 : vector<2x1xf32>
    %81 = arith.mulf %77, %80 : vector<2x1xf32>
    %82 = vector.broadcast %81 : vector<2x1xf32> to vector<2x128xf32>
    %83 = arith.mulf %74, %82 : vector<2x128xf32>
    %84 = vector.shape_cast %83 : vector<2x128xf32> to vector<1x256xf32>
    %c0_35 = arith.constant 0 : index
    %c0_36 = arith.constant 0 : index
    %85 = vector.load %arg3[%c0_35, %c0_36] : memref<256x32xf32, #tpu.memory_space<vmem>>, vector<256x32xf32>
    %cst_37 = arith.constant dense<0.000000e+00> : vector<1x32xf32>
    %86 = tpu.matmul %84, %85, %cst_37 {dimension_numbers = #tpu.dot_dimension_numbers<[1], [0], [0], [1], [0, 0, 1, 1], [], []>} : vector<1x256xf32>, vector<256x32xf32>, vector<1x32xf32> -> vector<1x32xf32>
    %c1_38 = arith.constant 1 : index
    %c0_39 = arith.constant 0 : index
    %87 = vector.load %arg2[%c1_38, %c0_39] : memref<8x32xf32, #tpu.memory_space<vmem>>, vector<1x32xf32>
    %88 = arith.addf %87, %86 : vector<1x32xf32>
    %cst_40 = arith.constant 0.000000e+00 : f32
    %89 = vector.broadcast %cst_40 : f32 to vector<1x32xf32>
    %90 = arith.maximumf %88, %89 : vector<1x32xf32>
    %c0_41 = arith.constant 0 : index
    %c0_42 = arith.constant 0 : index
    %91 = vector.load %arg7[%c0_41, %c0_42] : memref<32x384xf32, #tpu.memory_space<vmem>>, vector<32x384xf32>
    %cst_43 = arith.constant dense<0.000000e+00> : vector<1x384xf32>
    %92 = tpu.matmul %90, %91, %cst_43 {dimension_numbers = #tpu.dot_dimension_numbers<[1], [0], [0], [1], [0, 0, 1, 1], [], []>} : vector<1x32xf32>, vector<32x384xf32>, vector<1x384xf32> -> vector<1x384xf32>
    %c0_44 = arith.constant 0 : index
    %c0_45 = arith.constant 0 : index
    %93 = vector.load %arg8[%c0_44, %c0_45] : memref<1x384xf32, #tpu.memory_space<vmem>>, vector<1x384xf32>
    %94 = arith.addf %92, %93 : vector<1x384xf32>
    %95 = vector.extract_strided_slice %65 {offsets = [0, 256], sizes = [1, 384], strides = [1, 1]} : vector<1x640xf32> to vector<1x384xf32>
    %96 = vector.extract_strided_slice %94 {offsets = [0, 0], sizes = [1, 128], strides = [1, 1]} : vector<1x384xf32> to vector<1x128xf32>
    %97 = vector.extract_strided_slice %95 {offsets = [0, 0], sizes = [1, 128], strides = [1, 1]} : vector<1x384xf32> to vector<1x128xf32>
    %98 = arith.addf %96, %97 : vector<1x128xf32>
    %99 = arith.negf %98 : vector<1x128xf32>
    %100 = math.exp %99 : vector<1x128xf32>
    %cst_46 = arith.constant 1.000000e+00 : f32
    %101 = vector.broadcast %cst_46 : f32 to vector<1x128xf32>
    %102 = arith.addf %101, %100 : vector<1x128xf32>
    %103 = arith.divf %101, %102 : vector<1x128xf32>
    %104 = vector.extract_strided_slice %94 {offsets = [0, 128], sizes = [1, 128], strides = [1, 1]} : vector<1x384xf32> to vector<1x128xf32>
    %105 = vector.extract_strided_slice %95 {offsets = [0, 128], sizes = [1, 128], strides = [1, 1]} : vector<1x384xf32> to vector<1x128xf32>
    %106 = arith.addf %104, %105 : vector<1x128xf32>
    %107 = arith.negf %106 : vector<1x128xf32>
    %108 = math.exp %107 : vector<1x128xf32>
    %cst_47 = arith.constant 1.000000e+00 : f32
    %109 = vector.broadcast %cst_47 : f32 to vector<1x128xf32>
    %110 = arith.addf %109, %108 : vector<1x128xf32>
    %111 = arith.divf %109, %110 : vector<1x128xf32>
    %112 = vector.extract_strided_slice %94 {offsets = [0, 256], sizes = [1, 128], strides = [1, 1]} : vector<1x384xf32> to vector<1x128xf32>
    %113 = vector.extract_strided_slice %95 {offsets = [0, 256], sizes = [1, 128], strides = [1, 1]} : vector<1x384xf32> to vector<1x128xf32>
    %114 = arith.mulf %103, %113 : vector<1x128xf32>
    %115 = arith.addf %112, %114 : vector<1x128xf32>
    %116 = math.tanh %115 : vector<1x128xf32>
    %cst_48 = arith.constant 1.000000e+00 : f32
    %117 = vector.broadcast %cst_48 : f32 to vector<1x128xf32>
    %118 = arith.subf %117, %111 : vector<1x128xf32>
    %119 = arith.mulf %118, %116 : vector<1x128xf32>
    %120 = arith.mulf %111, %60 : vector<1x128xf32>
    %121 = arith.addf %119, %120 : vector<1x128xf32>
    %c1_49 = arith.constant 1 : index
    %c0_50 = arith.constant 0 : index
    %122 = vector.load %arg13[%c1_49, %c0_50] : memref<8x128xf32, #tpu.memory_space<vmem>>, vector<1x128xf32>
    tpu.vector_store %arg13[%c1_49, %c0_50], %121 {strides = array<i32>} : memref<8x128xf32, #tpu.memory_space<vmem>>, vector<1x128xf32>,
    %c0_51 = arith.constant 0 : index
    %c0_52 = arith.constant 0 : index
    %123 = vector.load %arg5[%c0_51, %c0_52] : memref<128x640xf32, #tpu.memory_space<vmem>>, vector<128x640xf32>
    %cst_53 = arith.constant dense<0.000000e+00> : vector<1x640xf32>
    %124 = tpu.matmul %121, %123, %cst_53 {dimension_numbers = #tpu.dot_dimension_numbers<[1], [0], [0], [1], [0, 0, 1, 1], [], []>} : vector<1x128xf32>, vector<128x640xf32>, vector<1x640xf32> -> vector<1x640xf32>
    %c0_54 = arith.constant 0 : index
    %c0_55 = arith.constant 0 : index
    %125 = vector.load %arg6[%c0_54, %c0_55] : memref<1x640xf32, #tpu.memory_space<vmem>>, vector<1x640xf32>
    %126 = arith.addf %124, %125 : vector<1x640xf32>
    %c2 = arith.constant 2 : index
    %c0_56 = arith.constant 0 : index
    %127 = vector.load %arg1[%c2, %c0_56] : memref<8x256xf32, #tpu.memory_space<vmem>>, vector<1x256xf32>
    %128 = vector.extract_strided_slice %126 {offsets = [0, 0], sizes = [1, 256], strides = [1, 1]} : vector<1x640xf32> to vector<1x256xf32>
    %129 = arith.addf %127, %128 : vector<1x256xf32>
    %130 = vector.shape_cast %129 : vector<1x256xf32> to vector<2x128xf32>
    %cst_57 = arith.constant dense<0xFF800000> : vector<2xf32>
    %131 = vector.multi_reduction <maximumf>, %130, %cst_57 [1] : vector<2x128xf32> to vector<2xf32>
    %132 = vector.shape_cast %131 : vector<2xf32> to vector<2x1xf32>
    %133 = vector.broadcast %132 : vector<2x1xf32> to vector<2x128xf32>
    %134 = arith.subf %130, %133 : vector<2x128xf32>
    %135 = math.exp %134 : vector<2x128xf32>
    %cst_58 = arith.constant dense<0.000000e+00> : vector<2xf32>
    %136 = vector.multi_reduction <add>, %135, %cst_58 [1] : vector<2x128xf32> to vector<2xf32>
    %137 = vector.shape_cast %136 : vector<2xf32> to vector<2x1xf32>
    %138 = tpu.reciprocal %137 {approx = true} : vector<2x1xf32> -> vector<2x1xf32>
    %139 = arith.mulf %137, %138 : vector<2x1xf32>
    %cst_59 = arith.constant 2.000000e+00 : f32
    %140 = vector.broadcast %cst_59 : f32 to vector<2x1xf32>
    %141 = arith.subf %140, %139 : vector<2x1xf32>
    %142 = arith.mulf %138, %141 : vector<2x1xf32>
    %143 = vector.broadcast %142 : vector<2x1xf32> to vector<2x128xf32>
    %144 = arith.mulf %135, %143 : vector<2x128xf32>
    %145 = vector.shape_cast %144 : vector<2x128xf32> to vector<1x256xf32>
    %c0_60 = arith.constant 0 : index
    %c0_61 = arith.constant 0 : index
    %146 = vector.load %arg3[%c0_60, %c0_61] : memref<256x32xf32, #tpu.memory_space<vmem>>, vector<256x32xf32>
    %cst_62 = arith.constant dense<0.000000e+00> : vector<1x32xf32>
    %147 = tpu.matmul %145, %146, %cst_62 {dimension_numbers = #tpu.dot_dimension_numbers<[1], [0], [0], [1], [0, 0, 1, 1], [], []>} : vector<1x256xf32>, vector<256x32xf32>, vector<1x32xf32> -> vector<1x32xf32>
    %c2_63 = arith.constant 2 : index
    %c0_64 = arith.constant 0 : index
    %148 = vector.load %arg2[%c2_63, %c0_64] : memref<8x32xf32, #tpu.memory_space<vmem>>, vector<1x32xf32>
    %149 = arith.addf %148, %147 : vector<1x32xf32>
    %cst_65 = arith.constant 0.000000e+00 : f32
    %150 = vector.broadcast %cst_65 : f32 to vector<1x32xf32>
    %151 = arith.maximumf %149, %150 : vector<1x32xf32>
    %c0_66 = arith.constant 0 : index
    %c0_67 = arith.constant 0 : index
    %152 = vector.load %arg7[%c0_66, %c0_67] : memref<32x384xf32, #tpu.memory_space<vmem>>, vector<32x384xf32>
    %cst_68 = arith.constant dense<0.000000e+00> : vector<1x384xf32>
    %153 = tpu.matmul %151, %152, %cst_68 {dimension_numbers = #tpu.dot_dimension_numbers<[1], [0], [0], [1], [0, 0, 1, 1], [], []>} : vector<1x32xf32>, vector<32x384xf32>, vector<1x384xf32> -> vector<1x384xf32>
    %c0_69 = arith.constant 0 : index
    %c0_70 = arith.constant 0 : index
    %154 = vector.load %arg8[%c0_69, %c0_70] : memref<1x384xf32, #tpu.memory_space<vmem>>, vector<1x384xf32>
    %155 = arith.addf %153, %154 : vector<1x384xf32>
    %156 = vector.extract_strided_slice %126 {offsets = [0, 256], sizes = [1, 384], strides = [1, 1]} : vector<1x640xf32> to vector<1x384xf32>
    %157 = vector.extract_strided_slice %155 {offsets = [0, 0], sizes = [1, 128], strides = [1, 1]} : vector<1x384xf32> to vector<1x128xf32>
    %158 = vector.extract_strided_slice %156 {offsets = [0, 0], sizes = [1, 128], strides = [1, 1]} : vector<1x384xf32> to vector<1x128xf32>
    %159 = arith.addf %157, %158 : vector<1x128xf32>
    %160 = arith.negf %159 : vector<1x128xf32>
    %161 = math.exp %160 : vector<1x128xf32>
    %cst_71 = arith.constant 1.000000e+00 : f32
    %162 = vector.broadcast %cst_71 : f32 to vector<1x128xf32>
    %163 = arith.addf %162, %161 : vector<1x128xf32>
    %164 = arith.divf %162, %163 : vector<1x128xf32>
    %165 = vector.extract_strided_slice %155 {offsets = [0, 128], sizes = [1, 128], strides = [1, 1]} : vector<1x384xf32> to vector<1x128xf32>
    %166 = vector.extract_strided_slice %156 {offsets = [0, 128], sizes = [1, 128], strides = [1, 1]} : vector<1x384xf32> to vector<1x128xf32>
    %167 = arith.addf %165, %166 : vector<1x128xf32>
    %168 = arith.negf %167 : vector<1x128xf32>
    %169 = math.exp %168 : vector<1x128xf32>
    %cst_72 = arith.constant 1.000000e+00 : f32
    %170 = vector.broadcast %cst_72 : f32 to vector<1x128xf32>
    %171 = arith.addf %170, %169 : vector<1x128xf32>
    %172 = arith.divf %170, %171 : vector<1x128xf32>
    %173 = vector.extract_strided_slice %155 {offsets = [0, 256], sizes = [1, 128], strides = [1, 1]} : vector<1x384xf32> to vector<1x128xf32>
    %174 = vector.extract_strided_slice %156 {offsets = [0, 256], sizes = [1, 128], strides = [1, 1]} : vector<1x384xf32> to vector<1x128xf32>
    %175 = arith.mulf %164, %174 : vector<1x128xf32>
    %176 = arith.addf %173, %175 : vector<1x128xf32>
    %177 = math.tanh %176 : vector<1x128xf32>
    %cst_73 = arith.constant 1.000000e+00 : f32
    %178 = vector.broadcast %cst_73 : f32 to vector<1x128xf32>
    %179 = arith.subf %178, %172 : vector<1x128xf32>
    %180 = arith.mulf %179, %177 : vector<1x128xf32>
    %181 = arith.mulf %172, %121 : vector<1x128xf32>
    %182 = arith.addf %180, %181 : vector<1x128xf32>
    %c2_74 = arith.constant 2 : index
    %c0_75 = arith.constant 0 : index
    %183 = vector.load %arg13[%c2_74, %c0_75] : memref<8x128xf32, #tpu.memory_space<vmem>>, vector<1x128xf32>
    tpu.vector_store %arg13[%c2_74, %c0_75], %182 {strides = array<i32>} : memref<8x128xf32, #tpu.memory_space<vmem>>, vector<1x128xf32>,
    %c0_76 = arith.constant 0 : index
    %c0_77 = arith.constant 0 : index
    %184 = vector.load %arg5[%c0_76, %c0_77] : memref<128x640xf32, #tpu.memory_space<vmem>>, vector<128x640xf32>
    %cst_78 = arith.constant dense<0.000000e+00> : vector<1x640xf32>
    %185 = tpu.matmul %182, %184, %cst_78 {dimension_numbers = #tpu.dot_dimension_numbers<[1], [0], [0], [1], [0, 0, 1, 1], [], []>} : vector<1x128xf32>, vector<128x640xf32>, vector<1x640xf32> -> vector<1x640xf32>
    %c0_79 = arith.constant 0 : index
    %c0_80 = arith.constant 0 : index
    %186 = vector.load %arg6[%c0_79, %c0_80] : memref<1x640xf32, #tpu.memory_space<vmem>>, vector<1x640xf32>
    %187 = arith.addf %185, %186 : vector<1x640xf32>
    %c3 = arith.constant 3 : index
    %c0_81 = arith.constant 0 : index
    %188 = vector.load %arg1[%c3, %c0_81] : memref<8x256xf32, #tpu.memory_space<vmem>>, vector<1x256xf32>
    %189 = vector.extract_strided_slice %187 {offsets = [0, 0], sizes = [1, 256], strides = [1, 1]} : vector<1x640xf32> to vector<1x256xf32>
    %190 = arith.addf %188, %189 : vector<1x256xf32>
    %191 = vector.shape_cast %190 : vector<1x256xf32> to vector<2x128xf32>
    %cst_82 = arith.constant dense<0xFF800000> : vector<2xf32>
    %192 = vector.multi_reduction <maximumf>, %191, %cst_82 [1] : vector<2x128xf32> to vector<2xf32>
    %193 = vector.shape_cast %192 : vector<2xf32> to vector<2x1xf32>
    %194 = vector.broadcast %193 : vector<2x1xf32> to vector<2x128xf32>
    %195 = arith.subf %191, %194 : vector<2x128xf32>
    %196 = math.exp %195 : vector<2x128xf32>
    %cst_83 = arith.constant dense<0.000000e+00> : vector<2xf32>
    %197 = vector.multi_reduction <add>, %196, %cst_83 [1] : vector<2x128xf32> to vector<2xf32>
    %198 = vector.shape_cast %197 : vector<2xf32> to vector<2x1xf32>
    %199 = tpu.reciprocal %198 {approx = true} : vector<2x1xf32> -> vector<2x1xf32>
    %200 = arith.mulf %198, %199 : vector<2x1xf32>
    %cst_84 = arith.constant 2.000000e+00 : f32
    %201 = vector.broadcast %cst_84 : f32 to vector<2x1xf32>
    %202 = arith.subf %201, %200 : vector<2x1xf32>
    %203 = arith.mulf %199, %202 : vector<2x1xf32>
    %204 = vector.broadcast %203 : vector<2x1xf32> to vector<2x128xf32>
    %205 = arith.mulf %196, %204 : vector<2x128xf32>
    %206 = vector.shape_cast %205 : vector<2x128xf32> to vector<1x256xf32>
    %c0_85 = arith.constant 0 : index
    %c0_86 = arith.constant 0 : index
    %207 = vector.load %arg3[%c0_85, %c0_86] : memref<256x32xf32, #tpu.memory_space<vmem>>, vector<256x32xf32>
    %cst_87 = arith.constant dense<0.000000e+00> : vector<1x32xf32>
    %208 = tpu.matmul %206, %207, %cst_87 {dimension_numbers = #tpu.dot_dimension_numbers<[1], [0], [0], [1], [0, 0, 1, 1], [], []>} : vector<1x256xf32>, vector<256x32xf32>, vector<1x32xf32> -> vector<1x32xf32>
    %c3_88 = arith.constant 3 : index
    %c0_89 = arith.constant 0 : index
    %209 = vector.load %arg2[%c3_88, %c0_89] : memref<8x32xf32, #tpu.memory_space<vmem>>, vector<1x32xf32>
    %210 = arith.addf %209, %208 : vector<1x32xf32>
    %cst_90 = arith.constant 0.000000e+00 : f32
    %211 = vector.broadcast %cst_90 : f32 to vector<1x32xf32>
    %212 = arith.maximumf %210, %211 : vector<1x32xf32>
    %c0_91 = arith.constant 0 : index
    %c0_92 = arith.constant 0 : index
    %213 = vector.load %arg7[%c0_91, %c0_92] : memref<32x384xf32, #tpu.memory_space<vmem>>, vector<32x384xf32>
    %cst_93 = arith.constant dense<0.000000e+00> : vector<1x384xf32>
    %214 = tpu.matmul %212, %213, %cst_93 {dimension_numbers = #tpu.dot_dimension_numbers<[1], [0], [0], [1], [0, 0, 1, 1], [], []>} : vector<1x32xf32>, vector<32x384xf32>, vector<1x384xf32> -> vector<1x384xf32>
    %c0_94 = arith.constant 0 : index
    %c0_95 = arith.constant 0 : index
    %215 = vector.load %arg8[%c0_94, %c0_95] : memref<1x384xf32, #tpu.memory_space<vmem>>, vector<1x384xf32>
    %216 = arith.addf %214, %215 : vector<1x384xf32>
    %217 = vector.extract_strided_slice %187 {offsets = [0, 256], sizes = [1, 384], strides = [1, 1]} : vector<1x640xf32> to vector<1x384xf32>
    %218 = vector.extract_strided_slice %216 {offsets = [0, 0], sizes = [1, 128], strides = [1, 1]} : vector<1x384xf32> to vector<1x128xf32>
    %219 = vector.extract_strided_slice %217 {offsets = [0, 0], sizes = [1, 128], strides = [1, 1]} : vector<1x384xf32> to vector<1x128xf32>
    %220 = arith.addf %218, %219 : vector<1x128xf32>
    %221 = arith.negf %220 : vector<1x128xf32>
    %222 = math.exp %221 : vector<1x128xf32>
    %cst_96 = arith.constant 1.000000e+00 : f32
    %223 = vector.broadcast %cst_96 : f32 to vector<1x128xf32>
    %224 = arith.addf %223, %222 : vector<1x128xf32>
    %225 = arith.divf %223, %224 : vector<1x128xf32>
    %226 = vector.extract_strided_slice %216 {offsets = [0, 128], sizes = [1, 128], strides = [1, 1]} : vector<1x384xf32> to vector<1x128xf32>
    %227 = vector.extract_strided_slice %217 {offsets = [0, 128], sizes = [1, 128], strides = [1, 1]} : vector<1x384xf32> to vector<1x128xf32>
    %228 = arith.addf %226, %227 : vector<1x128xf32>
    %229 = arith.negf %228 : vector<1x128xf32>
    %230 = math.exp %229 : vector<1x128xf32>
    %cst_97 = arith.constant 1.000000e+00 : f32
    %231 = vector.broadcast %cst_97 : f32 to vector<1x128xf32>
    %232 = arith.addf %231, %230 : vector<1x128xf32>
    %233 = arith.divf %231, %232 : vector<1x128xf32>
    %234 = vector.extract_strided_slice %216 {offsets = [0, 256], sizes = [1, 128], strides = [1, 1]} : vector<1x384xf32> to vector<1x128xf32>
    %235 = vector.extract_strided_slice %217 {offsets = [0, 256], sizes = [1, 128], strides = [1, 1]} : vector<1x384xf32> to vector<1x128xf32>
    %236 = arith.mulf %225, %235 : vector<1x128xf32>
    %237 = arith.addf %234, %236 : vector<1x128xf32>
    %238 = math.tanh %237 : vector<1x128xf32>
    %cst_98 = arith.constant 1.000000e+00 : f32
    %239 = vector.broadcast %cst_98 : f32 to vector<1x128xf32>
    %240 = arith.subf %239, %233 : vector<1x128xf32>
    %241 = arith.mulf %240, %238 : vector<1x128xf32>
    %242 = arith.mulf %233, %182 : vector<1x128xf32>
    %243 = arith.addf %241, %242 : vector<1x128xf32>
    %c3_99 = arith.constant 3 : index
    %c0_100 = arith.constant 0 : index
    %244 = vector.load %arg13[%c3_99, %c0_100] : memref<8x128xf32, #tpu.memory_space<vmem>>, vector<1x128xf32>
    tpu.vector_store %arg13[%c3_99, %c0_100], %243 {strides = array<i32>} : memref<8x128xf32, #tpu.memory_space<vmem>>, vector<1x128xf32>,
    %c0_101 = arith.constant 0 : index
    %c0_102 = arith.constant 0 : index
    %245 = vector.load %arg5[%c0_101, %c0_102] : memref<128x640xf32, #tpu.memory_space<vmem>>, vector<128x640xf32>
    %cst_103 = arith.constant dense<0.000000e+00> : vector<1x640xf32>
    %246 = tpu.matmul %243, %245, %cst_103 {dimension_numbers = #tpu.dot_dimension_numbers<[1], [0], [0], [1], [0, 0, 1, 1], [], []>} : vector<1x128xf32>, vector<128x640xf32>, vector<1x640xf32> -> vector<1x640xf32>
    %c0_104 = arith.constant 0 : index
    %c0_105 = arith.constant 0 : index
    %247 = vector.load %arg6[%c0_104, %c0_105] : memref<1x640xf32, #tpu.memory_space<vmem>>, vector<1x640xf32>
    %248 = arith.addf %246, %247 : vector<1x640xf32>
    %c4 = arith.constant 4 : index
    %c0_106 = arith.constant 0 : index
    %249 = vector.load %arg1[%c4, %c0_106] : memref<8x256xf32, #tpu.memory_space<vmem>>, vector<1x256xf32>
    %250 = vector.extract_strided_slice %248 {offsets = [0, 0], sizes = [1, 256], strides = [1, 1]} : vector<1x640xf32> to vector<1x256xf32>
    %251 = arith.addf %249, %250 : vector<1x256xf32>
    %252 = vector.shape_cast %251 : vector<1x256xf32> to vector<2x128xf32>
    %cst_107 = arith.constant dense<0xFF800000> : vector<2xf32>
    %253 = vector.multi_reduction <maximumf>, %252, %cst_107 [1] : vector<2x128xf32> to vector<2xf32>
    %254 = vector.shape_cast %253 : vector<2xf32> to vector<2x1xf32>
    %255 = vector.broadcast %254 : vector<2x1xf32> to vector<2x128xf32>
    %256 = arith.subf %252, %255 : vector<2x128xf32>
    %257 = math.exp %256 : vector<2x128xf32>
    %cst_108 = arith.constant dense<0.000000e+00> : vector<2xf32>
    %258 = vector.multi_reduction <add>, %257, %cst_108 [1] : vector<2x128xf32> to vector<2xf32>
    %259 = vector.shape_cast %258 : vector<2xf32> to vector<2x1xf32>
    %260 = tpu.reciprocal %259 {approx = true} : vector<2x1xf32> -> vector<2x1xf32>
    %261 = arith.mulf %259, %260 : vector<2x1xf32>
    %cst_109 = arith.constant 2.000000e+00 : f32
    %262 = vector.broadcast %cst_109 : f32 to vector<2x1xf32>
    %263 = arith.subf %262, %261 : vector<2x1xf32>
    %264 = arith.mulf %260, %263 : vector<2x1xf32>
    %265 = vector.broadcast %264 : vector<2x1xf32> to vector<2x128xf32>
    %266 = arith.mulf %257, %265 : vector<2x128xf32>
    %267 = vector.shape_cast %266 : vector<2x128xf32> to vector<1x256xf32>
    %c0_110 = arith.constant 0 : index
    %c0_111 = arith.constant 0 : index
    %268 = vector.load %arg3[%c0_110, %c0_111] : memref<256x32xf32, #tpu.memory_space<vmem>>, vector<256x32xf32>
    %cst_112 = arith.constant dense<0.000000e+00> : vector<1x32xf32>
    %269 = tpu.matmul %267, %268, %cst_112 {dimension_numbers = #tpu.dot_dimension_numbers<[1], [0], [0], [1], [0, 0, 1, 1], [], []>} : vector<1x256xf32>, vector<256x32xf32>, vector<1x32xf32> -> vector<1x32xf32>
    %c4_113 = arith.constant 4 : index
    %c0_114 = arith.constant 0 : index
    %270 = vector.load %arg2[%c4_113, %c0_114] : memref<8x32xf32, #tpu.memory_space<vmem>>, vector<1x32xf32>
    %271 = arith.addf %270, %269 : vector<1x32xf32>
    %cst_115 = arith.constant 0.000000e+00 : f32
    %272 = vector.broadcast %cst_115 : f32 to vector<1x32xf32>
    %273 = arith.maximumf %271, %272 : vector<1x32xf32>
    %c0_116 = arith.constant 0 : index
    %c0_117 = arith.constant 0 : index
    %274 = vector.load %arg7[%c0_116, %c0_117] : memref<32x384xf32, #tpu.memory_space<vmem>>, vector<32x384xf32>
    %cst_118 = arith.constant dense<0.000000e+00> : vector<1x384xf32>
    %275 = tpu.matmul %273, %274, %cst_118 {dimension_numbers = #tpu.dot_dimension_numbers<[1], [0], [0], [1], [0, 0, 1, 1], [], []>} : vector<1x32xf32>, vector<32x384xf32>, vector<1x384xf32> -> vector<1x384xf32>
    %c0_119 = arith.constant 0 : index
    %c0_120 = arith.constant 0 : index
    %276 = vector.load %arg8[%c0_119, %c0_120] : memref<1x384xf32, #tpu.memory_space<vmem>>, vector<1x384xf32>
    %277 = arith.addf %275, %276 : vector<1x384xf32>
    %278 = vector.extract_strided_slice %248 {offsets = [0, 256], sizes = [1, 384], strides = [1, 1]} : vector<1x640xf32> to vector<1x384xf32>
    %279 = vector.extract_strided_slice %277 {offsets = [0, 0], sizes = [1, 128], strides = [1, 1]} : vector<1x384xf32> to vector<1x128xf32>
    %280 = vector.extract_strided_slice %278 {offsets = [0, 0], sizes = [1, 128], strides = [1, 1]} : vector<1x384xf32> to vector<1x128xf32>
    %281 = arith.addf %279, %280 : vector<1x128xf32>
    %282 = arith.negf %281 : vector<1x128xf32>
    %283 = math.exp %282 : vector<1x128xf32>
    %cst_121 = arith.constant 1.000000e+00 : f32
    %284 = vector.broadcast %cst_121 : f32 to vector<1x128xf32>
    %285 = arith.addf %284, %283 : vector<1x128xf32>
    %286 = arith.divf %284, %285 : vector<1x128xf32>
    %287 = vector.extract_strided_slice %277 {offsets = [0, 128], sizes = [1, 128], strides = [1, 1]} : vector<1x384xf32> to vector<1x128xf32>
    %288 = vector.extract_strided_slice %278 {offsets = [0, 128], sizes = [1, 128], strides = [1, 1]} : vector<1x384xf32> to vector<1x128xf32>
    %289 = arith.addf %287, %288 : vector<1x128xf32>
    %290 = arith.negf %289 : vector<1x128xf32>
    %291 = math.exp %290 : vector<1x128xf32>
    %cst_122 = arith.constant 1.000000e+00 : f32
    %292 = vector.broadcast %cst_122 : f32 to vector<1x128xf32>
    %293 = arith.addf %292, %291 : vector<1x128xf32>
    %294 = arith.divf %292, %293 : vector<1x128xf32>
    %295 = vector.extract_strided_slice %277 {offsets = [0, 256], sizes = [1, 128], strides = [1, 1]} : vector<1x384xf32> to vector<1x128xf32>
    %296 = vector.extract_strided_slice %278 {offsets = [0, 256], sizes = [1, 128], strides = [1, 1]} : vector<1x384xf32> to vector<1x128xf32>
    %297 = arith.mulf %286, %296 : vector<1x128xf32>
    %298 = arith.addf %295, %297 : vector<1x128xf32>
    %299 = math.tanh %298 : vector<1x128xf32>
    %cst_123 = arith.constant 1.000000e+00 : f32
    %300 = vector.broadcast %cst_123 : f32 to vector<1x128xf32>
    %301 = arith.subf %300, %294 : vector<1x128xf32>
    %302 = arith.mulf %301, %299 : vector<1x128xf32>
    %303 = arith.mulf %294, %243 : vector<1x128xf32>
    %304 = arith.addf %302, %303 : vector<1x128xf32>
    %c4_124 = arith.constant 4 : index
    %c0_125 = arith.constant 0 : index
    %305 = vector.load %arg13[%c4_124, %c0_125] : memref<8x128xf32, #tpu.memory_space<vmem>>, vector<1x128xf32>
    tpu.vector_store %arg13[%c4_124, %c0_125], %304 {strides = array<i32>} : memref<8x128xf32, #tpu.memory_space<vmem>>, vector<1x128xf32>,
    %c0_126 = arith.constant 0 : index
    %c0_127 = arith.constant 0 : index
    %306 = vector.load %arg5[%c0_126, %c0_127] : memref<128x640xf32, #tpu.memory_space<vmem>>, vector<128x640xf32>
    %cst_128 = arith.constant dense<0.000000e+00> : vector<1x640xf32>
    %307 = tpu.matmul %304, %306, %cst_128 {dimension_numbers = #tpu.dot_dimension_numbers<[1], [0], [0], [1], [0, 0, 1, 1], [], []>} : vector<1x128xf32>, vector<128x640xf32>, vector<1x640xf32> -> vector<1x640xf32>
    %c0_129 = arith.constant 0 : index
    %c0_130 = arith.constant 0 : index
    %308 = vector.load %arg6[%c0_129, %c0_130] : memref<1x640xf32, #tpu.memory_space<vmem>>, vector<1x640xf32>
    %309 = arith.addf %307, %308 : vector<1x640xf32>
    %c5 = arith.constant 5 : index
    %c0_131 = arith.constant 0 : index
    %310 = vector.load %arg1[%c5, %c0_131] : memref<8x256xf32, #tpu.memory_space<vmem>>, vector<1x256xf32>
    %311 = vector.extract_strided_slice %309 {offsets = [0, 0], sizes = [1, 256], strides = [1, 1]} : vector<1x640xf32> to vector<1x256xf32>
    %312 = arith.addf %310, %311 : vector<1x256xf32>
    %313 = vector.shape_cast %312 : vector<1x256xf32> to vector<2x128xf32>
    %cst_132 = arith.constant dense<0xFF800000> : vector<2xf32>
    %314 = vector.multi_reduction <maximumf>, %313, %cst_132 [1] : vector<2x128xf32> to vector<2xf32>
    %315 = vector.shape_cast %314 : vector<2xf32> to vector<2x1xf32>
    %316 = vector.broadcast %315 : vector<2x1xf32> to vector<2x128xf32>
    %317 = arith.subf %313, %316 : vector<2x128xf32>
    %318 = math.exp %317 : vector<2x128xf32>
    %cst_133 = arith.constant dense<0.000000e+00> : vector<2xf32>
    %319 = vector.multi_reduction <add>, %318, %cst_133 [1] : vector<2x128xf32> to vector<2xf32>
    %320 = vector.shape_cast %319 : vector<2xf32> to vector<2x1xf32>
    %321 = tpu.reciprocal %320 {approx = true} : vector<2x1xf32> -> vector<2x1xf32>
    %322 = arith.mulf %320, %321 : vector<2x1xf32>
    %cst_134 = arith.constant 2.000000e+00 : f32
    %323 = vector.broadcast %cst_134 : f32 to vector<2x1xf32>
    %324 = arith.subf %323, %322 : vector<2x1xf32>
    %325 = arith.mulf %321, %324 : vector<2x1xf32>
    %326 = vector.broadcast %325 : vector<2x1xf32> to vector<2x128xf32>
    %327 = arith.mulf %318, %326 : vector<2x128xf32>
    %328 = vector.shape_cast %327 : vector<2x128xf32> to vector<1x256xf32>
    %c0_135 = arith.constant 0 : index
    %c0_136 = arith.constant 0 : index
    %329 = vector.load %arg3[%c0_135, %c0_136] : memref<256x32xf32, #tpu.memory_space<vmem>>, vector<256x32xf32>
    %cst_137 = arith.constant dense<0.000000e+00> : vector<1x32xf32>
    %330 = tpu.matmul %328, %329, %cst_137 {dimension_numbers = #tpu.dot_dimension_numbers<[1], [0], [0], [1], [0, 0, 1, 1], [], []>} : vector<1x256xf32>, vector<256x32xf32>, vector<1x32xf32> -> vector<1x32xf32>
    %c5_138 = arith.constant 5 : index
    %c0_139 = arith.constant 0 : index
    %331 = vector.load %arg2[%c5_138, %c0_139] : memref<8x32xf32, #tpu.memory_space<vmem>>, vector<1x32xf32>
    %332 = arith.addf %331, %330 : vector<1x32xf32>
    %cst_140 = arith.constant 0.000000e+00 : f32
    %333 = vector.broadcast %cst_140 : f32 to vector<1x32xf32>
    %334 = arith.maximumf %332, %333 : vector<1x32xf32>
    %c0_141 = arith.constant 0 : index
    %c0_142 = arith.constant 0 : index
    %335 = vector.load %arg7[%c0_141, %c0_142] : memref<32x384xf32, #tpu.memory_space<vmem>>, vector<32x384xf32>
    %cst_143 = arith.constant dense<0.000000e+00> : vector<1x384xf32>
    %336 = tpu.matmul %334, %335, %cst_143 {dimension_numbers = #tpu.dot_dimension_numbers<[1], [0], [0], [1], [0, 0, 1, 1], [], []>} : vector<1x32xf32>, vector<32x384xf32>, vector<1x384xf32> -> vector<1x384xf32>
    %c0_144 = arith.constant 0 : index
    %c0_145 = arith.constant 0 : index
    %337 = vector.load %arg8[%c0_144, %c0_145] : memref<1x384xf32, #tpu.memory_space<vmem>>, vector<1x384xf32>
    %338 = arith.addf %336, %337 : vector<1x384xf32>
    %339 = vector.extract_strided_slice %309 {offsets = [0, 256], sizes = [1, 384], strides = [1, 1]} : vector<1x640xf32> to vector<1x384xf32>
    %340 = vector.extract_strided_slice %338 {offsets = [0, 0], sizes = [1, 128], strides = [1, 1]} : vector<1x384xf32> to vector<1x128xf32>
    %341 = vector.extract_strided_slice %339 {offsets = [0, 0], sizes = [1, 128], strides = [1, 1]} : vector<1x384xf32> to vector<1x128xf32>
    %342 = arith.addf %340, %341 : vector<1x128xf32>
    %343 = arith.negf %342 : vector<1x128xf32>
    %344 = math.exp %343 : vector<1x128xf32>
    %cst_146 = arith.constant 1.000000e+00 : f32
    %345 = vector.broadcast %cst_146 : f32 to vector<1x128xf32>
    %346 = arith.addf %345, %344 : vector<1x128xf32>
    %347 = arith.divf %345, %346 : vector<1x128xf32>
    %348 = vector.extract_strided_slice %338 {offsets = [0, 128], sizes = [1, 128], strides = [1, 1]} : vector<1x384xf32> to vector<1x128xf32>
    %349 = vector.extract_strided_slice %339 {offsets = [0, 128], sizes = [1, 128], strides = [1, 1]} : vector<1x384xf32> to vector<1x128xf32>
    %350 = arith.addf %348, %349 : vector<1x128xf32>
    %351 = arith.negf %350 : vector<1x128xf32>
    %352 = math.exp %351 : vector<1x128xf32>
    %cst_147 = arith.constant 1.000000e+00 : f32
    %353 = vector.broadcast %cst_147 : f32 to vector<1x128xf32>
    %354 = arith.addf %353, %352 : vector<1x128xf32>
    %355 = arith.divf %353, %354 : vector<1x128xf32>
    %356 = vector.extract_strided_slice %338 {offsets = [0, 256], sizes = [1, 128], strides = [1, 1]} : vector<1x384xf32> to vector<1x128xf32>
    %357 = vector.extract_strided_slice %339 {offsets = [0, 256], sizes = [1, 128], strides = [1, 1]} : vector<1x384xf32> to vector<1x128xf32>
    %358 = arith.mulf %347, %357 : vector<1x128xf32>
    %359 = arith.addf %356, %358 : vector<1x128xf32>
    %360 = math.tanh %359 : vector<1x128xf32>
    %cst_148 = arith.constant 1.000000e+00 : f32
    %361 = vector.broadcast %cst_148 : f32 to vector<1x128xf32>
    %362 = arith.subf %361, %355 : vector<1x128xf32>
    %363 = arith.mulf %362, %360 : vector<1x128xf32>
    %364 = arith.mulf %355, %304 : vector<1x128xf32>
    %365 = arith.addf %363, %364 : vector<1x128xf32>
    %c5_149 = arith.constant 5 : index
    %c0_150 = arith.constant 0 : index
    %366 = vector.load %arg13[%c5_149, %c0_150] : memref<8x128xf32, #tpu.memory_space<vmem>>, vector<1x128xf32>
    tpu.vector_store %arg13[%c5_149, %c0_150], %365 {strides = array<i32>} : memref<8x128xf32, #tpu.memory_space<vmem>>, vector<1x128xf32>,
    %c0_151 = arith.constant 0 : index
    %c0_152 = arith.constant 0 : index
    %367 = vector.load %arg5[%c0_151, %c0_152] : memref<128x640xf32, #tpu.memory_space<vmem>>, vector<128x640xf32>
    %cst_153 = arith.constant dense<0.000000e+00> : vector<1x640xf32>
    %368 = tpu.matmul %365, %367, %cst_153 {dimension_numbers = #tpu.dot_dimension_numbers<[1], [0], [0], [1], [0, 0, 1, 1], [], []>} : vector<1x128xf32>, vector<128x640xf32>, vector<1x640xf32> -> vector<1x640xf32>
    %c0_154 = arith.constant 0 : index
    %c0_155 = arith.constant 0 : index
    %369 = vector.load %arg6[%c0_154, %c0_155] : memref<1x640xf32, #tpu.memory_space<vmem>>, vector<1x640xf32>
    %370 = arith.addf %368, %369 : vector<1x640xf32>
    %c6 = arith.constant 6 : index
    %c0_156 = arith.constant 0 : index
    %371 = vector.load %arg1[%c6, %c0_156] : memref<8x256xf32, #tpu.memory_space<vmem>>, vector<1x256xf32>
    %372 = vector.extract_strided_slice %370 {offsets = [0, 0], sizes = [1, 256], strides = [1, 1]} : vector<1x640xf32> to vector<1x256xf32>
    %373 = arith.addf %371, %372 : vector<1x256xf32>
    %374 = vector.shape_cast %373 : vector<1x256xf32> to vector<2x128xf32>
    %cst_157 = arith.constant dense<0xFF800000> : vector<2xf32>
    %375 = vector.multi_reduction <maximumf>, %374, %cst_157 [1] : vector<2x128xf32> to vector<2xf32>
    %376 = vector.shape_cast %375 : vector<2xf32> to vector<2x1xf32>
    %377 = vector.broadcast %376 : vector<2x1xf32> to vector<2x128xf32>
    %378 = arith.subf %374, %377 : vector<2x128xf32>
    %379 = math.exp %378 : vector<2x128xf32>
    %cst_158 = arith.constant dense<0.000000e+00> : vector<2xf32>
    %380 = vector.multi_reduction <add>, %379, %cst_158 [1] : vector<2x128xf32> to vector<2xf32>
    %381 = vector.shape_cast %380 : vector<2xf32> to vector<2x1xf32>
    %382 = tpu.reciprocal %381 {approx = true} : vector<2x1xf32> -> vector<2x1xf32>
    %383 = arith.mulf %381, %382 : vector<2x1xf32>
    %cst_159 = arith.constant 2.000000e+00 : f32
    %384 = vector.broadcast %cst_159 : f32 to vector<2x1xf32>
    %385 = arith.subf %384, %383 : vector<2x1xf32>
    %386 = arith.mulf %382, %385 : vector<2x1xf32>
    %387 = vector.broadcast %386 : vector<2x1xf32> to vector<2x128xf32>
    %388 = arith.mulf %379, %387 : vector<2x128xf32>
    %389 = vector.shape_cast %388 : vector<2x128xf32> to vector<1x256xf32>
    %c0_160 = arith.constant 0 : index
    %c0_161 = arith.constant 0 : index
    %390 = vector.load %arg3[%c0_160, %c0_161] : memref<256x32xf32, #tpu.memory_space<vmem>>, vector<256x32xf32>
    %cst_162 = arith.constant dense<0.000000e+00> : vector<1x32xf32>
    %391 = tpu.matmul %389, %390, %cst_162 {dimension_numbers = #tpu.dot_dimension_numbers<[1], [0], [0], [1], [0, 0, 1, 1], [], []>} : vector<1x256xf32>, vector<256x32xf32>, vector<1x32xf32> -> vector<1x32xf32>
    %c6_163 = arith.constant 6 : index
    %c0_164 = arith.constant 0 : index
    %392 = vector.load %arg2[%c6_163, %c0_164] : memref<8x32xf32, #tpu.memory_space<vmem>>, vector<1x32xf32>
    %393 = arith.addf %392, %391 : vector<1x32xf32>
    %cst_165 = arith.constant 0.000000e+00 : f32
    %394 = vector.broadcast %cst_165 : f32 to vector<1x32xf32>
    %395 = arith.maximumf %393, %394 : vector<1x32xf32>
    %c0_166 = arith.constant 0 : index
    %c0_167 = arith.constant 0 : index
    %396 = vector.load %arg7[%c0_166, %c0_167] : memref<32x384xf32, #tpu.memory_space<vmem>>, vector<32x384xf32>
    %cst_168 = arith.constant dense<0.000000e+00> : vector<1x384xf32>
    %397 = tpu.matmul %395, %396, %cst_168 {dimension_numbers = #tpu.dot_dimension_numbers<[1], [0], [0], [1], [0, 0, 1, 1], [], []>} : vector<1x32xf32>, vector<32x384xf32>, vector<1x384xf32> -> vector<1x384xf32>
    %c0_169 = arith.constant 0 : index
    %c0_170 = arith.constant 0 : index
    %398 = vector.load %arg8[%c0_169, %c0_170] : memref<1x384xf32, #tpu.memory_space<vmem>>, vector<1x384xf32>
    %399 = arith.addf %397, %398 : vector<1x384xf32>
    %400 = vector.extract_strided_slice %370 {offsets = [0, 256], sizes = [1, 384], strides = [1, 1]} : vector<1x640xf32> to vector<1x384xf32>
    %401 = vector.extract_strided_slice %399 {offsets = [0, 0], sizes = [1, 128], strides = [1, 1]} : vector<1x384xf32> to vector<1x128xf32>
    %402 = vector.extract_strided_slice %400 {offsets = [0, 0], sizes = [1, 128], strides = [1, 1]} : vector<1x384xf32> to vector<1x128xf32>
    %403 = arith.addf %401, %402 : vector<1x128xf32>
    %404 = arith.negf %403 : vector<1x128xf32>
    %405 = math.exp %404 : vector<1x128xf32>
    %cst_171 = arith.constant 1.000000e+00 : f32
    %406 = vector.broadcast %cst_171 : f32 to vector<1x128xf32>
    %407 = arith.addf %406, %405 : vector<1x128xf32>
    %408 = arith.divf %406, %407 : vector<1x128xf32>
    %409 = vector.extract_strided_slice %399 {offsets = [0, 128], sizes = [1, 128], strides = [1, 1]} : vector<1x384xf32> to vector<1x128xf32>
    %410 = vector.extract_strided_slice %400 {offsets = [0, 128], sizes = [1, 128], strides = [1, 1]} : vector<1x384xf32> to vector<1x128xf32>
    %411 = arith.addf %409, %410 : vector<1x128xf32>
    %412 = arith.negf %411 : vector<1x128xf32>
    %413 = math.exp %412 : vector<1x128xf32>
    %cst_172 = arith.constant 1.000000e+00 : f32
    %414 = vector.broadcast %cst_172 : f32 to vector<1x128xf32>
    %415 = arith.addf %414, %413 : vector<1x128xf32>
    %416 = arith.divf %414, %415 : vector<1x128xf32>
    %417 = vector.extract_strided_slice %399 {offsets = [0, 256], sizes = [1, 128], strides = [1, 1]} : vector<1x384xf32> to vector<1x128xf32>
    %418 = vector.extract_strided_slice %400 {offsets = [0, 256], sizes = [1, 128], strides = [1, 1]} : vector<1x384xf32> to vector<1x128xf32>
    %419 = arith.mulf %408, %418 : vector<1x128xf32>
    %420 = arith.addf %417, %419 : vector<1x128xf32>
    %421 = math.tanh %420 : vector<1x128xf32>
    %cst_173 = arith.constant 1.000000e+00 : f32
    %422 = vector.broadcast %cst_173 : f32 to vector<1x128xf32>
    %423 = arith.subf %422, %416 : vector<1x128xf32>
    %424 = arith.mulf %423, %421 : vector<1x128xf32>
    %425 = arith.mulf %416, %365 : vector<1x128xf32>
    %426 = arith.addf %424, %425 : vector<1x128xf32>
    %c6_174 = arith.constant 6 : index
    %c0_175 = arith.constant 0 : index
    %427 = vector.load %arg13[%c6_174, %c0_175] : memref<8x128xf32, #tpu.memory_space<vmem>>, vector<1x128xf32>
    tpu.vector_store %arg13[%c6_174, %c0_175], %426 {strides = array<i32>} : memref<8x128xf32, #tpu.memory_space<vmem>>, vector<1x128xf32>,
    %c0_176 = arith.constant 0 : index
    %c0_177 = arith.constant 0 : index
    %428 = vector.load %arg5[%c0_176, %c0_177] : memref<128x640xf32, #tpu.memory_space<vmem>>, vector<128x640xf32>
    %cst_178 = arith.constant dense<0.000000e+00> : vector<1x640xf32>
    %429 = tpu.matmul %426, %428, %cst_178 {dimension_numbers = #tpu.dot_dimension_numbers<[1], [0], [0], [1], [0, 0, 1, 1], [], []>} : vector<1x128xf32>, vector<128x640xf32>, vector<1x640xf32> -> vector<1x640xf32>
    %c0_179 = arith.constant 0 : index
    %c0_180 = arith.constant 0 : index
    %430 = vector.load %arg6[%c0_179, %c0_180] : memref<1x640xf32, #tpu.memory_space<vmem>>, vector<1x640xf32>
    %431 = arith.addf %429, %430 : vector<1x640xf32>
    %c7 = arith.constant 7 : index
    %c0_181 = arith.constant 0 : index
    %432 = vector.load %arg1[%c7, %c0_181] : memref<8x256xf32, #tpu.memory_space<vmem>>, vector<1x256xf32>
    %433 = vector.extract_strided_slice %431 {offsets = [0, 0], sizes = [1, 256], strides = [1, 1]} : vector<1x640xf32> to vector<1x256xf32>
    %434 = arith.addf %432, %433 : vector<1x256xf32>
    %435 = vector.shape_cast %434 : vector<1x256xf32> to vector<2x128xf32>
    %cst_182 = arith.constant dense<0xFF800000> : vector<2xf32>
    %436 = vector.multi_reduction <maximumf>, %435, %cst_182 [1] : vector<2x128xf32> to vector<2xf32>
    %437 = vector.shape_cast %436 : vector<2xf32> to vector<2x1xf32>
    %438 = vector.broadcast %437 : vector<2x1xf32> to vector<2x128xf32>
    %439 = arith.subf %435, %438 : vector<2x128xf32>
    %440 = math.exp %439 : vector<2x128xf32>
    %cst_183 = arith.constant dense<0.000000e+00> : vector<2xf32>
    %441 = vector.multi_reduction <add>, %440, %cst_183 [1] : vector<2x128xf32> to vector<2xf32>
    %442 = vector.shape_cast %441 : vector<2xf32> to vector<2x1xf32>
    %443 = tpu.reciprocal %442 {approx = true} : vector<2x1xf32> -> vector<2x1xf32>
    %444 = arith.mulf %442, %443 : vector<2x1xf32>
    %cst_184 = arith.constant 2.000000e+00 : f32
    %445 = vector.broadcast %cst_184 : f32 to vector<2x1xf32>
    %446 = arith.subf %445, %444 : vector<2x1xf32>
    %447 = arith.mulf %443, %446 : vector<2x1xf32>
    %448 = vector.broadcast %447 : vector<2x1xf32> to vector<2x128xf32>
    %449 = arith.mulf %440, %448 : vector<2x128xf32>
    %450 = vector.shape_cast %449 : vector<2x128xf32> to vector<1x256xf32>
    %c0_185 = arith.constant 0 : index
    %c0_186 = arith.constant 0 : index
    %451 = vector.load %arg3[%c0_185, %c0_186] : memref<256x32xf32, #tpu.memory_space<vmem>>, vector<256x32xf32>
    %cst_187 = arith.constant dense<0.000000e+00> : vector<1x32xf32>
    %452 = tpu.matmul %450, %451, %cst_187 {dimension_numbers = #tpu.dot_dimension_numbers<[1], [0], [0], [1], [0, 0, 1, 1], [], []>} : vector<1x256xf32>, vector<256x32xf32>, vector<1x32xf32> -> vector<1x32xf32>
    %c7_188 = arith.constant 7 : index
    %c0_189 = arith.constant 0 : index
    %453 = vector.load %arg2[%c7_188, %c0_189] : memref<8x32xf32, #tpu.memory_space<vmem>>, vector<1x32xf32>
    %454 = arith.addf %453, %452 : vector<1x32xf32>
    %cst_190 = arith.constant 0.000000e+00 : f32
    %455 = vector.broadcast %cst_190 : f32 to vector<1x32xf32>
    %456 = arith.maximumf %454, %455 : vector<1x32xf32>
    %c0_191 = arith.constant 0 : index
    %c0_192 = arith.constant 0 : index
    %457 = vector.load %arg7[%c0_191, %c0_192] : memref<32x384xf32, #tpu.memory_space<vmem>>, vector<32x384xf32>
    %cst_193 = arith.constant dense<0.000000e+00> : vector<1x384xf32>
    %458 = tpu.matmul %456, %457, %cst_193 {dimension_numbers = #tpu.dot_dimension_numbers<[1], [0], [0], [1], [0, 0, 1, 1], [], []>} : vector<1x32xf32>, vector<32x384xf32>, vector<1x384xf32> -> vector<1x384xf32>
    %c0_194 = arith.constant 0 : index
    %c0_195 = arith.constant 0 : index
    %459 = vector.load %arg8[%c0_194, %c0_195] : memref<1x384xf32, #tpu.memory_space<vmem>>, vector<1x384xf32>
    %460 = arith.addf %458, %459 : vector<1x384xf32>
    %461 = vector.extract_strided_slice %431 {offsets = [0, 256], sizes = [1, 384], strides = [1, 1]} : vector<1x640xf32> to vector<1x384xf32>
    %462 = vector.extract_strided_slice %460 {offsets = [0, 0], sizes = [1, 128], strides = [1, 1]} : vector<1x384xf32> to vector<1x128xf32>
    %463 = vector.extract_strided_slice %461 {offsets = [0, 0], sizes = [1, 128], strides = [1, 1]} : vector<1x384xf32> to vector<1x128xf32>
    %464 = arith.addf %462, %463 : vector<1x128xf32>
    %465 = arith.negf %464 : vector<1x128xf32>
    %466 = math.exp %465 : vector<1x128xf32>
    %cst_196 = arith.constant 1.000000e+00 : f32
    %467 = vector.broadcast %cst_196 : f32 to vector<1x128xf32>
    %468 = arith.addf %467, %466 : vector<1x128xf32>
    %469 = arith.divf %467, %468 : vector<1x128xf32>
    %470 = vector.extract_strided_slice %460 {offsets = [0, 128], sizes = [1, 128], strides = [1, 1]} : vector<1x384xf32> to vector<1x128xf32>
    %471 = vector.extract_strided_slice %461 {offsets = [0, 128], sizes = [1, 128], strides = [1, 1]} : vector<1x384xf32> to vector<1x128xf32>
    %472 = arith.addf %470, %471 : vector<1x128xf32>
    %473 = arith.negf %472 : vector<1x128xf32>
    %474 = math.exp %473 : vector<1x128xf32>
    %cst_197 = arith.constant 1.000000e+00 : f32
    %475 = vector.broadcast %cst_197 : f32 to vector<1x128xf32>
    %476 = arith.addf %475, %474 : vector<1x128xf32>
    %477 = arith.divf %475, %476 : vector<1x128xf32>
    %478 = vector.extract_strided_slice %460 {offsets = [0, 256], sizes = [1, 128], strides = [1, 1]} : vector<1x384xf32> to vector<1x128xf32>
    %479 = vector.extract_strided_slice %461 {offsets = [0, 256], sizes = [1, 128], strides = [1, 1]} : vector<1x384xf32> to vector<1x128xf32>
    %480 = arith.mulf %469, %479 : vector<1x128xf32>
    %481 = arith.addf %478, %480 : vector<1x128xf32>
    %482 = math.tanh %481 : vector<1x128xf32>
    %cst_198 = arith.constant 1.000000e+00 : f32
    %483 = vector.broadcast %cst_198 : f32 to vector<1x128xf32>
    %484 = arith.subf %483, %477 : vector<1x128xf32>
    %485 = arith.mulf %484, %482 : vector<1x128xf32>
    %486 = arith.mulf %477, %426 : vector<1x128xf32>
    %487 = arith.addf %485, %486 : vector<1x128xf32>
    %c7_199 = arith.constant 7 : index
    %c0_200 = arith.constant 0 : index
    %488 = vector.load %arg13[%c7_199, %c0_200] : memref<8x128xf32, #tpu.memory_space<vmem>>, vector<1x128xf32>
    tpu.vector_store %arg13[%c7_199, %c0_200], %487 {strides = array<i32>} : memref<8x128xf32, #tpu.memory_space<vmem>>, vector<1x128xf32>,
    %c0_201 = arith.constant 0 : index
    %c0_202 = arith.constant 0 : index
    %489 = vector.load %arg12[%c0_201, %c0_202] : memref<1x128xf32, #tpu.memory_space<vmem>>, vector<1x128xf32>
    tpu.vector_store %arg12[%c0_201, %c0_202], %487 {strides = array<i32>} : memref<1x128xf32, #tpu.memory_space<vmem>>, vector<1x128xf32>,
    %c0_203 = arith.constant 0 : index
    %c0_204 = arith.constant 0 : index
    %490 = vector.load %arg13[%c0_203, %c0_204] : memref<8x128xf32, #tpu.memory_space<vmem>>, vector<8x128xf32>
    %c0_205 = arith.constant 0 : index
    %c0_206 = arith.constant 0 : index
    %491 = vector.load %arg9[%c0_205, %c0_206] : memref<128x128xf32, #tpu.memory_space<vmem>>, vector<128x128xf32>
    %cst_207 = arith.constant dense<0.000000e+00> : vector<8x128xf32>
    %492 = tpu.matmul %490, %491, %cst_207 {dimension_numbers = #tpu.dot_dimension_numbers<[1], [0], [0], [1], [0, 0, 1, 1], [], []>} : vector<8x128xf32>, vector<128x128xf32>, vector<8x128xf32> -> vector<8x128xf32>
    %c0_208 = arith.constant 0 : index
    %c0_209 = arith.constant 0 : index
    %493 = vector.load %arg10[%c0_208, %c0_209] : memref<1x128xf32, #tpu.memory_space<vmem>>, vector<1x128xf32>
    %494 = vector.broadcast %493 : vector<1x128xf32> to vector<8x128xf32>
    %495 = arith.addf %492, %494 : vector<8x128xf32>
    %cst_210 = arith.constant dense<0xFF800000> : vector<8xf32>
    %496 = vector.multi_reduction <maximumf>, %495, %cst_210 [1] : vector<8x128xf32> to vector<8xf32>
    %497 = vector.shape_cast %496 : vector<8xf32> to vector<8x1xf32>
    %498 = vector.broadcast %497 : vector<8x1xf32> to vector<8x128xf32>
    %499 = arith.subf %495, %498 : vector<8x128xf32>
    %500 = math.exp %499 : vector<8x128xf32>
    %cst_211 = arith.constant dense<0.000000e+00> : vector<8xf32>
    %501 = vector.multi_reduction <add>, %500, %cst_211 [1] : vector<8x128xf32> to vector<8xf32>
    %502 = vector.shape_cast %501 : vector<8xf32> to vector<8x1xf32>
    %503 = math.log %502 : vector<8x1xf32>
    %504 = vector.broadcast %503 : vector<8x1xf32> to vector<8x128xf32>
    %505 = arith.subf %499, %504 : vector<8x128xf32>
    %c0_212 = arith.constant 0 : index
    %c0_213 = arith.constant 0 : index
    %506 = vector.load %arg11[%c0_212, %c0_213] : memref<8x128xf32, #tpu.memory_space<vmem>>, vector<8x128xf32>
    tpu.vector_store %arg11[%c0_212, %c0_213], %505 {strides = array<i32>} : memref<8x128xf32, #tpu.memory_space<vmem>>, vector<8x128xf32>,
    return
  }
  func.func @transform_0(%arg0: i32) -> (i32, i32) {
    %c0_i32 = arith.constant 0 : i32
    %c0_i32_0 = arith.constant 0 : i32
    %c0_i32_1 = arith.constant 0 : i32
    return %c0_i32, %c0_i32_0 : i32, i32
  }
  func.func @transform_1(%arg0: i32) -> (i32, i32) {
    %c0_i32 = arith.constant 0 : i32
    %c0_i32_0 = arith.constant 0 : i32
    %c0_i32_1 = arith.constant 0 : i32
    return %c0_i32, %c0_i32_0 : i32, i32
  }
  func.func @transform_2(%arg0: i32) -> (i32, i32) {
    %c0_i32 = arith.constant 0 : i32
    %c0_i32_0 = arith.constant 0 : i32
    %c0_i32_1 = arith.constant 0 : i32
    return %c0_i32, %c0_i32_0 : i32, i32
  }
  func.func @transform_3(%arg0: i32) -> (i32, i32) {
    %c0_i32 = arith.constant 0 : i32
    %c0_i32_0 = arith.constant 0 : i32
    %c0_i32_1 = arith.constant 0 : i32
    return %c0_i32, %c0_i32_0 : i32, i32
  }
  func.func @transform_4(%arg0: i32) -> (i32, i32) {
    %c0_i32 = arith.constant 0 : i32
    %c0_i32_0 = arith.constant 0 : i32
    %c0_i32_1 = arith.constant 0 : i32
    return %c0_i32, %c0_i32_0 : i32, i32
  }
  func.func @transform_5(%arg0: i32) -> (i32, i32) {
    %c0_i32 = arith.constant 0 : i32
    %c0_i32_0 = arith.constant 0 : i32
    %c0_i32_1 = arith.constant 0 : i32
    return %c0_i32, %c0_i32_0 : i32, i32
  }
  func.func @transform_6(%arg0: i32) -> (i32, i32) {
    %c0_i32 = arith.constant 0 : i32
    %c0_i32_0 = arith.constant 0 : i32
    %c0_i32_1 = arith.constant 0 : i32
    return %c0_i32, %c0_i32_0 : i32, i32
  }
  func.func @transform_7(%arg0: i32) -> (i32, i32) {
    %c0_i32 = arith.constant 0 : i32
    %c0_i32_0 = arith.constant 0 : i32
    %c0_i32_1 = arith.constant 0 : i32
    return %c0_i32, %c0_i32_0 : i32, i32
  }
  func.func @transform_8(%arg0: i32) -> (i32, i32) {
    %c0_i32 = arith.constant 0 : i32
    %c0_i32_0 = arith.constant 0 : i32
    %c0_i32_1 = arith.constant 0 : i32
    return %c0_i32, %c0_i32_0 : i32, i32
  }
  func.func @transform_9(%arg0: i32) -> (i32, i32) {
    %c0_i32 = arith.constant 0 : i32
    %c0_i32_0 = arith.constant 0 : i32
    %c0_i32_1 = arith.constant 0 : i32
    return %c0_i32, %c0_i32_0 : i32, i32
  }
  func.func @transform_10(%arg0: i32) -> (i32, i32) {
    %c0_i32 = arith.constant 0 : i32
    %c0_i32_0 = arith.constant 0 : i32
    %c0_i32_1 = arith.constant 0 : i32
    return %c0_i32, %c0_i32_0 : i32, i32
  }
  func.func @transform_11(%arg0: i32) -> (i32, i32) {
    %c0_i32 = arith.constant 0 : i32
    %c0_i32_0 = arith.constant 0 : i32
    %c0_i32_1 = arith.constant 0 : i32
    return %c0_i32, %c0_i32_0 : i32, i32
  }
}

</mosaic_0001>

<bundles_post_ra>
// kernel: multi_attn_decode.1
= control target key start
LH: loop header
LB: loop body
LE: loop exit
PB: predicated region body
PF: predicated region fallthrough
CT: control target
= control target key end

     0   :  { %17 = vsyncpa [#allocation4], 0  ;;  %s6562_s0 = inlined_call_operand.vmem [shape: f32[8,256], index: 0, kind: input, shape index: {}]   ;;  %s6563_s1 = inlined_call_operand.vmem [shape: f32[8,32], index: 1, kind: input, shape index: {}]   ;;  %s6564_s2 = inlined_call_operand.vmem [shape: f32[256,32], index: 2, kind: input, shape index: {}]   ;;  %s6565_s3 = inlined_call_operand.vmem [shape: f32[1,128], index: 3, kind: input, shape index: {}]   ;;  %s6566_s4 = inlined_call_operand.hbm [shape: f32[128,640], index: 4, kind: input, shape index: {}]   ;;  %s6567_s5 = inlined_call_operand.vmem [shape: f32[1,640], index: 5, kind: input, shape index: {}]   ;;  %s6568_s6 = inlined_call_operand.vmem [shape: f32[32,384], index: 6, kind: input, shape index: {}]   ;;  %s6569_s7 = inlined_call_operand.vmem [shape: f32[1,384], index: 7, kind: input, shape index: {}]   ;;  %s6570_s8 = inlined_call_operand.vmem [shape: f32[128,128], index: 8, kind: input, shape index: {}]   ;;  %s6571_s9 = inlined_call_operand.vmem [shape: f32[1,128], index: 9, kind: input, shape index: {}]   ;;  %s6572_s10 = inlined_call_operand.hbm [shape: f32[8,128], index: 10, kind: output, shape index: {0}]   ;;  %s6573_s11 = inlined_call_operand.vmem [shape: f32[1,128], index: 11, kind: output, shape index: {1}]  }
   0x1   :  { %18 = vsyncpa [#allocation5], 0  ;;  %s31_s19 = sshll.u32 %s6566_s4, 4  ;;  %s3866_s20 = smov [#allocation3]   ;;  %s32_s19 = int_to_ptr.hbm [resolvable:$true] %s31_s19 }
   0x2   :  { %s33_s21 = sshll.u32 %s3866_s20, 4  ;;  %s3867_s22 = smov 640   ;;  %s34_s21 = int_to_ptr.vmem [resolvable:$true] %s33_s21 }
   0x3   :  { %s3868_s23 = smov 40  }
   0x4   :  { %39 = dma.hbm_to_vmem [thread:$0]  %s32_s19, 10240, %s34_s21, [#allocation4], %s3867_s22, %s3867_s22, %s3868_s23  }
   0x5   :  { %3862 = dma.done.wait [#allocation4], 10240  }
   0x6   :  { %3863 = vsyncadd [#allocation4], 4294957056  ;;  %v3936_v0 = vld [vmem:[#allocation3 + $0x260] sm:$0xff]  ;;  %v3938_v1 = vld [vmem:[#allocation3 + $0x258] sm:$0xff]  ;;  %v3869_v38 = vmov 286326784   ;;  %vm251_vm0 = vcmask 1040384  }
   0x7   :  { %v3940_v2 = vld [vmem:[#allocation3 + $0x238] sm:$0xff]  ;;  %167 = vmatpush.msra.mxu1 %v3936_v0  ;;  %147 = vmatpush.msra.mxu0 %v3938_v1  ;;  %v3944_v3 = vld [vmem:[#allocation3 + $0x230] sm:$0xff]  ;;  %v3948_v5 = vld [vmem:[#allocation3 + $0x208] sm:$0xff]  ;;  %v257_v39 = vunpack.c.l.s4 %v3869_v38  ;;  %v3870_v42 = vmov 1935823168   ;;  %vm265_vm1 = vcmask 1041408  }
   0x8   :  { %v3946_v4 = vld [vmem:[#allocation3 + $0x210] sm:$0xff]  ;;  %v3952_v6 = vld [vmem:[#allocation3 + $0x1e8] sm:$0xff]  ;;  %v3954_v7 = vld [vmem:[#allocation3 + $0x1e0] sm:$0xff]  ;;  %v262_v43 = vunpack.c.l.s4 %v3870_v42  ;;  %vm384_vm2 = vcmask 261120   ;;  %s3629_s25 = sshll.u32 %s6572_s10, 4  ;;  %s3630_s25 = int_to_ptr.hbm [resolvable:$true] %s3629_s25 }
   0x9   :  { %168 = vmatpush.msra.mxu1 %v3940_v2  ;;  %148 = vmatpush.msra.mxu0 %v3944_v3  ;;  %v3958_v8 = vld [vmem:[#allocation3 + $0x1c0] sm:$0xff]  ;;  %v3960_v9 = vld [vmem:[#allocation3 + $0x1b8] sm:$0xff]  ;;  %v3966_v11 = vld [vmem:[#allocation3 + $0x190] sm:$0xff]  ;;  %v4049_v46 = vunpack.c.0.s8 %v257_v39 }
   0xa   :  { %v3964_v10 = vld [vmem:[#allocation3 + $0x198] sm:$0xff]  ;;  %v3970_v12 = vld [vmem:[#allocation3 + $0x170] sm:$0xff]  ;;  %v3972_v13 = vld [vmem:[#allocation3 + $0x168] sm:$0xff]  ;;  %v4052_v49 = vunpack.c.0.s8 %v262_v43 }
   0xb   :  { %169 = vmatpush.msra.mxu1 %v3946_v4  ;;  %149 = vmatpush.msra.mxu0 %v3948_v5  ;;  %v3976_v14 = vld [vmem:[#allocation3 + $0x148] sm:$0xff]  ;;  %v3978_v15 = vld [vmem:[#allocation3 + $0x140] sm:$0xff]  ;;  %v3984_v17 = vld [vmem:[#allocation3 + $0x118] sm:$0xff]  ;;  %6749 = vst [vmem:[#allocation18_spill] sm:$0xff] %v4049_v46 }
   0xc   :  { %v3982_v16 = vld [vmem:[#allocation3 + $0x120] sm:$0xff]  ;;  %v3988_v18 = vld [vmem:[#allocation3 + $0xf8] sm:$0xff]  ;;  %v3990_v19 = vld [vmem:[#allocation3 + $0xf0] sm:$0xff]  ;;  %6750 = vst [vmem:[#allocation19_spill] sm:$0xff] %v4052_v49 }
   0xd   :  { %170 = vmatpush.msra.mxu1 %v3952_v6  ;;  %150 = vmatpush.msra.mxu0 %v3954_v7  ;;  %v3994_v20 = vld [vmem:[#allocation3 + $0xd0] sm:$0xff]  ;;  %v3996_v21 = vld [vmem:[#allocation3 + $0xc8] sm:$0xff]  ;;  %v4002_v23 = vld [vmem:[#allocation3 + $0xa0] sm:$0xff] }
   0xe   :  { %v4000_v22 = vld [vmem:[#allocation3 + $0xa8] sm:$0xff]  ;;  %6740 = vst [vmem:[#allocation9_spill] sm:$0xff] %v4002_v23  ;;  %v4006_v24 = vld [vmem:[#allocation3 + $0x80] sm:$0xff]  ;;  %v4008_v25 = vld [vmem:[#allocation3 + $0x78] sm:$0xff] }
   0xf   :  { %171 = vmatpush.msra.mxu1 %v3958_v8  ;;  %151 = vmatpush.msra.mxu0 %v3960_v9  ;;  %6741 = vst [vmem:[#allocation10_spill] sm:$0xff] %v4008_v25  ;;  %v4012_v26 = vld [vmem:[#allocation3 + $0x58] sm:$0xff]  ;;  %v4014_v27 = vld [vmem:[#allocation3 + $0x50] sm:$0xff]  ;;  %v4020_v29 = vld [vmem:[#allocation3 + $0x28] sm:$0xff] }
  0x10   :  { %6742 = vst [vmem:[#allocation11_spill] sm:$0xff] %v4012_v26  ;;  %v4018_v28 = vld [vmem:[#allocation3 + $0x30] sm:$0xff]  ;;  %v4024_v30 = vld [vmem:[#allocation3 + $0x8] sm:$0xff]  ;;  %v4026_v31 = vld [vmem:[#allocation3] sm:$0xff] }
  0x11   :  { %172 = vmatpush.msra.mxu1 %v3964_v10  ;;  %152 = vmatpush.msra.mxu0 %v3966_v11  ;;  %6743 = vst [vmem:[#allocation12_spill] sm:$0xff] %v4014_v27  ;;  %v4033_v32 = vld [vmem:[%s6565_s3] sm:$0x1]  ;;  %v4057_v53 = vld [vmem:[#allocation3 + $0x268] sm:$0xff]  ;;  %v4059_v54 = vld [vmem:[#allocation3 + $0x240] sm:$0xff] }
  0x12   :  { %6744 = vst [vmem:[#allocation13_spill] sm:$0xff] %v4018_v28  ;;  %v4042_v33 = vld [vmem:[%s6567_s5] sm:$0x1f]  ;;  %187 = vmatpush.msra.mxu2 %v4057_v53  ;;  %v4065_v56 = vld [vmem:[#allocation3 + $0x1f0] sm:$0xff]  ;;  %v4073_v58 = vld [vmem:[#allocation3 + $0x1c8] sm:$0xff] }
  0x13   :  { %173 = vmatpush.msra.mxu1 %v3970_v12  ;;  %153 = vmatpush.msra.mxu0 %v3972_v13  ;;  %6745 = vst [vmem:[#allocation14_spill] sm:$0xff] %v4020_v29  ;;  %v138_v34 = vperm.slane %v4042_v33, 1  ;;  %v137_v35 = vperm.slane %v4042_v33, 0  ;;  %v247_v45 = vld [vmem:[%s6562_s0] ss:$8 sm:$0x3] }
  0x14   :  { %6746 = vst [vmem:[#allocation15_spill] sm:$0xff] %v4024_v30  ;;  %v4062_v55 = vld [vmem:[#allocation3 + $0x218] sm:$0xff]  ;;  %188 = vmatpush.msra.mxu2 %v4059_v54  ;;  %v4071_v57 = vld [vmem:[%s6564_s2 + $0x78] sm:$0xff]  ;;  %v4079_v59 = vld [vmem:[%s6564_s2 + $0x70] sm:$0xff] }
  0x15   :  { %174 = vmatpush.msra.mxu1 %v3976_v14  ;;  %154 = vmatpush.msra.mxu0 %v3978_v15  ;;  %6747 = vst [vmem:[#allocation16_spill] sm:$0xff] %v4026_v31  ;;  %v4085_v60 = vld [vmem:[%s6564_s2 + $0x68] sm:$0xff]  ;;  %v4094_v62 = vld [vmem:[%s6564_s2 + $0x60] sm:$0xff]  ;;  %v4125_v42 = vld [vmem:[#allocation3 + $0xb0] sm:$0xff] }
  0x16   :  { %6748 = vst [vmem:[#allocation17_spill] sm:$0xff] %v4042_v33  ;;  %189 = vmatpush.msra.mxu2 %v4062_v55  ;;  %v4087_v61 = vld [vmem:[#allocation3 + $0x1a0] sm:$0xff]  ;;  %v4096_v63 = vld [vmem:[#allocation3 + $0x178] sm:$0xff] }
  0x17   :  { %175 = vmatpush.msra.mxu1 %v3982_v16  ;;  %155 = vmatpush.msra.mxu0 %v3984_v17  ;;  %6751 = vst [vmem:[#allocation20_spill] sm:$0xff] %v4071_v57  ;;  %v4118_v38 = vld [vmem:[#allocation3 + $0x100] sm:$0xff]  ;;  %v4122_v39 = vld [vmem:[#allocation3 + $0xd8] sm:$0xff] }
  0x18   :  { %6752 = vst [vmem:[#allocation21_spill] sm:$0xff] %v4079_v59  ;;  %190 = vmatpush.msra.mxu2 %v4065_v56  ;;  %v4190_v33 = vld [vmem:[%s6564_s2 + $0xc8] sm:$0xff] }
  0x19   :  { %176 = vmatpush.msra.mxu1 %v3988_v18  ;;  %156 = vmatpush.msra.mxu0 %v3990_v19  ;;  %6753 = vst [vmem:[#allocation22_spill] sm:$0xff] %v4085_v60 }
  0x1a   :  { %191 = vmatpush.msra.mxu2 %v4073_v58  ;;  %6754 = vst [vmem:[#allocation23_spill] sm:$0xff] %v4094_v62 }
  0x1b   :  { %177 = vmatpush.msra.mxu1 %v3994_v20  ;;  %157 = vmatpush.msra.mxu0 %v3996_v21 }
  0x1c   :  { %192 = vmatpush.msra.mxu2 %v4087_v61 }
  0x1d   :  { %178 = vmatpush.msra.mxu1 %v4000_v22  ;;  %158 = vmatpush.msra.mxu0 %v4002_v23  ;;  %v118_v23 = vld [vmem:[#allocation3 + $0x1f8] sm:$0xff] }
  0x1e   :  { %193 = vmatpush.msra.mxu2 %v4096_v63 }
  0x1f   :  { %179 = vmatpush.msra.mxu1 %v4006_v24  ;;  %159 = vmatpush.msra.mxu0 %v4008_v25  ;;  %v128_v25 = vld [vmem:[#allocation3 + $0x248] sm:$0xff] }
  0x21   :  { %180 = vmatpush.msra.mxu1 %v4012_v26  ;;  %160 = vmatpush.msra.mxu0 %v4014_v27  ;;  %v4291_v27 = vld [vmem:[%s6564_s2] sm:$0xff]  ;;  %v123_v26 = vld [vmem:[#allocation3 + $0x220] sm:$0xff] }
  0x22   :  { %6766 = vst [vmem:[#allocation35_spill] sm:$0xff] %v4291_v27 }
  0x23   :  { %181 = vmatpush.msra.mxu1 %v4018_v28  ;;  %161 = vmatpush.msra.mxu0 %v4020_v29  ;;  %v4262_v29 = vld [vmem:[%s6564_s2 + $0x98] sm:$0xff]  ;;  %v4296_v28 = vld [vmem:[%s6564_s2 + $0x80] sm:$0xff] }
  0x25   :  { %182 = vmatpush.msra.mxu1 %v4024_v30  ;;  %162 = vmatpush.msra.mxu0 %v4026_v31  ;;  %v4238_v31 = vld [vmem:[%s6564_s2 + $0xa8] sm:$0xff] }
  0x26   :  { %183 = vmatmul.f32.vlgmr.msra.gmra.mxu1 %v4033_v32  ;;  %163 = vmatmul.f32.vlgmr.msra.gmra.mxu0 %v4033_v32  ;;  %v4279_v30 = vld [vmem:[%s6564_s2 + $0x8] sm:$0xff] }
  0x27   :  { %321 = vmatpush.msrb.mxu1 %v4071_v57  ;;  %v4274_v57 = vld [vmem:[%s6564_s2 + $0x90] sm:$0xff]  ;;  %6765 = vst [vmem:[#allocation34_spill] sm:$0xff] %v4279_v30 }
  0x29   :  { %322 = vmatpush.msrb.mxu1 %v4079_v59  ;;  %v4250_v59 = vld [vmem:[%s6564_s2 + $0xa0] sm:$0xff] }
  0x2b   :  { %323 = vmatpush.msrb.mxu1 %v4085_v60  ;;  %v4226_v60 = vld [vmem:[%s6564_s2 + $0xb0] sm:$0xff] }
  0x2d   :  { %324 = vmatpush.msrb.mxu1 %v4094_v62  ;;  %v4214_v62 = vld [vmem:[%s6564_s2 + $0xb8] sm:$0xff] }
  0xa3   :  { %v184_v36 = vpop.f32.mrf.mxu1  ;;  %v164_v37 = vpop.f32.mrf.mxu0 }
  0xa4   :  { %v185_v40 = vadd.f32 %v184_v36, %v138_v34  ;;  %v165_v41 = vadd.f32 %v164_v37, %v137_v35  ;;  %v4103_v34 = vld [vmem:[%s6564_s2 + $0x58] sm:$0xff]  ;;  %v4112_v36 = vld [vmem:[%s6564_s2 + $0x50] sm:$0xff] }
  0xa5   :  { %6755 = vst [vmem:[#allocation24_spill] sm:$0xff] %v4103_v34  ;;  %v4105_v35 = vld [vmem:[#allocation3 + $0x150] sm:$0xff]  ;;  %v4114_v37 = vld [vmem:[#allocation3 + $0x128] sm:$0xff]  ;;  %325 = vmatpush.msrb.mxu1 %v4103_v34  ;;  %v4202_v34 = vld [vmem:[%s6564_s2 + $0xc0] sm:$0xff] }
  0xa6   :  { %v250_v44 = vrot.slane %v185_v40, 7  ;;  %6756 = vst [vmem:[#allocation25_spill] sm:$0xff] %v4112_v36  ;;  %194 = vmatpush.msra.mxu2 %v4105_v35 }
  0xa7   :  { %326 = vmatpush.msrb.mxu1 %v4112_v36  ;;  %v4197_v36 = vld [vmem:[%s6564_s2 + $0x40] sm:$0xff] }
  0xa8   :  { %v252_v47 = vsel %vm251_vm0, %v165_v41, %v250_v44  ;;  %195 = vmatpush.msra.mxu2 %v4114_v37  ;;  %v4128_v44 = vld [vmem:[#allocation3 + $0x88] sm:$0xff]  ;;  %6758 = vst [vmem:[#allocation27_spill] sm:$0xff] %v4197_v36 }
  0xa9   :  { %v254_v48 = vadd.f32 %v252_v47, %v247_v45  ;;  %v4131_v45 = vld [vmem:[#allocation3 + $0x60] sm:$0xff]  ;;  %v4134_v47 = vld [vmem:[#allocation3 + $0x38] sm:$0xff] }
  0xaa   :  { %196 = vmatpush.msra.mxu2 %v4118_v38 }
  0xab   :  { %v259_v50 = vperm.slane %v254_v48, %v4049_v46  ;;  %v4137_v48 = vld [vmem:[#allocation3 + $0x10] sm:$0xff]  ;;  %v4185_v46 = vld [vmem:[%s6564_s2 + $0x48] sm:$0xff] }
  0xac   :  { %197 = vmatpush.msra.mxu2 %v4122_v39  ;;  %6757 = vst [vmem:[#allocation26_spill] sm:$0xff] %v4185_v46  ;;  %327 = vmatpush.msrb.mxu1 %v4185_v46  ;;  %v4209_v46 = vld [vmem:[%s6564_s2 + $0x38] sm:$0xff] }
  0xad   :  { %v264_v51 = vperm.slane %v259_v50, %v4052_v49  ;;  %v4143_v50 = vld [vmem:[%s6564_s2 + $0xf8] sm:$0xff]  ;;  %v4178_v49 = vld [vmem:[%s6564_s2 + $0xd0] sm:$0xff]  ;;  %6759 = vst [vmem:[#allocation28_spill] sm:$0xff] %v4209_v46 }
  0xae   :  { %198 = vmatpush.msra.mxu2 %v4125_v42  ;;  %328 = vmatpush.msrb.mxu1 %v4197_v36  ;;  %v4221_v36 = vld [vmem:[%s6564_s2 + $0x30] sm:$0xff] }
  0xaf   :  { %v266_v52 = vsel %vm265_vm1, %v264_v51, -inf  ;;  %6760 = vst [vmem:[#allocation29_spill] sm:$0xff] %v4221_v36 }
  0xb0   :  { %267 = vmax.xlane.f32.xlu0 %v266_v52  ;;  %199 = vmatpush.msra.mxu2 %v4128_v44 }
  0xb1   :  { %329 = vmatpush.msrb.mxu1 %v4209_v46  ;;  %v4233_v46 = vld [vmem:[%s6564_s2 + $0x28] sm:$0xff] }
  0xb2   :  { %200 = vmatpush.msra.mxu2 %v4131_v45  ;;  %6761 = vst [vmem:[#allocation30_spill] sm:$0xff] %v4233_v46 }
  0xb3   :  { %330 = vmatpush.msrb.mxu1 %v4221_v36  ;;  %v4245_v36 = vld [vmem:[%s6564_s2 + $0x20] sm:$0xff] }
  0xb4   :  { %201 = vmatpush.msra.mxu2 %v4134_v47  ;;  %6762 = vst [vmem:[#allocation31_spill] sm:$0xff] %v4245_v36 }
  0xb5   :  { %331 = vmatpush.msrb.mxu1 %v4233_v46  ;;  %v4257_v46 = vld [vmem:[%s6564_s2 + $0x18] sm:$0xff] }
  0xb6   :  { %202 = vmatpush.msra.mxu2 %v4137_v48  ;;  %6763 = vst [vmem:[#allocation32_spill] sm:$0xff] %v4257_v46 }
  0xb7   :  { %203 = vmatmul.f32.vlgmr.msra.gmra.mxu2 %v4033_v32  ;;  %332 = vmatpush.msrb.mxu1 %v4245_v36  ;;  %v4269_v36 = vld [vmem:[%s6564_s2 + $0x10] sm:$0xff] }
  0xb8   :  { %341 = vmatpush.msrb.mxu2 %v4143_v50  ;;  %6764 = vst [vmem:[#allocation33_spill] sm:$0xff] %v4269_v36 }
  0xb9   :  { %333 = vmatpush.msrb.mxu1 %v4257_v46  ;;  %v4286_v46 = vld [vmem:[%s6564_s2 + $0x88] sm:$0xff] }
  0xbb   :  { %334 = vmatpush.msrb.mxu1 %v4269_v36  ;;  %v133_v36 = vld [vmem:[#allocation3 + $0x270] sm:$0xff] }
  0xbc   :  { %207 = vmatpush.msra.mxu3 %v133_v36 }
  0xbd   :  { %335 = vmatpush.msrb.mxu1 %v4279_v30  ;;  %v113_v30 = vld [vmem:[#allocation3 + $0x1d0] sm:$0xff] }
  0xbe   :  { %208 = vmatpush.msra.mxu3 %v128_v25 }
  0xbf   :  { %336 = vmatpush.msrb.mxu1 %v4291_v27  ;;  %v108_v27 = vld [vmem:[#allocation3 + $0x1a8] sm:$0xff] }
  0xc0   :  { %209 = vmatpush.msra.mxu3 %v123_v26 }
  0xc1   :  { %628 = vmatpush.msra.mxu1 %v4057_v53  ;;  %v103_v53 = vld [vmem:[#allocation3 + $0x180] sm:$0xff] }
  0xc2   :  { %210 = vmatpush.msra.mxu3 %v118_v23 }
  0xc3   :  { %629 = vmatpush.msra.mxu1 %v4059_v54  ;;  %v98_v54 = vld [vmem:[#allocation3 + $0x158] sm:$0xff] }
  0xc4   :  { %211 = vmatpush.msra.mxu3 %v113_v30 }
  0xc5   :  { %630 = vmatpush.msra.mxu1 %v4062_v55 }
  0xc6   :  { %212 = vmatpush.msra.mxu3 %v108_v27 }
  0xc7   :  { %631 = vmatpush.msra.mxu1 %v4065_v56  ;;  %v3871_v56 = vmov 1966171168  }
  0xc8   :  { %213 = vmatpush.msra.mxu3 %v103_v53 }
  0xc9   :  { %632 = vmatpush.msra.mxu1 %v4073_v58  ;;  %v281_v58 = vunpack.c.l.s4 %v3871_v56  ;;  %v4415_v56 = vld [vmem:[#allocation3 + $0x98] sm:$0xff] }
  0xca   :  { %214 = vmatpush.msra.mxu3 %v98_v54 }
  0xcb   :  { %633 = vmatpush.msra.mxu1 %v4087_v61  ;;  %v78_v61 = vld [vmem:[#allocation3 + $0xb8] sm:$0xff] }
  0xcd   :  { %634 = vmatpush.msra.mxu1 %v4096_v63 }
  0xcf   :  { %635 = vmatpush.msra.mxu1 %v4105_v35  ;;  %v73_v35 = vld [vmem:[#allocation3 + $0x90] sm:$0xff] }
  0xd1   :  { %636 = vmatpush.msra.mxu1 %v4114_v37  ;;  %v4314_v37 = vunpack.c.0.s8 %v281_v58 }
  0xd3   :  { %637 = vmatpush.msra.mxu1 %v4118_v38  ;;  %6767 = vst [vmem:[#allocation36_spill] sm:$0xff] %v4314_v37  ;;  %v68_v38 = vld [vmem:[#allocation3 + $0x68] sm:$0xff] }
  0xd5   :  { %638 = vmatpush.msra.mxu1 %v4122_v39 }
  0xd7   :  { %639 = vmatpush.msra.mxu1 %v4125_v42 }
  0xd9   :  { %640 = vmatpush.msra.mxu1 %v4128_v44  ;;  %v4377_v44 = vld [vmem:[%s6568_s6 + $0x8] sm:$0xff] }
  0xdb   :  { %641 = vmatpush.msra.mxu1 %v4131_v45  ;;  %v4381_v45 = vld [vmem:[#allocation3 + $0x228] sm:$0xff] }
  0xdd   :  { %642 = vmatpush.msra.mxu1 %v4134_v47  ;;  %v4383_v47 = vld [vmem:[#allocation3 + $0x200] sm:$0xff] }
  0xdf   :  { %643 = vmatpush.msra.mxu1 %v4137_v48  ;;  %v4386_v48 = vld [vmem:[#allocation3 + $0x1d8] sm:$0xff] }
 0x123   :  { %v268_v40 = vpop.xlane.xlu0 %267 }
 0x124   :  { %v269_v41 = vsub.f32 %v264_v51, %v268_v40  ;;  %v4153_v40 = vld [vmem:[%s6564_s2 + $0xf0] sm:$0xff] }
 0x125   :  { %342 = vmatpush.msrb.mxu2 %v4153_v40 }
 0x126   :  { %v270_v43 = vmul.f32 1.442695, %v269_v41  ;;  %v4159_v41 = vld [vmem:[%s6564_s2 + $0xe8] sm:$0xff] }
 0x127   :  { %343 = vmatpush.msrb.mxu2 %v4159_v41 }
 0x128   :  { %3698 = vpow2.f32 %v270_v43  ;;  %v4166_v43 = vld [vmem:[%s6564_s2 + $0xe0] sm:$0xff] }
 0x129   :  { %344 = vmatpush.msrb.mxu2 %v4166_v43 }
 0x12e   :  { %v4145_v51 = vpop.eup %3698 }
 0x12f   :  { %v272_v52 = vsel %vm265_vm1, %v4145_v51, 0.0 }
 0x130   :  { %273 = vadd.xlane.f32.xlu0 %v272_v52  ;;  %v4172_v52 = vld [vmem:[%s6564_s2 + $0xd8] sm:$0xff] }
 0x131   :  { %345 = vmatpush.msrb.mxu2 %v4172_v52 }
 0x133   :  { %346 = vmatpush.msrb.mxu2 %v4178_v49 }
 0x135   :  { %347 = vmatpush.msrb.mxu2 %v4190_v33 }
 0x137   :  { %348 = vmatpush.msrb.mxu2 %v4202_v34 }
 0x139   :  { %349 = vmatpush.msrb.mxu2 %v4214_v62 }
 0x13b   :  { %350 = vmatpush.msrb.mxu2 %v4226_v60 }
 0x13d   :  { %351 = vmatpush.msrb.mxu2 %v4238_v31 }
 0x13f   :  { %352 = vmatpush.msrb.mxu2 %v4250_v59 }
 0x141   :  { %353 = vmatpush.msrb.mxu2 %v4262_v29 }
 0x143   :  { %354 = vmatpush.msrb.mxu2 %v4274_v57 }
 0x145   :  { %355 = vmatpush.msrb.mxu2 %v4286_v46 }
 0x147   :  { %356 = vmatpush.msrb.mxu2 %v4296_v28 }
 0x149   :  { %648 = vmatpush.msra.mxu2 %v133_v36 }
 0x14b   :  { %649 = vmatpush.msra.mxu2 %v128_v25 }
 0x14d   :  { %650 = vmatpush.msra.mxu2 %v123_v26  ;;  %v93_v26 = vld [vmem:[#allocation3 + $0x130] sm:$0xff] }
 0x14e   :  { %215 = vmatpush.msra.mxu3 %v93_v26 }
 0x14f   :  { %651 = vmatpush.msra.mxu2 %v118_v23  ;;  %v88_v23 = vld [vmem:[#allocation3 + $0x108] sm:$0xff] }
 0x150   :  { %216 = vmatpush.msra.mxu3 %v88_v23 }
 0x151   :  { %652 = vmatpush.msra.mxu2 %v113_v30  ;;  %v83_v30 = vld [vmem:[#allocation3 + $0xe0] sm:$0xff] }
 0x152   :  { %217 = vmatpush.msra.mxu3 %v83_v30 }
 0x153   :  { %653 = vmatpush.msra.mxu2 %v108_v27 }
 0x154   :  { %218 = vmatpush.msra.mxu3 %v78_v61 }
 0x155   :  { %654 = vmatpush.msra.mxu2 %v103_v53 }
 0x156   :  { %219 = vmatpush.msra.mxu3 %v73_v35 }
 0x157   :  { %655 = vmatpush.msra.mxu2 %v98_v54  ;;  %v4406_v54 = vld [vmem:[#allocation3 + $0xe8] sm:$0xff] }
 0x158   :  { %220 = vmatpush.msra.mxu3 %v68_v38 }
 0x159   :  { %656 = vmatpush.msra.mxu2 %v93_v26  ;;  %v4409_v26 = vld [vmem:[#allocation3 + $0xc0] sm:$0xff] }
 0x15b   :  { %657 = vmatpush.msra.mxu2 %v88_v23 }
 0x15d   :  { %658 = vmatpush.msra.mxu2 %v83_v30 }
 0x15f   :  { %659 = vmatpush.msra.mxu2 %v78_v61  ;;  %v4418_v61 = vld [vmem:[#allocation3 + $0x70] sm:$0xff] }
 0x161   :  { %660 = vmatpush.msra.mxu2 %v73_v35  ;;  %v4424_v35 = vld [vmem:[%s6568_s6 + $0x58] sm:$0xff] }
 0x163   :  { %661 = vmatpush.msra.mxu2 %v68_v38  ;;  %v4433_v38 = vld [vmem:[%s6568_s6 + $0x40] sm:$0xff] }
 0x1a3   :  { %v274_v25 = vpop.xlane.xlu0 %273 }
 0x1a4   :  { %3700 = vrcp.f32 %v274_v25 }
 0x1aa   :  { %v3701_v27 = vpop.eup %3700 }
 0x1ab   :  { %v276_v55 = vmul.f32 %v3701_v27, %v274_v25 }
 0x1ad   :  { %v277_v63 = vsub.f32 2.0, %v276_v55 }
 0x1af   :  { %v278_v36 = vmul.f32 %v3701_v27, %v277_v63  ;;  %v361_v27 = vld [vmem:[%s6563_s1] sm:$0x1] }
 0x1b1   :  { %v279_v53 = vmul.f32 %v4145_v51, %v278_v36  ;;  %v4392_v51 = vpop.f32.mrf.mxu2  ;;  %v4426_v36 = vld [vmem:[#allocation3 + $0x48] sm:$0xff] }
 0x1b3   :  { %v283_v39 = vperm.slane %v279_v53, %v4314_v37  ;;  %v4435_v53 = vld [vmem:[#allocation3 + $0x20] sm:$0xff] }
 0x1b5   :  { %v317_v42 = vperm.slane %v283_v39, 0  ;;  %v318_v25 = vperm.slane %v283_v39, 4  ;;  %v4442_v39 = vld [vmem:[%s6568_s6 + $0x28] sm:$0xff] }
 0x1b7   :  { %337 = vmatmul.f32.vlgmr.msrb.gmra.mxu1 %v317_v42  ;;  %357 = vmatmul.f32.vlgmr.msrb.gmra.mxu2 %v318_v25  ;;  %v4449_v42 = vld [vmem:[%s6568_s6 + $0x10] sm:$0xff] }
 0x1b8   :  { %781 = vmatpush.msrb.mxu1 %v4143_v50  ;;  %v4389_v50 = vld [vmem:[#allocation3 + $0x1b0] sm:$0xff] }
 0x1ba   :  { %782 = vmatpush.msrb.mxu1 %v4153_v40  ;;  %v4395_v40 = vld [vmem:[#allocation3 + $0x188] sm:$0xff] }
 0x1bc   :  { %783 = vmatpush.msrb.mxu1 %v4159_v41  ;;  %v4397_v41 = vld [vmem:[#allocation3 + $0x160] sm:$0xff] }
 0x1be   :  { %784 = vmatpush.msrb.mxu1 %v4166_v43  ;;  %v4400_v43 = vld [vmem:[#allocation3 + $0x138] sm:$0xff] }
 0x1c0   :  { %785 = vmatpush.msrb.mxu1 %v4172_v52  ;;  %v4403_v52 = vld [vmem:[#allocation3 + $0x110] sm:$0xff] }
 0x1c2   :  { %786 = vmatpush.msrb.mxu1 %v4178_v49  ;;  %v63_v49 = vld [vmem:[#allocation3 + $0x40] sm:$0xff] }
 0x1c3   :  { %221 = vmatpush.msra.mxu3 %v63_v49  ;;  %662 = vmatpush.msra.mxu2 %v63_v49  ;;  %v376_v49 = vld [vmem:[%s6569_s7] sm:$0x7] }
 0x1c4   :  { %787 = vmatpush.msrb.mxu1 %v4190_v33  ;;  %v58_v33 = vld [vmem:[#allocation3 + $0x18] sm:$0xff] }
 0x1c5   :  { %222 = vmatpush.msra.mxu3 %v58_v33  ;;  %663 = vmatpush.msra.mxu2 %v58_v33  ;;  %v6792_v33 = vld [vmem:[#allocation17_spill] sm:$0xff] }
 0x1c6   :  { %788 = vmatpush.msrb.mxu1 %v4202_v34  ;;  %223 = vmatmul.f32.vlgmr.msra.gmra.mxu3 %v4033_v32  ;;  %v4370_v34 = vld [vmem:[%s6568_s6 + $0x20] sm:$0xff] }
 0x1c8   :  { %789 = vmatpush.msrb.mxu1 %v4214_v62  ;;  %v4365_v62 = vld [vmem:[#allocation3 + $0x250] sm:$0xff] }
 0x1ca   :  { %790 = vmatpush.msrb.mxu1 %v4226_v60  ;;  %v373_v60 = vld [vmem:[%s6568_s6 + $0x48] sm:$0xff] }
 0x1cb   :  { %839 = vmatpush.msrb.mxu2 %v373_v60  ;;  %400 = vmatpush.msrb.mxu3 %v373_v60  ;;  %v139_v60 = vperm.slane %v6792_v33, 2 }
 0x1cc   :  { %791 = vmatpush.msrb.mxu1 %v4238_v31  ;;  %v364_v31 = vld [vmem:[%s6568_s6] sm:$0xff] }
 0x1ce   :  { %792 = vmatpush.msrb.mxu1 %v4250_v59  ;;  %v4361_v59 = vld [vmem:[#allocation3 + $0x278] sm:$0xff] }
 0x1cf   :  { %227 = vmatpush.msrb.mxu0 %v4361_v59 }
 0x1d0   :  { %793 = vmatpush.msrb.mxu1 %v4262_v29  ;;  %v370_v29 = vld [vmem:[%s6568_s6 + $0x30] sm:$0xff] }
 0x1d1   :  { %401 = vmatpush.msrb.mxu3 %v370_v29  ;;  %840 = vmatpush.msrb.mxu2 %v370_v29  ;;  %v378_v29 = vperm.slane %v376_v49, 0 }
 0x1d2   :  { %794 = vmatpush.msrb.mxu1 %v4274_v57  ;;  %v4359_v57 = vld [vmem:[%s6568_s6 + $0x38] sm:$0xff]  ;;  %228 = vmatpush.msrb.mxu0 %v4365_v62 }
 0x1d4   :  { %795 = vmatpush.msrb.mxu1 %v4286_v46  ;;  %v4354_v46 = vld [vmem:[%s6568_s6 + $0x50] sm:$0xff]  ;;  %229 = vmatpush.msrb.mxu0 %v4381_v45 }
 0x1d6   :  { %796 = vmatpush.msrb.mxu1 %v4296_v28  ;;  %v367_v28 = vld [vmem:[%s6568_s6 + $0x18] sm:$0xff]  ;;  %230 = vmatpush.msrb.mxu0 %v4383_v47 }
 0x1d7   :  { %402 = vmatpush.msrb.mxu3 %v367_v28  ;;  %841 = vmatpush.msrb.mxu2 %v367_v28 }
 0x1d8   :  { %231 = vmatpush.msrb.mxu0 %v4386_v48 }
 0x1d9   :  { %403 = vmatpush.msrb.mxu3 %v364_v31  ;;  %842 = vmatpush.msrb.mxu2 %v364_v31  ;;  %v205_v31 = vadd.f32 %v4392_v51, %v139_v60 }
 0x1da   :  { %232 = vmatpush.msrb.mxu0 %v4389_v50 }
 0x1db   :  { %420 = vmatpush.msra.mxu3 %v4354_v46 }
 0x1dc   :  { %233 = vmatpush.msrb.mxu0 %v4395_v40 }
 0x1dd   :  { %421 = vmatpush.msra.mxu3 %v4359_v57 }
 0x1de   :  { %234 = vmatpush.msrb.mxu0 %v4397_v41 }
 0x1df   :  { %422 = vmatpush.msra.mxu3 %v4370_v34 }
 0x1e0   :  { %235 = vmatpush.msrb.mxu0 %v4400_v43 }
 0x1e1   :  { %423 = vmatpush.msra.mxu3 %v4377_v44 }
 0x1e2   :  { %236 = vmatpush.msrb.mxu0 %v4403_v52 }
 0x1e4   :  { %237 = vmatpush.msrb.mxu0 %v4406_v54 }
 0x1e6   :  { %238 = vmatpush.msrb.mxu0 %v4409_v26 }
 0x1e8   :  { %239 = vmatpush.msrb.mxu0 %v4415_v56 }
 0x1ea   :  { %240 = vmatpush.msrb.mxu0 %v4418_v61 }
 0x1ec   :  { %241 = vmatpush.msrb.mxu0 %v4426_v36 }
 0x1ee   :  { %242 = vmatpush.msrb.mxu0 %v4435_v53 }
 0x1ef   :  { %243 = vmatmul.f32.vlgmr.msrb.gmra.mxu0 %v4033_v32 }
 0x1f0   :  { %608 = vmatpush.msra.mxu0 %v3936_v0  ;;  %v6768_v0 = vld [vmem:[#allocation9_spill] sm:$0xff] }
 0x1f2   :  { %609 = vmatpush.msra.mxu0 %v3940_v2  ;;  %v6770_v2 = vld [vmem:[#allocation10_spill] sm:$0xff] }
 0x1f4   :  { %610 = vmatpush.msra.mxu0 %v3946_v4  ;;  %v6772_v4 = vld [vmem:[#allocation12_spill] sm:$0xff] }
 0x1f6   :  { %611 = vmatpush.msra.mxu0 %v3952_v6  ;;  %v6774_v6 = vld [vmem:[#allocation20_spill] sm:$0xff] }
 0x1f8   :  { %612 = vmatpush.msra.mxu0 %v3958_v8  ;;  %v6776_v8 = vld [vmem:[#allocation21_spill] sm:$0xff] }
 0x1fa   :  { %613 = vmatpush.msra.mxu0 %v3964_v10  ;;  %v6778_v10 = vld [vmem:[#allocation22_spill] sm:$0xff] }
 0x1fc   :  { %614 = vmatpush.msra.mxu0 %v3970_v12  ;;  %v6780_v12 = vld [vmem:[#allocation24_spill] sm:$0xff] }
 0x1fe   :  { %615 = vmatpush.msra.mxu0 %v3976_v14  ;;  %v6782_v14 = vld [vmem:[#allocation26_spill] sm:$0xff] }
 0x200   :  { %616 = vmatpush.msra.mxu0 %v3982_v16  ;;  %v6784_v16 = vld [vmem:[#allocation28_spill] sm:$0xff] }
 0x202   :  { %617 = vmatpush.msra.mxu0 %v3988_v18  ;;  %v6786_v18 = vld [vmem:[#allocation30_spill] sm:$0xff] }
 0x204   :  { %618 = vmatpush.msra.mxu0 %v3994_v20  ;;  %v6788_v20 = vld [vmem:[#allocation32_spill] sm:$0xff] }
 0x206   :  { %619 = vmatpush.msra.mxu0 %v4000_v22  ;;  %v6790_v22 = vld [vmem:[#allocation34_spill] sm:$0xff] }
 0x208   :  { %620 = vmatpush.msra.mxu0 %v4006_v24  ;;  %v6791_v24 = vld [vmem:[#allocation35_spill] sm:$0xff] }
 0x234   :  { %v338_v23 = vpop.f32.mrf.mxu1 }
 0x23a   :  { %v358_v30 = vpop.f32.mrf.mxu2 }
 0x23b   :  { %v359_v55 = vadd.f32 %v358_v30, %v338_v23 }
 0x23d   :  { %v362_v58 = vadd.f32 %v361_v27, %v359_v55  ;;  %v141_v55 = vperm.slane %v6792_v33, 4 }
 0x23f   :  { %v363_v63 = vmax.f32 %v362_v58, 0.0 }
 0x241   :  { %3643 = vmatmul.msk.f32.vlgmr.msrb.gmra.mxu3 %vm384_vm2, %v363_v63 }
 0x242   :  { %440 = vmatpush.msrb.mxu3 %v4424_v35 }
 0x244   :  { %441 = vmatpush.msrb.mxu3 %v4433_v38 }
 0x246   :  { %442 = vmatpush.msrb.mxu3 %v4442_v39 }
 0x248   :  { %443 = vmatpush.msrb.mxu3 %v4449_v42 }
 0x249   :  { %3644 = vmatmul.msk.f32.vlgmr.msra.gmra.mxu3 %vm384_vm2, %v363_v63  ;;  %v224_v25 = vpop.f32.mrf.mxu3 }
 0x24a   :  { %588 = vmatpush.msra.mxu3 %v3938_v1  ;;  %v6769_v1 = vld [vmem:[#allocation11_spill] sm:$0xff] }
 0x24b   :  { %621 = vmatpush.msra.mxu0 %v6769_v1 }
 0x24c   :  { %589 = vmatpush.msra.mxu3 %v3944_v3  ;;  %v6771_v3 = vld [vmem:[#allocation13_spill] sm:$0xff] }
 0x24d   :  { %622 = vmatpush.msra.mxu0 %v6771_v3 }
 0x24e   :  { %590 = vmatpush.msra.mxu3 %v3948_v5  ;;  %v6773_v5 = vld [vmem:[#allocation15_spill] sm:$0xff] }
 0x24f   :  { %623 = vmatpush.msra.mxu0 %v6773_v5 }
 0x250   :  { %591 = vmatpush.msra.mxu3 %v3954_v7  ;;  %v6775_v7 = vld [vmem:[#allocation14_spill] sm:$0xff] }
 0x251   :  { %3645 = vmatmul.msk.f32.vlgmr.msrb.gmra.mxu3 %vm384_vm2, %v363_v63  ;;  %761 = vmatpush.msrb.mxu0 %v6774_v6 }
 0x252   :  { %592 = vmatpush.msra.mxu3 %v3960_v9  ;;  %v6777_v9 = vld [vmem:[#allocation16_spill] sm:$0xff] }
 0x253   :  { %762 = vmatpush.msrb.mxu0 %v6776_v8 }
 0x254   :  { %593 = vmatpush.msra.mxu3 %v3966_v11  ;;  %v6779_v11 = vld [vmem:[#allocation23_spill] sm:$0xff] }
 0x255   :  { %763 = vmatpush.msrb.mxu0 %v6778_v10 }
 0x256   :  { %594 = vmatpush.msra.mxu3 %v3972_v13  ;;  %v6781_v13 = vld [vmem:[#allocation25_spill] sm:$0xff] }
 0x257   :  { %764 = vmatpush.msrb.mxu0 %v6779_v11 }
 0x258   :  { %595 = vmatpush.msra.mxu3 %v3978_v15  ;;  %v6783_v15 = vld [vmem:[#allocation27_spill] sm:$0xff] }
 0x259   :  { %765 = vmatpush.msrb.mxu0 %v6780_v12 }
 0x25a   :  { %596 = vmatpush.msra.mxu3 %v3984_v17  ;;  %v6785_v17 = vld [vmem:[#allocation29_spill] sm:$0xff] }
 0x25b   :  { %766 = vmatpush.msrb.mxu0 %v6781_v13 }
 0x25c   :  { %597 = vmatpush.msra.mxu3 %v3990_v19  ;;  %v6787_v19 = vld [vmem:[#allocation31_spill] sm:$0xff] }
 0x25d   :  { %767 = vmatpush.msrb.mxu0 %v6782_v14 }
 0x25e   :  { %598 = vmatpush.msra.mxu3 %v3996_v21  ;;  %v6789_v21 = vld [vmem:[#allocation33_spill] sm:$0xff] }
 0x25f   :  { %768 = vmatpush.msrb.mxu0 %v6783_v15 }
 0x260   :  { %599 = vmatpush.msra.mxu3 %v6768_v0 }
 0x261   :  { %769 = vmatpush.msrb.mxu0 %v6784_v16 }
 0x262   :  { %600 = vmatpush.msra.mxu3 %v6770_v2 }
 0x263   :  { %770 = vmatpush.msrb.mxu0 %v6785_v17 }
 0x264   :  { %601 = vmatpush.msra.mxu3 %v6772_v4 }
 0x265   :  { %771 = vmatpush.msrb.mxu0 %v6786_v18 }
 0x266   :  { %602 = vmatpush.msra.mxu3 %v6775_v7 }
 0x267   :  { %772 = vmatpush.msrb.mxu0 %v6787_v19 }
 0x268   :  { %603 = vmatpush.msra.mxu3 %v6777_v9 }
 0x269   :  { %773 = vmatpush.msrb.mxu0 %v6788_v20 }
 0x26a   :  { %668 = vmatpush.msrb.mxu3 %v4361_v59 }
 0x26b   :  { %774 = vmatpush.msrb.mxu0 %v6789_v21 }
 0x26c   :  { %669 = vmatpush.msrb.mxu3 %v4365_v62  ;;  %v244_v58 = vpop.f32.mrf.mxu0 }
 0x26d   :  { %775 = vmatpush.msrb.mxu0 %v6790_v22  ;;  %v245_v0 = vadd.f32 %v244_v58, %v141_v55 }
 0x26e   :  { %670 = vmatpush.msrb.mxu3 %v4381_v45  ;;  %v140_v45 = vperm.slane %v6792_v33, 3 }
 0x26f   :  { %776 = vmatpush.msrb.mxu0 %v6791_v24 }
 0x270   :  { %671 = vmatpush.msrb.mxu3 %v4383_v47 }
 0x272   :  { %672 = vmatpush.msrb.mxu3 %v4386_v48  ;;  %v379_v48 = vperm.slane %v376_v49, 1 }
 0x274   :  { %673 = vmatpush.msrb.mxu3 %v4389_v50 }
 0x276   :  { %674 = vmatpush.msrb.mxu3 %v4395_v40  ;;  %v225_v40 = vadd.f32 %v224_v25, %v140_v45 }
 0x278   :  { %675 = vmatpush.msrb.mxu3 %v4397_v41 }
 0x27a   :  { %676 = vmatpush.msrb.mxu3 %v4400_v43 }
 0x27c   :  { %677 = vmatpush.msrb.mxu3 %v4403_v52 }
 0x27e   :  { %678 = vmatpush.msrb.mxu3 %v4406_v54 }
 0x280   :  { %679 = vmatpush.msrb.mxu3 %v4409_v26 }
 0x282   :  { %680 = vmatpush.msrb.mxu3 %v4415_v56 }
 0x284   :  { %681 = vmatpush.msrb.mxu3 %v4418_v61 }
 0x286   :  { %682 = vmatpush.msrb.mxu3 %v4426_v36 }
 0x288   :  { %683 = vmatpush.msrb.mxu3 %v4435_v53  ;;  %v380_v53 = vperm.slane %v376_v49, 2 }
 0x2c4   :  { %v405_v28 = vpop.f32.mrf.mxu3 }
 0x2c5   :  { %v406_v59 = vadd.f32 %v405_v28, %v378_v29 }
 0x2c7   :  { %v448_v62 = vadd.f32 %v406_v59, %v205_v31  ;;  %v6793_v31 = vld [vmem:[#allocation18_spill] sm:$0xff] }
 0x2c9   :  { %v3646_v47 = vmul.f32 -1.442695, %v448_v62  ;;  %v6794_v62 = vld [vmem:[#allocation19_spill] sm:$0xff] }
 0x2cb   :  { %3702 = vpow2.f32 %v3646_v47 }
 0x2cc   :  { %v425_v50 = vpop.f32.mrf.mxu3 }
 0x2cd   :  { %v426_v41 = vadd.f32 %v425_v50, %v379_v48 }
 0x2cf   :  { %v468_v43 = vadd.f32 %v426_v41, %v225_v40 }
 0x2d1   :  { %v3703_v52 = vpop.eup %3702  ;;  %v3647_v54 = vmul.f32 -1.442695, %v468_v43 }
 0x2d2   :  { %v452_v26 = vadd.f32 1.0, %v3703_v52 }
 0x2d3   :  { %3704 = vpow2.f32 %v3647_v54 }
 0x2d4   :  { %3706 = vrcp.f32 %v452_v26  ;;  %v464_v61 = vand.u32 2147483648, %v452_v26  ;;  %v462_v36 = vand.u32 2147483647, %v452_v26  ;;  %vm458_vm4 = vweird.f32 %v452_v26  ;;  %v445_v3 = vpop.f32.mrf.mxu3 }
 0x2d5   :  { %v446_v9 = vadd.f32 %v445_v3, %v380_v53  ;;  %v4569_v3 = vld [vmem:[#allocation3 + $0x230] sm:$0xff] }
 0x2d6   :  { %v465_v4 = vor.u32 1.1754944e-38, %v464_v61  ;;  %vm463_vm6 = vcmp.eq.f32.partialorder %v462_v36, 8.507059e+37  ;;  %v801_v36 = vld [vmem:[%s6563_s1 + $0x1] sm:$0x1]  ;;  %6796 = vst [vmem:[#allocation11_spill] sm:$0xff] %v4569_v3 }
 0x2d9   :  { %v3705_v23 = vpop.eup %3704 }
 0x2da   :  { %v3707_v30 = vpop.eup %3706  ;;  %v472_v27 = vadd.f32 1.0, %v3705_v23 }
 0x2db   :  { %v454_v51 = vmul.f32 %v3707_v30, %v452_v26  ;;  %vm459_vm3 = vweird.f32 %v3707_v30 }
 0x2dc   :  { %3708 = vrcp.f32 %v472_v27  ;;  %vm460_vm5 = vmor %vm458_vm4, %vm459_vm3  ;;  %v484_v11 = vand.u32 2147483648, %v472_v27  ;;  %v482_v13 = vand.u32 2147483647, %v472_v27  ;;  %vm478_vm8 = vweird.f32 %v472_v27 }
 0x2dd   :  { %v455_v56 = vsub.f32 1.0, %v454_v51 }
 0x2de   :  { %v485_v16 = vor.u32 1.1754944e-38, %v484_v11  ;;  %vm483_vm10 = vcmp.eq.f32.partialorder %v482_v13, 8.507059e+37  ;;  %v4606_v11 = vld [vmem:[#allocation3 + $0x268] sm:$0xff]  ;;  %v4612_v13 = vld [vmem:[#allocation3 + $0x78] sm:$0xff] }
 0x2df   :  { %v456_v63 = vmul.f32 %v3707_v30, %v455_v56  ;;  %6807 = vst [vmem:[#allocation24_spill] sm:$0xff] %v4612_v13 }
 0x2e1   :  { %v457_v1 = vadd.f32 %v3707_v30, %v456_v63 }
 0x2e2   :  { %v3709_v2 = vpop.eup %3708 }
 0x2e3   :  { %v474_v5 = vmul.f32 %v3709_v2, %v472_v27  ;;  %v461_v6 = vsel %vm460_vm5, %v3707_v30, %v457_v1  ;;  %vm479_vm7 = vweird.f32 %v3709_v2 }
 0x2e4   :  { %v466_v7 = vsel %vm463_vm6, %v465_v4, %v461_v6  ;;  %vm480_vm9 = vmor %vm478_vm8, %vm479_vm7  ;;  %v4572_v4 = vld [vmem:[#allocation3 + $0x208] sm:$0xff]  ;;  %v4592_v6 = vld [vmem:[#allocation3 + $0x118] sm:$0xff] }
 0x2e5   :  { %v475_v8 = vsub.f32 1.0, %v474_v5  ;;  %v488_v10 = vmul.f32 %v466_v7, %v245_v0  ;;  %6797 = vst [vmem:[#allocation10_spill] sm:$0xff] %v4572_v4  ;;  %v4589_v5 = vld [vmem:[#allocation3 + $0x140] sm:$0xff]  ;;  %v4595_v7 = vld [vmem:[#allocation3 + $0xf0] sm:$0xff] }
 0x2e6   :  { %6802 = vst [vmem:[#allocation14_spill] sm:$0xff] %v4589_v5 }
 0x2e7   :  { %v476_v12 = vmul.f32 %v3709_v2, %v475_v8  ;;  %v489_v14 = vadd.f32 %v488_v10, %v446_v9  ;;  %6803 = vst [vmem:[#allocation21_spill] sm:$0xff] %v4592_v6  ;;  %v4598_v8 = vld [vmem:[#allocation3 + $0xc8] sm:$0xff]  ;;  %v4601_v9 = vld [vmem:[#allocation3 + $0xa0] sm:$0xff] }
 0x2e8   :  { %6804 = vst [vmem:[#allocation16_spill] sm:$0xff] %v4595_v7  ;;  %v4604_v10 = vld [vmem:[#allocation3 + $0x260] sm:$0xff] }
 0x2e9   :  { %v477_v15 = vadd.f32 %v3709_v2, %v476_v12  ;;  %3710 = vtanh.f32 %v489_v14  ;;  %6805 = vst [vmem:[#allocation22_spill] sm:$0xff] %v4598_v8  ;;  %v4608_v12 = vld [vmem:[#allocation3 + $0x270] sm:$0xff]  ;;  %v4616_v14 = vld [vmem:[#allocation3 + $0x238] sm:$0xff] }
 0x2ea   :  { %6806 = vst [vmem:[#allocation23_spill] sm:$0xff] %v4601_v9 }
 0x2eb   :  { %v481_v17 = vsel %vm480_vm9, %v3709_v2, %v477_v15  ;;  %v4565_v2 = vld [vmem:[#allocation3 + $0x258] sm:$0xff]  ;;  %v4618_v15 = vld [vmem:[#allocation3 + $0x240] sm:$0xff] }
 0x2ec   :  { %v486_v18 = vsel %vm483_vm10, %v485_v16, %v481_v17  ;;  %6795 = vst [vmem:[#allocation9_spill] sm:$0xff] %v4565_v2  ;;  %v4620_v16 = vld [vmem:[#allocation3 + $0x248] sm:$0xff]  ;;  %v4624_v17 = vld [vmem:[#allocation3 + $0x50] sm:$0xff] }
 0x2ed   :  { %v491_v19 = vsub.f32 1.0, %v486_v18  ;;  %v493_v22 = vmul.f32 %v486_v18, %v4033_v32  ;;  %v4543_v32 = vld [vmem:[%s6567_s5] sm:$0x1f]  ;;  %6808 = vst [vmem:[#allocation25_spill] sm:$0xff] %v4624_v17  ;;  %v4628_v18 = vld [vmem:[#allocation3 + $0x210] sm:$0xff] }
 0x2ee   :  { %v579_v25 = vperm.slane %v4543_v32, 1  ;;  %v578_v60 = vperm.slane %v4543_v32, 0 }
 0x2ef   :  { %v3711_v20 = vpop.eup %3710 }
 0x2f0   :  { %v492_v21 = vmul.f32 %v3711_v20, %v491_v19  ;;  %v4630_v19 = vld [vmem:[#allocation3 + $0x218] sm:$0xff]  ;;  %v4632_v20 = vld [vmem:[#allocation3 + $0x220] sm:$0xff] }
 0x2f2   :  { %v4528_v24 = vadd.f32 %v493_v22, %v492_v21  ;;  %v4636_v21 = vld [vmem:[#allocation3 + $0x28] sm:$0xff] }
 0x2f3   :  { %6809 = vst [vmem:[#allocation26_spill] sm:$0xff] %v4636_v21  ;;  %v4640_v22 = vld [vmem:[#allocation3 + $0x1e8] sm:$0xff] }
 0x2f4   :  { %495 = vst [vmem:[#allocation2] sm:$0x1] %v4528_v24  ;;  %604 = vmatmul.f32.vlgmr.msra.gmra.mxu3 %v4528_v24  ;;  %624 = vmatmul.f32.vlgmr.msra.gmra.mxu0 %v4528_v24 }
 0x2f5   :  { %644 = vmatmul.f32.vlgmr.msra.gmra.mxu1 %v4528_v24  ;;  %664 = vmatmul.f32.vlgmr.msra.gmra.mxu2 %v4528_v24 }
 0x2f6   :  { %859 = vmatpush.msra.mxu2 %v4354_v46  ;;  %1047 = vmatpush.msra.mxu3 %v4604_v10 }
 0x2f7   :  { %1067 = vmatpush.msra.mxu0 %v4606_v11  ;;  %1087 = vmatpush.msra.mxu1 %v4608_v12 }
 0x2f8   :  { %860 = vmatpush.msra.mxu2 %v4359_v57  ;;  %1048 = vmatpush.msra.mxu3 %v4616_v14 }
 0x2f9   :  { %1068 = vmatpush.msra.mxu0 %v4618_v15  ;;  %1088 = vmatpush.msra.mxu1 %v4620_v16 }
 0x2fa   :  { %861 = vmatpush.msra.mxu2 %v4370_v34  ;;  %v3648_v34 = vld [vmem:[%s6562_s0 + $0x1] ss:$8 sm:$0x3]  ;;  %1049 = vmatpush.msra.mxu3 %v4628_v18 }
 0x2fb   :  { %1069 = vmatpush.msra.mxu0 %v4630_v19  ;;  %1089 = vmatpush.msra.mxu1 %v4632_v20 }
 0x2fc   :  { %684 = vmatmul.f32.vlgmr.msrb.gmra.mxu3 %v4528_v24  ;;  %862 = vmatpush.msra.mxu2 %v4377_v44 }
 0x2fd   :  { %1050 = vmatpush.msra.mxu3 %v4640_v22 }
 0x371   :  { %v625_v49 = vpop.f32.mrf.mxu0 }
 0x372   :  { %v626_v33 = vadd.f32 %v625_v49, %v579_v25  ;;  %v4556_v58 = vpop.f32.mrf.mxu1  ;;  %v4642_v25 = vld [vmem:[#allocation3 + $0x1f0] sm:$0xff]  ;;  %v4644_v49 = vld [vmem:[#allocation3 + $0x1f8] sm:$0xff] }
 0x373   :  { %1070 = vmatpush.msra.mxu0 %v4642_v25  ;;  %1090 = vmatpush.msra.mxu1 %v4644_v49 }
 0x374   :  { %v692_v29 = vrot.slane %v626_v33, 7 }
 0x377   :  { %v605_v46 = vpop.f32.mrf.mxu3 }
 0x378   :  { %v606_v57 = vadd.f32 %v605_v46, %v578_v60  ;;  %v4646_v33 = vpop.f32.mrf.mxu2  ;;  %v4650_v60 = vld [vmem:[#allocation3] sm:$0xff] }
 0x379   :  { %6810 = vst [vmem:[#allocation27_spill] sm:$0xff] %v4650_v60  ;;  %v4654_v46 = vld [vmem:[#allocation3 + $0x1c0] sm:$0xff] }
 0x37a   :  { %v693_v44 = vsel %vm251_vm0, %v606_v57, %v692_v29  ;;  %v4656_v29 = vld [vmem:[#allocation3 + $0x1c8] sm:$0xff]  ;;  %v4658_v57 = vld [vmem:[#allocation3 + $0x1d0] sm:$0xff]  ;;  %1051 = vmatpush.msra.mxu3 %v4654_v46 }
 0x37b   :  { %v695_v28 = vadd.f32 %v3648_v34, %v693_v44  ;;  %v4663_v34 = vld [vmem:[%s6569_s7] sm:$0x7]  ;;  %1071 = vmatpush.msra.mxu0 %v4656_v29  ;;  %1091 = vmatpush.msra.mxu1 %v4658_v57 }
 0x37c   :  { %v4667_v44 = vld [vmem:[#allocation3 + $0x278] sm:$0xff] }
 0x37d   :  { %v700_v59 = vperm.slane %v695_v28, %v6793_v31  ;;  %6811 = vst [vmem:[#allocation28_spill] sm:$0xff] %v4667_v44  ;;  %v4671_v28 = vld [vmem:[#allocation3 + $0x198] sm:$0xff] }
 0x37e   :  { %1052 = vmatpush.msra.mxu3 %v4671_v28 }
 0x37f   :  { %v705_v45 = vperm.slane %v700_v59, %v6794_v62  ;;  %v4673_v59 = vld [vmem:[#allocation3 + $0x1a0] sm:$0xff] }
 0x380   :  { %1072 = vmatpush.msra.mxu0 %v4673_v59 }
 0x381   :  { %v706_v47 = vsel %vm265_vm1, %v705_v45, -inf }
 0x382   :  { %707 = vmax.xlane.f32.xlu1 %v706_v47  ;;  %v4679_v47 = vld [vmem:[#allocation3 + $0x250] sm:$0xff] }
 0x383   :  { %6812 = vst [vmem:[#allocation29_spill] sm:$0xff] %v4679_v47 }
 0x3f5   :  { %v708_v48 = vpop.xlane.xlu1 %707 }
 0x3f6   :  { %v709_v50 = vsub.f32 %v705_v45, %v708_v48  ;;  %v4675_v45 = vld [vmem:[#allocation3 + $0x1a8] sm:$0xff]  ;;  %v580_v48 = vperm.slane %v4543_v32, 2 }
 0x3f7   :  { %1092 = vmatpush.msra.mxu1 %v4675_v45 }
 0x3f8   :  { %v710_v40 = vmul.f32 1.442695, %v709_v50  ;;  %v818_v50 = vperm.slane %v4663_v34, 0 }
 0x3fa   :  { %3712 = vpow2.f32 %v710_v40  ;;  %v4685_v40 = vld [vmem:[#allocation3 + $0x170] sm:$0xff] }
 0x3fb   :  { %1053 = vmatpush.msra.mxu3 %v4685_v40 }
 0x400   :  { %v3713_v41 = vpop.eup %3712 }
 0x401   :  { %v712_v43 = vsel %vm265_vm1, %v3713_v41, 0.0 }
 0x402   :  { %713 = vadd.xlane.f32.xlu1 %v712_v43  ;;  %v4689_v43 = vld [vmem:[#allocation3 + $0x180] sm:$0xff] }
 0x403   :  { %1093 = vmatpush.msra.mxu1 %v4689_v43 }
 0x475   :  { %v714_v52 = vpop.xlane.xlu1 %713 }
 0x476   :  { %3714 = vrcp.f32 %v714_v52 }
 0x47c   :  { %v3715_v54 = vpop.eup %3714 }
 0x47d   :  { %v716_v26 = vmul.f32 %v3715_v54, %v714_v52  ;;  %v4693_v52 = vld [vmem:[#allocation3 + $0x228] sm:$0xff] }
 0x47e   :  { %6813 = vst [vmem:[#allocation30_spill] sm:$0xff] %v4693_v52 }
 0x47f   :  { %v717_v23 = vsub.f32 2.0, %v716_v26  ;;  %v4699_v26 = vld [vmem:[#allocation3 + $0x150] sm:$0xff] }
 0x481   :  { %v718_v30 = vmul.f32 %v3715_v54, %v717_v23  ;;  %v4697_v54 = vld [vmem:[#allocation3 + $0x148] sm:$0xff]  ;;  %v4701_v23 = vld [vmem:[#allocation3 + $0x158] sm:$0xff] }
 0x482   :  { %1054 = vmatpush.msra.mxu3 %v4697_v54  ;;  %1094 = vmatpush.msra.mxu1 %v4701_v23 }
 0x483   :  { %v719_v27 = vmul.f32 %v3713_v41, %v718_v30  ;;  %v4687_v41 = vld [vmem:[#allocation3 + $0x178] sm:$0xff] }
 0x484   :  { %1073 = vmatpush.msra.mxu0 %v4687_v41 }
 0x485   :  { %v723_v51 = vperm.slane %v719_v27, %v4314_v37  ;;  %v4705_v27 = vld [vmem:[#allocation3 + $0x200] sm:$0xff] }
 0x486   :  { %1074 = vmatpush.msra.mxu0 %v4699_v26  ;;  %6814 = vst [vmem:[#allocation31_spill] sm:$0xff] %v4705_v27 }
 0x487   :  { %v757_v55 = vperm.slane %v723_v51, 0  ;;  %v758_v56 = vperm.slane %v723_v51, 4  ;;  %v646_v51 = vadd.f32 %v4556_v58, %v580_v48  ;;  %v4722_v58 = vld [vmem:[#allocation3 + $0xf8] sm:$0xff]  ;;  %v581_v48 = vperm.slane %v4543_v32, 3 }
 0x489   :  { %777 = vmatmul.f32.vlgmr.msrb.gmra.mxu0 %v757_v55  ;;  %797 = vmatmul.f32.vlgmr.msrb.gmra.mxu1 %v758_v56  ;;  %v4710_v56 = vld [vmem:[#allocation3 + $0x120] sm:$0xff] }
 0x48a   :  { %1055 = vmatpush.msra.mxu3 %v4710_v56 }
 0x48c   :  { %1056 = vmatpush.msra.mxu3 %v4722_v58 }
 0x506   :  { %v778_v61 = vpop.f32.mrf.mxu0  ;;  %v798_v63 = vpop.f32.mrf.mxu1 }
 0x507   :  { %v799_v53 = vadd.f32 %v798_v63, %v778_v61  ;;  %v4712_v61 = vld [vmem:[#allocation3 + $0x128] sm:$0xff]  ;;  %v4714_v63 = vld [vmem:[#allocation3 + $0x130] sm:$0xff] }
 0x508   :  { %1075 = vmatpush.msra.mxu0 %v4712_v61  ;;  %1095 = vmatpush.msra.mxu1 %v4714_v63 }
 0x509   :  { %v802_v0 = vadd.f32 %v801_v36, %v799_v53  ;;  %v4718_v36 = vld [vmem:[#allocation3 + $0x1d8] sm:$0xff] }
 0x50a   :  { %6815 = vst [vmem:[#allocation32_spill] sm:$0xff] %v4718_v36 }
 0x50b   :  { %v803_v1 = vmax.f32 %v802_v0, 0.0  ;;  %v4724_v0 = vld [vmem:[#allocation3 + $0x100] sm:$0xff] }
 0x50c   :  { %1076 = vmatpush.msra.mxu0 %v4724_v0 }
 0x50d   :  { %3649 = vmatmul.msk.f32.vlgmr.msrb.gmra.mxu2 %vm384_vm2, %v803_v1 }
 0x50e   :  { %879 = vmatpush.msrb.mxu2 %v4424_v35  ;;  %v4577_v35 = vld [vmem:[#allocation3 + $0x1e0] sm:$0xff] }
 0x50f   :  { %6798 = vst [vmem:[#allocation13_spill] sm:$0xff] %v4577_v35 }
 0x510   :  { %880 = vmatpush.msrb.mxu2 %v4433_v38  ;;  %v4580_v38 = vld [vmem:[#allocation3 + $0x1b8] sm:$0xff] }
 0x511   :  { %6799 = vst [vmem:[#allocation12_spill] sm:$0xff] %v4580_v38 }
 0x512   :  { %881 = vmatpush.msrb.mxu2 %v4442_v39  ;;  %v4583_v39 = vld [vmem:[#allocation3 + $0x190] sm:$0xff] }
 0x513   :  { %6800 = vst [vmem:[#allocation15_spill] sm:$0xff] %v4583_v39 }
 0x514   :  { %882 = vmatpush.msrb.mxu2 %v4449_v42  ;;  %v4586_v42 = vld [vmem:[#allocation3 + $0x168] sm:$0xff] }
 0x515   :  { %3650 = vmatmul.msk.f32.vlgmr.msra.gmra.mxu2 %vm384_vm2, %v803_v1  ;;  %6801 = vst [vmem:[#allocation20_spill] sm:$0xff] %v4586_v42 }
 0x516   :  { %1027 = vmatpush.msra.mxu2 %v4565_v2 }
 0x518   :  { %1028 = vmatpush.msra.mxu2 %v4569_v3  ;;  %v4817_v3 = vld [vmem:[#allocation3 + $0x20] sm:$0xff] }
 0x519   :  { %6838 = vst [vmem:[#allocation53_spill] sm:$0xff] %v4817_v3 }
 0x51a   :  { %1029 = vmatpush.msra.mxu2 %v4572_v4 }
 0x51c   :  { %1030 = vmatpush.msra.mxu2 %v4577_v35 }
 0x51d   :  { %3651 = vmatmul.msk.f32.vlgmr.msrb.gmra.mxu2 %vm384_vm2, %v803_v1  ;;  %v4726_v1 = vld [vmem:[#allocation3 + $0x108] sm:$0xff] }
 0x51e   :  { %1031 = vmatpush.msra.mxu2 %v4580_v38  ;;  %1096 = vmatpush.msra.mxu1 %v4726_v1 }
 0x520   :  { %1032 = vmatpush.msra.mxu2 %v4583_v39  ;;  %v4814_v39 = vld [vmem:[#allocation3 + $0x48] sm:$0xff] }
 0x521   :  { %6837 = vst [vmem:[#allocation52_spill] sm:$0xff] %v4814_v39 }
 0x522   :  { %1033 = vmatpush.msra.mxu2 %v4586_v42  ;;  %v4801_v42 = vld [vmem:[#allocation3 + $0x18] sm:$0xff] }
 0x523   :  { %6833 = vst [vmem:[#allocation48_spill] sm:$0xff] %v4801_v42 }
 0x524   :  { %1034 = vmatpush.msra.mxu2 %v4589_v5  ;;  %v4793_v5 = vld [vmem:[#allocation3 + $0xe8] sm:$0xff] }
 0x525   :  { %6831 = vst [vmem:[#allocation46_spill] sm:$0xff] %v4793_v5 }
 0x526   :  { %1035 = vmatpush.msra.mxu2 %v4592_v6 }
 0x528   :  { %1036 = vmatpush.msra.mxu2 %v4595_v7 }
 0x52a   :  { %1037 = vmatpush.msra.mxu2 %v4598_v8 }
 0x52c   :  { %1038 = vmatpush.msra.mxu2 %v4601_v9  ;;  %v4769_v9 = vld [vmem:[#allocation3 + $0x138] sm:$0xff] }
 0x52d   :  { %6825 = vst [vmem:[#allocation40_spill] sm:$0xff] %v4769_v9 }
 0x52e   :  { %1039 = vmatpush.msra.mxu2 %v4612_v13  ;;  %v4765_v13 = vld [vmem:[#allocation3 + $0x90] sm:$0xff] }
 0x52f   :  { %6824 = vst [vmem:[#allocation39_spill] sm:$0xff] %v4765_v13 }
 0x530   :  { %1040 = vmatpush.msra.mxu2 %v4624_v17  ;;  %v4763_v17 = vld [vmem:[#allocation3 + $0x88] sm:$0xff] }
 0x531   :  { %6823 = vst [vmem:[#allocation38_spill] sm:$0xff] %v4763_v17 }
 0x532   :  { %1041 = vmatpush.msra.mxu2 %v4636_v21  ;;  %v666_v21 = vadd.f32 %v4646_v33, %v581_v48  ;;  %v4773_v33 = vld [vmem:[#allocation3 + $0x58] sm:$0xff]  ;;  %v4777_v48 = vld [vmem:[#allocation3 + $0x68] sm:$0xff] }
 0x533   :  { %6827 = vst [vmem:[#allocation42_spill] sm:$0xff] %v4777_v48 }
 0x534   :  { %1042 = vmatpush.msra.mxu2 %v4650_v60  ;;  %v4756_v60 = vld [vmem:[#allocation3 + $0x160] sm:$0xff] }
 0x535   :  { %6822 = vst [vmem:[#allocation37_spill] sm:$0xff] %v4756_v60 }
 0x536   :  { %1107 = vmatpush.msrb.mxu2 %v4667_v44 }
 0x538   :  { %1108 = vmatpush.msrb.mxu2 %v4679_v47  ;;  %v4752_v47 = vld [vmem:[#allocation3 + $0xb8] sm:$0xff] }
 0x539   :  { %6821 = vst [vmem:[#allocation19_spill] sm:$0xff] %v4752_v47 }
 0x53a   :  { %1109 = vmatpush.msrb.mxu2 %v4693_v52  ;;  %v4744_v52 = vld [vmem:[#allocation3 + $0x188] sm:$0xff] }
 0x53b   :  { %6819 = vst [vmem:[#allocation17_spill] sm:$0xff] %v4744_v52 }
 0x53c   :  { %1110 = vmatpush.msrb.mxu2 %v4705_v27  ;;  %v4740_v27 = vld [vmem:[#allocation3 + $0xe0] sm:$0xff] }
 0x53d   :  { %6818 = vst [vmem:[#allocation35_spill] sm:$0xff] %v4740_v27  ;;  %1097 = vmatpush.msra.mxu1 %v4740_v27 }
 0x53e   :  { %1111 = vmatpush.msrb.mxu2 %v4718_v36  ;;  %v4738_v36 = vld [vmem:[#allocation3 + $0xd8] sm:$0xff] }
 0x53f   :  { %6817 = vst [vmem:[#allocation34_spill] sm:$0xff] %v4738_v36  ;;  %1077 = vmatpush.msra.mxu0 %v4738_v36  ;;  %1098 = vmatpush.msra.mxu1 %v4752_v47 }
 0x541   :  { %1099 = vmatpush.msra.mxu1 %v4765_v13 }
 0x543   :  { %1100 = vmatpush.msra.mxu1 %v4777_v48 }
 0x590   :  { %v844_v30 = vpop.f32.mrf.mxu2 }
 0x591   :  { %v845_v55 = vadd.f32 %v844_v30, %v818_v50  ;;  %v4731_v50 = vld [vmem:[#allocation3 + $0x1b0] sm:$0xff] }
 0x592   :  { %6816 = vst [vmem:[#allocation33_spill] sm:$0xff] %v4731_v50  ;;  %1112 = vmatpush.msrb.mxu2 %v4731_v50  ;;  %v4750_v50 = vld [vmem:[#allocation3 + $0xb0] sm:$0xff] }
 0x593   :  { %v887_v53 = vadd.f32 %v845_v55, %v646_v51  ;;  %v819_v51 = vperm.slane %v4663_v34, 1  ;;  %v4736_v55 = vld [vmem:[#allocation3 + $0xd0] sm:$0xff]  ;;  %6820 = vst [vmem:[#allocation18_spill] sm:$0xff] %v4750_v50  ;;  %1078 = vmatpush.msra.mxu0 %v4750_v50 }
 0x594   :  { %1057 = vmatpush.msra.mxu3 %v4736_v55  ;;  %1113 = vmatpush.msrb.mxu2 %v4744_v52  ;;  %v4761_v52 = vld [vmem:[#allocation3 + $0x80] sm:$0xff] }
 0x595   :  { %v3652_v30 = vmul.f32 -1.442695, %v887_v53  ;;  %v4748_v53 = vld [vmem:[#allocation3 + $0xa8] sm:$0xff]  ;;  %1079 = vmatpush.msra.mxu0 %v4763_v17 }
 0x596   :  { %1058 = vmatpush.msra.mxu3 %v4748_v53  ;;  %1114 = vmatpush.msrb.mxu2 %v4756_v60 }
 0x597   :  { %3716 = vpow2.f32 %v3652_v30 }
 0x598   :  { %v864_v44 = vpop.f32.mrf.mxu2  ;;  %1059 = vmatpush.msra.mxu3 %v4761_v52  ;;  %1115 = vmatpush.msrb.mxu2 %v4769_v9  ;;  %v4789_v9 = vld [vmem:[#allocation3 + $0x40] sm:$0xff] }
 0x599   :  { %v865_v30 = vadd.f32 %v864_v44, %v819_v51  ;;  %v4775_v44 = vld [vmem:[#allocation3 + $0x60] sm:$0xff]  ;;  %v4781_v51 = vld [vmem:[#allocation3 + $0x110] sm:$0xff]  ;;  %6830 = vst [vmem:[#allocation45_spill] sm:$0xff] %v4789_v9  ;;  %1101 = vmatpush.msra.mxu1 %v4789_v9 }
 0x59a   :  { %6826 = vst [vmem:[#allocation41_spill] sm:$0xff] %v4775_v44  ;;  %1060 = vmatpush.msra.mxu3 %v4773_v33  ;;  %1080 = vmatpush.msra.mxu0 %v4775_v44 }
 0x59b   :  { %v907_v8 = vadd.f32 %v865_v30, %v666_v21  ;;  %6828 = vst [vmem:[#allocation43_spill] sm:$0xff] %v4781_v51  ;;  %1116 = vmatpush.msrb.mxu2 %v4781_v51  ;;  %v4785_v21 = vld [vmem:[#allocation3 + $0x30] sm:$0xff]  ;;  %v4787_v30 = vld [vmem:[#allocation3 + $0x38] sm:$0xff]  ;;  %1102 = vmatpush.msra.mxu1 %v4801_v42 }
 0x59c   :  { %6829 = vst [vmem:[#allocation44_spill] sm:$0xff] %v4787_v30  ;;  %1061 = vmatpush.msra.mxu3 %v4785_v21  ;;  %1081 = vmatpush.msra.mxu0 %v4787_v30  ;;  %v4799_v51 = vld [vmem:[#allocation3 + $0x10] sm:$0xff]  ;;  %v685_v30 = vpop.f32.mrf.mxu3 }
 0x59d   :  { %v3717_v60 = vpop.eup %3716  ;;  %v3653_v7 = vmul.f32 -1.442695, %v907_v8  ;;  %1117 = vmatpush.msrb.mxu2 %v4793_v5  ;;  %v4797_v8 = vld [vmem:[#allocation3 + $0x8] sm:$0xff]  ;;  %6832 = vst [vmem:[#allocation47_spill] sm:$0xff] %v4799_v51  ;;  %v4811_v5 = vld [vmem:[#allocation3 + $0x70] sm:$0xff] }
 0x59e   :  { %v891_v6 = vadd.f32 1.0, %v3717_v60  ;;  %1062 = vmatpush.msra.mxu3 %v4797_v8  ;;  %1082 = vmatpush.msra.mxu0 %v4799_v51  ;;  %v4805_v60 = vld [vmem:[#allocation3 + $0xc0] sm:$0xff]  ;;  %6836 = vst [vmem:[#allocation51_spill] sm:$0xff] %v4811_v5  ;;  %v582_v51 = vperm.slane %v4543_v32, 4 }
 0x59f   :  { %3718 = vpow2.f32 %v3653_v7  ;;  %6834 = vst [vmem:[#allocation49_spill] sm:$0xff] %v4805_v60  ;;  %1118 = vmatpush.msrb.mxu2 %v4805_v60  ;;  %v4809_v7 = vld [vmem:[#allocation3 + $0x98] sm:$0xff] }
 0x5a0   :  { %3720 = vrcp.f32 %v891_v6  ;;  %6835 = vst [vmem:[#allocation50_spill] sm:$0xff] %v4809_v7  ;;  %v903_v42 = vand.u32 2147483648, %v891_v6  ;;  %v901_v9 = vand.u32 2147483647, %v891_v6  ;;  %vm897_vm12 = vweird.f32 %v891_v6  ;;  %v884_v48 = vpop.f32.mrf.mxu2 }
 0x5a1   :  { %1119 = vmatpush.msrb.mxu2 %v4809_v7 }
 0x5a2   :  { %v904_v44 = vor.u32 1.1754944e-38, %v903_v42  ;;  %vm902_vm14 = vcmp.eq.f32.partialorder %v901_v9, 8.507059e+37 }
 0x5a3   :  { %1120 = vmatpush.msrb.mxu2 %v4811_v5  ;;  %v820_v5 = vperm.slane %v4663_v34, 2 }
 0x5a5   :  { %v3719_v38 = vpop.eup %3718  ;;  %1121 = vmatpush.msrb.mxu2 %v4814_v39  ;;  %v686_v39 = vadd.f32 %v685_v30, %v582_v51  ;;  %v885_v47 = vadd.f32 %v884_v48, %v820_v5  ;;  %v4912_v48 = vld [vmem:[%s6564_s2 + $0xd0] sm:$0xff] }
 0x5a6   :  { %v3721_v35 = vpop.eup %3720  ;;  %v911_v4 = vadd.f32 1.0, %v3719_v38 }
 0x5a7   :  { %v893_v2 = vmul.f32 %v3721_v35, %v891_v6  ;;  %1122 = vmatpush.msrb.mxu2 %v4817_v3  ;;  %vm898_vm11 = vweird.f32 %v3721_v35 }
 0x5a8   :  { %3722 = vrcp.f32 %v911_v4  ;;  %vm899_vm13 = vmor %vm897_vm12, %vm898_vm11  ;;  %v921_v27 = vand.u32 2147483647, %v911_v4  ;;  %vm917_vm3 = vweird.f32 %v911_v4 }
 0x5a9   :  { %v894_v60 = vsub.f32 1.0, %v893_v2 }
 0x5aa   :  { %vm922_vm5 = vcmp.eq.f32.partialorder %v921_v27, 8.507059e+37  ;;  %v1177_v27 = vld [vmem:[%s6564_s2 + $0x70] sm:$0xff] }
 0x5ab   :  { %v895_v7 = vmul.f32 %v3721_v35, %v894_v60  ;;  %v923_v60 = vand.u32 2147483648, %v911_v4 }
 0x5ad   :  { %v896_v37 = vadd.f32 %v3721_v35, %v895_v7  ;;  %v924_v6 = vor.u32 1.1754944e-38, %v923_v60  ;;  %v4926_v60 = vld [vmem:[%s6564_s2 + $0xc8] sm:$0xff] }
 0x5ae   :  { %v3723_v38 = vpop.eup %3722 }
 0x5af   :  { %v913_v13 = vmul.f32 %v3723_v38, %v911_v4  ;;  %v900_v2 = vsel %vm899_vm13, %v3721_v35, %v896_v37  ;;  %vm918_vm15 = vweird.f32 %v3723_v38 }
 0x5b0   :  { %v905_v3 = vsel %vm902_vm14, %v904_v44, %v900_v2  ;;  %vm919_vm4 = vmor %vm917_vm3, %vm918_vm15  ;;  %v1173_v44 = vld [vmem:[%s6564_s2 + $0x50] sm:$0xff] }
 0x5b1   :  { %v914_v17 = vsub.f32 1.0, %v913_v13  ;;  %v927_v32 = vmul.f32 %v905_v3, %v686_v39 }
 0x5b3   :  { %v915_v50 = vmul.f32 %v3723_v38, %v914_v17  ;;  %v928_v36 = vadd.f32 %v927_v32, %v885_v47  ;;  %v1172_v32 = vld [vmem:[%s6564_s2 + $0x48] sm:$0xff] }
 0x5b5   :  { %v916_v34 = vadd.f32 %v3723_v38, %v915_v50  ;;  %3724 = vtanh.f32 %v928_v36  ;;  %v1176_v36 = vld [vmem:[%s6564_s2 + $0x68] sm:$0xff]  ;;  %v1175_v50 = vld [vmem:[%s6564_s2 + $0x60] sm:$0xff] }
 0x5b7   :  { %v920_v7 = vsel %vm919_vm4, %v3723_v38, %v916_v34  ;;  %v1171_v34 = vld [vmem:[%s6564_s2 + $0x40] sm:$0xff] }
 0x5b8   :  { %v925_v42 = vsel %vm922_vm5, %v924_v6, %v920_v7  ;;  %v4935_v6 = vld [vmem:[%s6564_s2 + $0xc0] sm:$0xff]  ;;  %v1170_v7 = vld [vmem:[%s6564_s2 + $0x38] sm:$0xff] }
 0x5b9   :  { %v930_v51 = vsub.f32 1.0, %v925_v42  ;;  %v932_v9 = vmul.f32 %v925_v42, %v4528_v24  ;;  %v4851_v24 = vld [vmem:[%s6567_s5] sm:$0x1f]  ;;  %v4944_v42 = vld [vmem:[%s6564_s2 + $0xb8] sm:$0xff] }
 0x5ba   :  { %v1018_v3 = vperm.slane %v4851_v24, 1  ;;  %v1017_v4 = vperm.slane %v4851_v24, 0 }
 0x5bb   :  { %v3725_v37 = vpop.eup %3724 }
 0x5bc   :  { %v931_v35 = vmul.f32 %v3725_v37, %v930_v51  ;;  %v1169_v51 = vld [vmem:[%s6564_s2 + $0x30] sm:$0xff] }
 0x5bd   :  { %v4953_v37 = vld [vmem:[%s6564_s2 + $0xb0] sm:$0xff] }
 0x5be   :  { %v4824_v5 = vadd.f32 %v932_v9, %v931_v35  ;;  %v1168_v35 = vld [vmem:[%s6564_s2 + $0x28] sm:$0xff] }
 0x5bf   :  { %v4962_v9 = vld [vmem:[%s6564_s2 + $0xa8] sm:$0xff] }
 0x5c0   :  { %934 = vst [vmem:[#allocation2 + $0x1] sm:$0x1] %v4824_v5  ;;  %1043 = vmatmul.f32.vlgmr.msra.gmra.mxu2 %v4824_v5  ;;  %1063 = vmatmul.f32.vlgmr.msra.gmra.mxu3 %v4824_v5 }
 0x5c1   :  { %1083 = vmatmul.f32.vlgmr.msra.gmra.mxu0 %v4824_v5  ;;  %1103 = vmatmul.f32.vlgmr.msra.gmra.mxu1 %v4824_v5 }
 0x5c2   :  { %1486 = vmatpush.msra.mxu2 %v4604_v10 }
 0x5c4   :  { %1487 = vmatpush.msra.mxu2 %v4616_v14 }
 0x5c6   :  { %1488 = vmatpush.msra.mxu2 %v4628_v18  ;;  %v3654_v18 = vld [vmem:[%s6562_s0 + $0x2] ss:$8 sm:$0x3] }
 0x5c8   :  { %1123 = vmatmul.f32.vlgmr.msrb.gmra.mxu2 %v4824_v5 }
 0x5c9   :  { %1489 = vmatpush.msra.mxu2 %v4640_v22 }
 0x5cb   :  { %1490 = vmatpush.msra.mxu2 %v4654_v46 }
 0x5cd   :  { %1491 = vmatpush.msra.mxu2 %v4671_v28 }
 0x5cf   :  { %1492 = vmatpush.msra.mxu2 %v4685_v40 }
 0x5d1   :  { %1493 = vmatpush.msra.mxu2 %v4697_v54  ;;  %v4868_v54 = vld [vmem:[%s6564_s2 + $0xf8] sm:$0xff] }
 0x5d2   :  { %1220 = vmatpush.msrb.mxu0 %v4868_v54 }
 0x5d3   :  { %1494 = vmatpush.msra.mxu2 %v4710_v56  ;;  %v4877_v56 = vld [vmem:[%s6564_s2 + $0xf0] sm:$0xff] }
 0x5d4   :  { %1221 = vmatpush.msrb.mxu0 %v4877_v56 }
 0x5d5   :  { %1495 = vmatpush.msra.mxu2 %v4722_v58  ;;  %v4885_v58 = vld [vmem:[%s6564_s2 + $0xe8] sm:$0xff] }
 0x5d6   :  { %1222 = vmatpush.msrb.mxu0 %v4885_v58 }
 0x5d7   :  { %1496 = vmatpush.msra.mxu2 %v4736_v55  ;;  %v4894_v55 = vld [vmem:[%s6564_s2 + $0xe0] sm:$0xff] }
 0x5d8   :  { %1223 = vmatpush.msrb.mxu0 %v4894_v55 }
 0x5d9   :  { %1497 = vmatpush.msra.mxu2 %v4748_v53  ;;  %v1174_v53 = vld [vmem:[%s6564_s2 + $0x58] sm:$0xff] }
 0x5db   :  { %1498 = vmatpush.msra.mxu2 %v4761_v52  ;;  %v1178_v52 = vld [vmem:[%s6564_s2 + $0x78] sm:$0xff] }
 0x5dc   :  { %1200 = vmatpush.msrb.mxu3 %v1178_v52 }
 0x5dd   :  { %1499 = vmatpush.msra.mxu2 %v4773_v33  ;;  %v4903_v33 = vld [vmem:[%s6564_s2 + $0xd8] sm:$0xff] }
 0x5de   :  { %1201 = vmatpush.msrb.mxu3 %v1177_v27  ;;  %1224 = vmatpush.msrb.mxu0 %v4903_v33 }
 0x5df   :  { %1500 = vmatpush.msra.mxu2 %v4785_v21 }
 0x5e0   :  { %1202 = vmatpush.msrb.mxu3 %v1176_v36  ;;  %1225 = vmatpush.msrb.mxu0 %v4912_v48 }
 0x5e1   :  { %1501 = vmatpush.msra.mxu2 %v4797_v8 }
 0x5e2   :  { %1203 = vmatpush.msrb.mxu3 %v1175_v50  ;;  %1226 = vmatpush.msrb.mxu0 %v4926_v60 }
 0x5e3   :  { %1639 = vmatpush.msrb.mxu2 %v1178_v52  ;;  %v5069_v52 = vld [vmem:[%s6568_s6 + $0x30] sm:$0xff] }
 0x5e4   :  { %1204 = vmatpush.msrb.mxu3 %v1174_v53  ;;  %1227 = vmatpush.msrb.mxu0 %v4935_v6 }
 0x5e5   :  { %1640 = vmatpush.msrb.mxu2 %v1177_v27  ;;  %v5081_v27 = vld [vmem:[%s6568_s6] sm:$0xff] }
 0x5e6   :  { %1205 = vmatpush.msrb.mxu3 %v1173_v44  ;;  %1228 = vmatpush.msrb.mxu0 %v4944_v42 }
 0x5e7   :  { %1641 = vmatpush.msrb.mxu2 %v1176_v36  ;;  %v5092_v36 = vld [vmem:[%s6568_s6 + $0x38] sm:$0xff] }
 0x5e8   :  { %1206 = vmatpush.msrb.mxu3 %v1172_v32  ;;  %1229 = vmatpush.msrb.mxu0 %v4953_v37 }
 0x5e9   :  { %1642 = vmatpush.msrb.mxu2 %v1175_v50  ;;  %v5104_v50 = vld [vmem:[%s6568_s6 + $0x8] sm:$0xff] }
 0x5ea   :  { %1207 = vmatpush.msrb.mxu3 %v1171_v34  ;;  %1230 = vmatpush.msrb.mxu0 %v4962_v9 }
 0x5eb   :  { %1643 = vmatpush.msrb.mxu2 %v1174_v53 }
 0x5ec   :  { %1208 = vmatpush.msrb.mxu3 %v1170_v7 }
 0x5ed   :  { %1644 = vmatpush.msrb.mxu2 %v1173_v44  ;;  %v1240_v44 = vld [vmem:[%s6563_s1 + $0x2] sm:$0x1] }
 0x5ee   :  { %1209 = vmatpush.msrb.mxu3 %v1169_v51 }
 0x5ef   :  { %1645 = vmatpush.msrb.mxu2 %v1172_v32  ;;  %v5132_v32 = vld [vmem:[%s6568_s6 + $0x10] sm:$0xff] }
 0x5f0   :  { %1210 = vmatpush.msrb.mxu3 %v1168_v35 }
 0x5f1   :  { %1646 = vmatpush.msrb.mxu2 %v1171_v34  ;;  %v6853_v34 = vld [vmem:[#allocation11_spill] sm:$0xff] }
 0x5f3   :  { %1647 = vmatpush.msrb.mxu2 %v1170_v7  ;;  %v6855_v7 = vld [vmem:[#allocation13_spill] sm:$0xff] }
 0x5f5   :  { %1648 = vmatpush.msrb.mxu2 %v1169_v51  ;;  %v6857_v51 = vld [vmem:[#allocation15_spill] sm:$0xff] }
 0x5f7   :  { %1649 = vmatpush.msrb.mxu2 %v1168_v35  ;;  %v6859_v35 = vld [vmem:[#allocation14_spill] sm:$0xff] }
 0x643   :  { %v1044_v39 = vpop.f32.mrf.mxu2  ;;  %v1064_v10 = vpop.f32.mrf.mxu3 }
 0x644   :  { %v1065_v13 = vadd.f32 %v1064_v10, %v1018_v3  ;;  %v1045_v14 = vadd.f32 %v1044_v39, %v1017_v4  ;;  %v1167_v3 = vld [vmem:[%s6564_s2 + $0x20] sm:$0xff]  ;;  %v1166_v39 = vld [vmem:[%s6564_s2 + $0x18] sm:$0xff] }
 0x645   :  { %v4971_v4 = vld [vmem:[%s6564_s2 + $0xa0] sm:$0xff]  ;;  %1211 = vmatpush.msrb.mxu3 %v1167_v3  ;;  %v4980_v10 = vld [vmem:[%s6564_s2 + $0x98] sm:$0xff]  ;;  %1650 = vmatpush.msrb.mxu2 %v1167_v3  ;;  %v6861_v3 = vld [vmem:[#allocation16_spill] sm:$0xff] }
 0x646   :  { %v1131_v17 = vrot.slane %v1065_v13, 7  ;;  %1231 = vmatpush.msrb.mxu0 %v4971_v4  ;;  %v1165_v13 = vld [vmem:[%s6564_s2 + $0x10] sm:$0xff] }
 0x647   :  { %1212 = vmatpush.msrb.mxu3 %v1166_v39  ;;  %1651 = vmatpush.msrb.mxu2 %v1166_v39  ;;  %v6863_v39 = vld [vmem:[#allocation23_spill] sm:$0xff] }
 0x648   :  { %v1132_v22 = vsel %vm251_vm0, %v1045_v14, %v1131_v17  ;;  %1232 = vmatpush.msrb.mxu0 %v4980_v10  ;;  %v4989_v14 = vld [vmem:[%s6564_s2 + $0x90] sm:$0xff]  ;;  %v1164_v17 = vld [vmem:[%s6564_s2 + $0x8] sm:$0xff] }
 0x649   :  { %v1134_v46 = vadd.f32 %v3654_v18, %v1132_v22  ;;  %1213 = vmatpush.msrb.mxu3 %v1165_v13  ;;  %v4998_v18 = vld [vmem:[%s6564_s2 + $0x88] sm:$0xff]  ;;  %v1163_v22 = vld [vmem:[%s6564_s2] sm:$0xff]  ;;  %1652 = vmatpush.msrb.mxu2 %v1165_v13  ;;  %v6865_v13 = vld [vmem:[#allocation25_spill] sm:$0xff] }
 0x64a   :  { %1233 = vmatpush.msrb.mxu0 %v4989_v14 }
 0x64b   :  { %v1139_v28 = vperm.slane %v1134_v46, %v6793_v31  ;;  %v5006_v46 = vld [vmem:[%s6564_s2 + $0x80] sm:$0xff]  ;;  %1214 = vmatpush.msrb.mxu3 %v1164_v17  ;;  %1653 = vmatpush.msrb.mxu2 %v1164_v17 }
 0x64c   :  { %1234 = vmatpush.msrb.mxu0 %v4998_v18  ;;  %v6867_v17 = vld [vmem:[#allocation27_spill] sm:$0xff] }
 0x64d   :  { %v1144_v47 = vperm.slane %v1139_v28, %v6794_v62  ;;  %1215 = vmatpush.msrb.mxu3 %v1163_v22  ;;  %1654 = vmatpush.msrb.mxu2 %v1163_v22  ;;  %v6850_v28 = vld [vmem:[#allocation47_spill] sm:$0xff]  ;;  %v6869_v22 = vld [vmem:[#allocation29_spill] sm:$0xff] }
 0x64e   :  { %1235 = vmatpush.msrb.mxu0 %v5006_v46 }
 0x64f   :  { %v1145_v40 = vsel %vm265_vm1, %v1144_v47, -inf  ;;  %1506 = vmatpush.msra.mxu3 %v4606_v11 }
 0x650   :  { %1146 = vmax.xlane.f32.xlu2 %v1145_v40  ;;  %1526 = vmatpush.msra.mxu0 %v4608_v12  ;;  %v5063_v40 = vld [vmem:[%s6568_s6 + $0x48] sm:$0xff] }
 0x651   :  { %1507 = vmatpush.msra.mxu3 %v4618_v15  ;;  %1278 = vmatpush.msrb.mxu1 %v5063_v40 }
 0x652   :  { %1527 = vmatpush.msra.mxu0 %v4620_v16  ;;  %v6839_v16 = vld [vmem:[#allocation34_spill] sm:$0xff] }
 0x653   :  { %1508 = vmatpush.msra.mxu3 %v4630_v19  ;;  %v6840_v19 = vld [vmem:[#allocation35_spill] sm:$0xff]  ;;  %1279 = vmatpush.msrb.mxu1 %v5069_v52 }
 0x654   :  { %1528 = vmatpush.msra.mxu0 %v4632_v20 }
 0x655   :  { %1509 = vmatpush.msra.mxu3 %v4642_v25  ;;  %v6841_v25 = vld [vmem:[#allocation18_spill] sm:$0xff] }
 0x656   :  { %1529 = vmatpush.msra.mxu0 %v4644_v49  ;;  %v6842_v49 = vld [vmem:[#allocation19_spill] sm:$0xff] }
 0x657   :  { %1510 = vmatpush.msra.mxu3 %v4656_v29 }
 0x658   :  { %1530 = vmatpush.msra.mxu0 %v4658_v57  ;;  %v6843_v57 = vld [vmem:[#allocation38_spill] sm:$0xff] }
 0x659   :  { %1511 = vmatpush.msra.mxu3 %v4673_v59  ;;  %v6844_v59 = vld [vmem:[#allocation39_spill] sm:$0xff] }
 0x65a   :  { %1531 = vmatpush.msra.mxu0 %v4675_v45 }
 0x65b   :  { %1512 = vmatpush.msra.mxu3 %v4687_v41  ;;  %v6845_v41 = vld [vmem:[#allocation41_spill] sm:$0xff] }
 0x65c   :  { %1532 = vmatpush.msra.mxu0 %v4689_v43  ;;  %v6846_v43 = vld [vmem:[#allocation42_spill] sm:$0xff] }
 0x65d   :  { %1513 = vmatpush.msra.mxu3 %v4699_v26  ;;  %v6847_v26 = vld [vmem:[#allocation36_spill] sm:$0xff] }
 0x65e   :  { %1533 = vmatpush.msra.mxu0 %v4701_v23 }
 0x65f   :  { %1514 = vmatpush.msra.mxu3 %v4712_v61  ;;  %v6848_v61 = vld [vmem:[#allocation44_spill] sm:$0xff] }
 0x660   :  { %1534 = vmatpush.msra.mxu0 %v4714_v63  ;;  %v6849_v63 = vld [vmem:[#allocation45_spill] sm:$0xff] }
 0x661   :  { %1515 = vmatpush.msra.mxu3 %v4724_v0 }
 0x662   :  { %1535 = vmatpush.msra.mxu0 %v4726_v1 }
 0x663   :  { %1516 = vmatpush.msra.mxu3 %v6839_v16  ;;  %v6874_v16 = vld [vmem:[#allocation17_spill] sm:$0xff] }
 0x664   :  { %1536 = vmatpush.msra.mxu0 %v6840_v19  ;;  %v6875_v19 = vld [vmem:[#allocation37_spill] sm:$0xff] }
 0x665   :  { %1517 = vmatpush.msra.mxu3 %v6841_v25  ;;  %v6877_v25 = vld [vmem:[#allocation43_spill] sm:$0xff] }
 0x666   :  { %1537 = vmatpush.msra.mxu0 %v6842_v49  ;;  %v6878_v49 = vld [vmem:[#allocation46_spill] sm:$0xff] }
 0x667   :  { %1518 = vmatpush.msra.mxu3 %v6843_v57  ;;  %v6880_v57 = vld [vmem:[#allocation50_spill] sm:$0xff] }
 0x668   :  { %1538 = vmatpush.msra.mxu0 %v6844_v59  ;;  %v6881_v59 = vld [vmem:[#allocation51_spill] sm:$0xff] }
 0x669   :  { %1519 = vmatpush.msra.mxu3 %v6845_v41  ;;  %v6883_v41 = vld [vmem:[#allocation53_spill] sm:$0xff] }
 0x66a   :  { %1539 = vmatpush.msra.mxu0 %v6846_v43  ;;  %v1104_v43 = vpop.f32.mrf.mxu1 }
 0x66b   :  { %1520 = vmatpush.msra.mxu3 %v6848_v61  ;;  %v1019_v61 = vperm.slane %v4851_v24, 2 }
 0x66c   :  { %1540 = vmatpush.msra.mxu0 %v6849_v63 }
 0x66d   :  { %1521 = vmatpush.msra.mxu3 %v6850_v28 }
 0x6c3   :  { %v1147_v21 = vpop.xlane.xlu2 %1146 }
 0x6c4   :  { %v1148_v30 = vsub.f32 %v1144_v47, %v1147_v21  ;;  %v6851_v47 = vld [vmem:[#allocation48_spill] sm:$0xff] }
 0x6c5   :  { %1541 = vmatpush.msra.mxu0 %v6851_v47 }
 0x6c6   :  { %v1149_v8 = vmul.f32 1.442695, %v1148_v30 }
 0x6c8   :  { %3726 = vpow2.f32 %v1149_v8  ;;  %v5114_v8 = vld [vmem:[%s6568_s6 + $0x58] sm:$0xff] }
 0x6ce   :  { %v4916_v38 = vpop.eup %3726 }
 0x6cf   :  { %v1151_v2 = vsel %vm265_vm1, %v4916_v38, 0.0 }
 0x6d0   :  { %1152 = vadd.xlane.f32.xlu2 %v1151_v2  ;;  %v5126_v2 = vld [vmem:[%s6568_s6 + $0x28] sm:$0xff] }
 0x743   :  { %v1153_v11 = vpop.xlane.xlu2 %1152 }
 0x744   :  { %3728 = vrcp.f32 %v1153_v11 }
 0x74a   :  { %v3729_v12 = vpop.eup %3728 }
 0x74b   :  { %v1155_v15 = vmul.f32 %v3729_v12, %v1153_v11  ;;  %v6871_v11 = vld [vmem:[#allocation31_spill] sm:$0xff] }
 0x74d   :  { %v1156_v20 = vsub.f32 2.0, %v1155_v15  ;;  %v6873_v15 = vld [vmem:[#allocation33_spill] sm:$0xff] }
 0x74f   :  { %v1157_v29 = vmul.f32 %v3729_v12, %v1156_v20  ;;  %v6872_v12 = vld [vmem:[#allocation32_spill] sm:$0xff] }
 0x750   :  { %v6876_v20 = vld [vmem:[#allocation40_spill] sm:$0xff] }
 0x751   :  { %v1158_v45 = vmul.f32 %v4916_v38, %v1157_v29  ;;  %v5120_v38 = vld [vmem:[%s6568_s6 + $0x40] sm:$0xff]  ;;  %v6879_v29 = vld [vmem:[#allocation49_spill] sm:$0xff] }
 0x753   :  { %v1162_v23 = vperm.slane %v1158_v45, %v6847_v26  ;;  %v6882_v45 = vld [vmem:[#allocation52_spill] sm:$0xff] }
 0x755   :  { %v1196_v0 = vperm.slane %v1162_v23, 0  ;;  %v1197_v1 = vperm.slane %v1162_v23, 4  ;;  %v1255_v23 = vld [vmem:[%s6569_s7] sm:$0x7] }
 0x756   :  { %v1257_v63 = vperm.slane %v1255_v23, 0 }
 0x757   :  { %1216 = vmatmul.f32.vlgmr.msrb.gmra.mxu3 %v1196_v0  ;;  %1236 = vmatmul.f32.vlgmr.msrb.gmra.mxu0 %v1197_v1 }
 0x758   :  { %1659 = vmatpush.msrb.mxu3 %v4868_v54  ;;  %v5075_v54 = vld [vmem:[%s6568_s6 + $0x18] sm:$0xff] }
 0x759   :  { %1280 = vmatpush.msrb.mxu1 %v5075_v54 }
 0x75a   :  { %1660 = vmatpush.msrb.mxu3 %v4877_v56  ;;  %v5087_v56 = vld [vmem:[%s6568_s6 + $0x50] sm:$0xff] }
 0x75b   :  { %1281 = vmatpush.msrb.mxu1 %v5081_v27 }
 0x75c   :  { %1661 = vmatpush.msrb.mxu3 %v4885_v58  ;;  %v5098_v58 = vld [vmem:[%s6568_s6 + $0x20] sm:$0xff] }
 0x75d   :  { %1298 = vmatpush.msra.mxu1 %v5087_v56 }
 0x75e   :  { %1662 = vmatpush.msrb.mxu3 %v4894_v55  ;;  %v1084_v55 = vpop.f32.mrf.mxu0 }
 0x75f   :  { %1299 = vmatpush.msra.mxu1 %v5092_v36  ;;  %v1085_v1 = vadd.f32 %v1084_v55, %v1019_v61 }
 0x760   :  { %1663 = vmatpush.msrb.mxu3 %v4903_v33 }
 0x761   :  { %1300 = vmatpush.msra.mxu1 %v5098_v58 }
 0x762   :  { %1664 = vmatpush.msrb.mxu3 %v4912_v48 }
 0x763   :  { %1301 = vmatpush.msra.mxu1 %v5104_v50 }
 0x764   :  { %1665 = vmatpush.msrb.mxu3 %v4926_v60  ;;  %v6852_v60 = vld [vmem:[#allocation9_spill] sm:$0xff] }
 0x766   :  { %1666 = vmatpush.msrb.mxu3 %v4935_v6  ;;  %v6854_v6 = vld [vmem:[#allocation10_spill] sm:$0xff] }
 0x768   :  { %1667 = vmatpush.msrb.mxu3 %v4944_v42  ;;  %v6856_v42 = vld [vmem:[#allocation12_spill] sm:$0xff] }
 0x76a   :  { %1668 = vmatpush.msrb.mxu3 %v4953_v37  ;;  %v6858_v37 = vld [vmem:[#allocation20_spill] sm:$0xff] }
 0x76c   :  { %1669 = vmatpush.msrb.mxu3 %v4962_v9  ;;  %v6860_v9 = vld [vmem:[#allocation21_spill] sm:$0xff] }
 0x76e   :  { %1670 = vmatpush.msrb.mxu3 %v4971_v4  ;;  %v6862_v4 = vld [vmem:[#allocation22_spill] sm:$0xff] }
 0x770   :  { %1671 = vmatpush.msrb.mxu3 %v4980_v10  ;;  %v6864_v10 = vld [vmem:[#allocation24_spill] sm:$0xff] }
 0x772   :  { %1672 = vmatpush.msrb.mxu3 %v4989_v14  ;;  %v6866_v14 = vld [vmem:[#allocation26_spill] sm:$0xff] }
 0x774   :  { %1673 = vmatpush.msrb.mxu3 %v4998_v18  ;;  %v6868_v18 = vld [vmem:[#allocation28_spill] sm:$0xff] }
 0x776   :  { %1674 = vmatpush.msrb.mxu3 %v5006_v46  ;;  %v6870_v46 = vld [vmem:[#allocation30_spill] sm:$0xff] }
 0x7d4   :  { %v1237_v53 = vpop.f32.mrf.mxu0 }
 0x7da   :  { %v1217_v33 = vpop.f32.mrf.mxu3 }
 0x7db   :  { %v1238_v48 = vadd.f32 %v1237_v53, %v1217_v33  ;;  %v1020_v53 = vperm.slane %v4851_v24, 3 }
 0x7dd   :  { %v1241_v21 = vadd.f32 %v1240_v44, %v1238_v48  ;;  %v1258_v44 = vperm.slane %v1255_v23, 1 }
 0x7df   :  { %v1242_v30 = vmax.f32 %v1241_v21, 0.0  ;;  %v1105_v21 = vadd.f32 %v1104_v43, %v1020_v53 }
 0x7e1   :  { %3655 = vmatmul.msk.f32.vlgmr.msrb.gmra.mxu1 %vm384_vm2, %v1242_v30 }
 0x7e2   :  { %1318 = vmatpush.msrb.mxu1 %v5114_v8 }
 0x7e4   :  { %1319 = vmatpush.msrb.mxu1 %v5120_v38 }
 0x7e6   :  { %1320 = vmatpush.msrb.mxu1 %v5126_v2 }
 0x7e8   :  { %1321 = vmatpush.msrb.mxu1 %v5132_v32 }
 0x7e9   :  { %3656 = vmatmul.msk.f32.vlgmr.msra.gmra.mxu1 %vm384_vm2, %v1242_v30 }
 0x7ea   :  { %1466 = vmatpush.msra.mxu1 %v6852_v60 }
 0x7ec   :  { %1467 = vmatpush.msra.mxu1 %v6853_v34 }
 0x7ee   :  { %1468 = vmatpush.msra.mxu1 %v6854_v6 }
 0x7f0   :  { %1469 = vmatpush.msra.mxu1 %v6855_v7 }
 0x7f1   :  { %3657 = vmatmul.msk.f32.vlgmr.msrb.gmra.mxu1 %vm384_vm2, %v1242_v30 }
 0x7f2   :  { %1470 = vmatpush.msra.mxu1 %v6856_v42 }
 0x7f4   :  { %1471 = vmatpush.msra.mxu1 %v6857_v51 }
 0x7f6   :  { %1472 = vmatpush.msra.mxu1 %v6858_v37 }
 0x7f8   :  { %1473 = vmatpush.msra.mxu1 %v6859_v35 }
 0x7fa   :  { %1474 = vmatpush.msra.mxu1 %v6860_v9 }
 0x7fc   :  { %1475 = vmatpush.msra.mxu1 %v6861_v3  ;;  %v1021_v3 = vperm.slane %v4851_v24, 4 }
 0x7fe   :  { %1476 = vmatpush.msra.mxu1 %v6862_v4 }
 0x800   :  { %1477 = vmatpush.msra.mxu1 %v6863_v39 }
 0x802   :  { %1478 = vmatpush.msra.mxu1 %v6864_v10  ;;  %v1124_v10 = vpop.f32.mrf.mxu2 }
 0x804   :  { %1479 = vmatpush.msra.mxu1 %v6865_v13  ;;  %v1259_v13 = vperm.slane %v1255_v23, 2 }
 0x806   :  { %1480 = vmatpush.msra.mxu1 %v6866_v14 }
 0x808   :  { %1481 = vmatpush.msra.mxu1 %v6867_v17 }
 0x80a   :  { %1546 = vmatpush.msrb.mxu1 %v6868_v18 }
 0x80c   :  { %1547 = vmatpush.msrb.mxu1 %v6869_v22 }
 0x80e   :  { %1548 = vmatpush.msrb.mxu1 %v6870_v46  ;;  %v1125_v46 = vadd.f32 %v1124_v10, %v1021_v3 }
 0x810   :  { %1549 = vmatpush.msrb.mxu1 %v6871_v11 }
 0x812   :  { %1550 = vmatpush.msrb.mxu1 %v6872_v12 }
 0x814   :  { %1551 = vmatpush.msrb.mxu1 %v6873_v15 }
 0x816   :  { %1552 = vmatpush.msrb.mxu1 %v6874_v16 }
 0x818   :  { %1553 = vmatpush.msrb.mxu1 %v6875_v19 }
 0x81a   :  { %1554 = vmatpush.msrb.mxu1 %v6876_v20 }
 0x81c   :  { %1555 = vmatpush.msrb.mxu1 %v6877_v25 }
 0x81e   :  { %1556 = vmatpush.msrb.mxu1 %v6878_v49 }
 0x820   :  { %1557 = vmatpush.msrb.mxu1 %v6879_v29 }
 0x822   :  { %1558 = vmatpush.msrb.mxu1 %v6880_v57 }
 0x824   :  { %1559 = vmatpush.msrb.mxu1 %v6881_v59 }
 0x826   :  { %1560 = vmatpush.msrb.mxu1 %v6882_v45 }
 0x828   :  { %1561 = vmatpush.msrb.mxu1 %v6883_v41 }
 0x85e   :  { %v1283_v0 = vpop.f32.mrf.mxu1 }
 0x85f   :  { %v1284_v28 = vadd.f32 %v1283_v0, %v1257_v63 }
 0x861   :  { %v1326_v47 = vadd.f32 %v1284_v28, %v1085_v1 }
 0x863   :  { %v3658_v33 = vmul.f32 -1.442695, %v1326_v47 }
 0x865   :  { %3730 = vpow2.f32 %v3658_v33 }
 0x866   :  { %v1303_v48 = vpop.f32.mrf.mxu1 }
 0x867   :  { %v1304_v30 = vadd.f32 %v1303_v48, %v1258_v44 }
 0x869   :  { %v1346_v60 = vadd.f32 %v1304_v30, %v1105_v21 }
 0x86b   :  { %v3731_v34 = vpop.eup %3730  ;;  %v3659_v6 = vmul.f32 -1.442695, %v1346_v60 }
 0x86c   :  { %v1330_v7 = vadd.f32 1.0, %v3731_v34 }
 0x86d   :  { %3732 = vpow2.f32 %v3659_v6 }
 0x86e   :  { %3734 = vrcp.f32 %v1330_v7  ;;  %v1342_v9 = vand.u32 2147483648, %v1330_v7  ;;  %v1340_v39 = vand.u32 2147483647, %v1330_v7  ;;  %vm1336_vm7 = vweird.f32 %v1330_v7  ;;  %v1323_v18 = vpop.f32.mrf.mxu1 }
 0x86f   :  { %v1324_v19 = vadd.f32 %v1323_v18, %v1259_v13  ;;  %v5233_v18 = vld [vmem:[#allocation3 + $0x1b8] sm:$0xff] }
 0x870   :  { %v1343_v22 = vor.u32 1.1754944e-38, %v1342_v9  ;;  %vm1341_vm9 = vcmp.eq.f32.partialorder %v1340_v39, 8.507059e+37  ;;  %v1679_v39 = vld [vmem:[%s6563_s1 + $0x3] sm:$0x1]  ;;  %6888 = vst [vmem:[#allocation38_spill] sm:$0xff] %v5233_v18 }
 0x873   :  { %v3733_v42 = vpop.eup %3732 }
 0x874   :  { %v3735_v51 = vpop.eup %3734  ;;  %v1350_v37 = vadd.f32 1.0, %v3733_v42 }
 0x875   :  { %v1332_v55 = vmul.f32 %v3735_v51, %v1330_v7  ;;  %vm1337_vm6 = vweird.f32 %v3735_v51 }
 0x876   :  { %3736 = vrcp.f32 %v1350_v37  ;;  %vm1338_vm8 = vmor %vm1336_vm7, %vm1337_vm6  ;;  %v1362_v24 = vand.u32 2147483648, %v1350_v37  ;;  %v1360_v49 = vand.u32 2147483647, %v1350_v37  ;;  %vm1356_vm11 = vweird.f32 %v1350_v37 }
 0x877   :  { %v1333_v35 = vsub.f32 1.0, %v1332_v55  ;;  %v5215_v55 = vld [vmem:[#allocation3 + $0x230] sm:$0xff] }
 0x878   :  { %v1363_v59 = vor.u32 1.1754944e-38, %v1362_v24  ;;  %vm1361_vm13 = vcmp.eq.f32.partialorder %v1360_v49, 8.507059e+37  ;;  %6885 = vst [vmem:[#allocation35_spill] sm:$0xff] %v5215_v55  ;;  %v5259_v24 = vld [vmem:[#allocation3 + $0x268] sm:$0xff]  ;;  %v5265_v49 = vld [vmem:[#allocation3 + $0x78] sm:$0xff] }
 0x879   :  { %v1334_v4 = vmul.f32 %v3735_v51, %v1333_v35  ;;  %v5218_v35 = vld [vmem:[#allocation3 + $0x208] sm:$0xff]  ;;  %6896 = vst [vmem:[#allocation9_spill] sm:$0xff] %v5265_v49 }
 0x87a   :  { %6886 = vst [vmem:[#allocation18_spill] sm:$0xff] %v5218_v35 }
 0x87b   :  { %v1335_v14 = vadd.f32 %v3735_v51, %v1334_v4 }
 0x87c   :  { %v3737_v17 = vpop.eup %3736 }
 0x87d   :  { %v1352_v11 = vmul.f32 %v3737_v17, %v1350_v37  ;;  %v1339_v12 = vsel %vm1338_vm8, %v3735_v51, %v1335_v14  ;;  %vm1357_vm10 = vweird.f32 %v3737_v17  ;;  %v5213_v37 = vld [vmem:[#allocation3 + $0x258] sm:$0xff] }
 0x87e   :  { %v1344_v15 = vsel %vm1341_vm9, %v1343_v22, %v1339_v12  ;;  %vm1358_vm12 = vmor %vm1356_vm11, %vm1357_vm10  ;;  %6884 = vst [vmem:[#allocation34_spill] sm:$0xff] %v5213_v37  ;;  %1905 = vmatpush.msrb.mxu0 %v5213_v37  ;;  %v5236_v22 = vld [vmem:[#allocation3 + $0x190] sm:$0xff]  ;;  %v5245_v12 = vld [vmem:[#allocation3 + $0x118] sm:$0xff] }
 0x87f   :  { %v1353_v16 = vsub.f32 1.0, %v1352_v11  ;;  %v1366_v20 = vmul.f32 %v1344_v15, %v1125_v46  ;;  %6889 = vst [vmem:[#allocation39_spill] sm:$0xff] %v5236_v22  ;;  %v5239_v46 = vld [vmem:[#allocation3 + $0x168] sm:$0xff]  ;;  %v5242_v11 = vld [vmem:[#allocation3 + $0x140] sm:$0xff]  ;;  %v5248_v15 = vld [vmem:[#allocation3 + $0xf0] sm:$0xff] }
 0x880   :  { %1906 = vmatpush.msrb.mxu0 %v5215_v55  ;;  %6890 = vst [vmem:[#allocation41_spill] sm:$0xff] %v5239_v46  ;;  %v5469_v37 = vld [vmem:[#allocation3 + $0x20] sm:$0xff] }
 0x881   :  { %v1354_v25 = vmul.f32 %v3737_v17, %v1353_v16  ;;  %v1367_v29 = vadd.f32 %v1366_v20, %v1324_v19  ;;  %6891 = vst [vmem:[#allocation42_spill] sm:$0xff] %v5242_v11  ;;  %v5251_v16 = vld [vmem:[#allocation3 + $0xc8] sm:$0xff]  ;;  %v5254_v19 = vld [vmem:[#allocation3 + $0xa0] sm:$0xff] }
 0x882   :  { %1907 = vmatpush.msrb.mxu0 %v5218_v35  ;;  %6892 = vst [vmem:[#allocation44_spill] sm:$0xff] %v5245_v12  ;;  %v5257_v20 = vld [vmem:[#allocation3 + $0x260] sm:$0xff]  ;;  %v5466_v35 = vld [vmem:[#allocation3 + $0x48] sm:$0xff] }
 0x883   :  { %v1355_v57 = vadd.f32 %v3737_v17, %v1354_v25  ;;  %3738 = vtanh.f32 %v1367_v29  ;;  %6893 = vst [vmem:[#allocation45_spill] sm:$0xff] %v5248_v15  ;;  %v5261_v25 = vld [vmem:[#allocation3 + $0x270] sm:$0xff]  ;;  %v5269_v29 = vld [vmem:[#allocation3 + $0x238] sm:$0xff] }
 0x884   :  { %6894 = vst [vmem:[#allocation47_spill] sm:$0xff] %v5251_v16 }
 0x885   :  { %v1359_v45 = vsel %vm1358_vm12, %v3737_v17, %v1355_v57  ;;  %v5230_v17 = vld [vmem:[#allocation3 + $0x1e0] sm:$0xff]  ;;  %6895 = vst [vmem:[#allocation48_spill] sm:$0xff] %v5254_v19 }
 0x886   :  { %v1364_v41 = vsel %vm1361_vm13, %v1363_v59, %v1359_v45  ;;  %6887 = vst [vmem:[#allocation19_spill] sm:$0xff] %v5230_v17  ;;  %1908 = vmatpush.msrb.mxu0 %v5230_v17  ;;  %v5271_v57 = vld [vmem:[#allocation3 + $0x240] sm:$0xff]  ;;  %v5273_v59 = vld [vmem:[#allocation3 + $0x248] sm:$0xff]  ;;  %v5277_v45 = vld [vmem:[#allocation3 + $0x50] sm:$0xff] }
 0x887   :  { %v1369_v43 = vsub.f32 1.0, %v1364_v41  ;;  %v1371_v63 = vmul.f32 %v1364_v41, %v4824_v5  ;;  %v5200_v5 = vld [vmem:[%s6567_s5] sm:$0x1f]  ;;  %6897 = vst [vmem:[#allocation11_spill] sm:$0xff] %v5277_v45  ;;  %v5281_v41 = vld [vmem:[#allocation3 + $0x210] sm:$0xff] }
 0x888   :  { %1909 = vmatpush.msrb.mxu0 %v5233_v18  ;;  %6926 = vst [vmem:[#allocation52_spill] sm:$0xff] %v5466_v35 }
 0x889   :  { %v3739_v23 = vpop.eup %3738  ;;  %6927 = vst [vmem:[#allocation53_spill] sm:$0xff] %v5469_v37 }
 0x88a   :  { %v1370_v61 = vmul.f32 %v3739_v23, %v1369_v43  ;;  %1910 = vmatpush.msrb.mxu0 %v5236_v22  ;;  %v5283_v43 = vld [vmem:[#allocation3 + $0x218] sm:$0xff]  ;;  %v5285_v23 = vld [vmem:[#allocation3 + $0x220] sm:$0xff] }
 0x88b   :  { %v5461_v22 = vld [vmem:[#allocation3 + $0x98] sm:$0xff] }
 0x88c   :  { %v5177_v0 = vadd.f32 %v1371_v63, %v1370_v61  ;;  %1911 = vmatpush.msrb.mxu0 %v5239_v46  ;;  %v5289_v61 = vld [vmem:[#allocation3 + $0x28] sm:$0xff]  ;;  %v5453_v46 = vld [vmem:[#allocation3 + $0x18] sm:$0xff]  ;;  %6924 = vst [vmem:[#allocation50_spill] sm:$0xff] %v5461_v22 }
 0x88d   :  { %6898 = vst [vmem:[#allocation10_spill] sm:$0xff] %v5289_v61  ;;  %v5293_v63 = vld [vmem:[#allocation3 + $0x1e8] sm:$0xff] }
 0x88e   :  { %1373 = vst [vmem:[#allocation2 + $0x2] sm:$0x1] %v5177_v0  ;;  %1482 = vmatmul.f32.vlgmr.msra.gmra.mxu1 %v5177_v0  ;;  %1502 = vmatmul.f32.vlgmr.msra.gmra.mxu2 %v5177_v0 }
 0x88f   :  { %1522 = vmatmul.f32.vlgmr.msra.gmra.mxu3 %v5177_v0  ;;  %1542 = vmatmul.f32.vlgmr.msra.gmra.mxu0 %v5177_v0  ;;  %6922 = vst [vmem:[#allocation46_spill] sm:$0xff] %v5453_v46 }
 0x890   :  { %1717 = vmatpush.msra.mxu1 %v5063_v40  ;;  %1737 = vmatpush.msra.mxu2 %v5087_v56  ;;  %v1457_v40 = vperm.slane %v5200_v5, 1 }
 0x891   :  { %1757 = vmatpush.msra.mxu3 %v5114_v8  ;;  %1912 = vmatpush.msrb.mxu0 %v5242_v11  ;;  %v5445_v11 = vld [vmem:[#allocation3 + $0xe8] sm:$0xff] }
 0x892   :  { %1718 = vmatpush.msra.mxu1 %v5069_v52  ;;  %1738 = vmatpush.msra.mxu2 %v5092_v36  ;;  %v1456_v52 = vperm.slane %v5200_v5, 0  ;;  %6920 = vst [vmem:[#allocation40_spill] sm:$0xff] %v5445_v11 }
 0x893   :  { %1758 = vmatpush.msra.mxu3 %v5120_v38  ;;  %1913 = vmatpush.msrb.mxu0 %v5245_v12 }
 0x894   :  { %1719 = vmatpush.msra.mxu1 %v5075_v54  ;;  %1739 = vmatpush.msra.mxu2 %v5098_v58 }
 0x895   :  { %1759 = vmatpush.msra.mxu3 %v5126_v2  ;;  %1914 = vmatpush.msrb.mxu0 %v5248_v15  ;;  %v5441_v15 = vld [vmem:[#allocation3 + $0x40] sm:$0xff] }
 0x896   :  { %1562 = vmatmul.f32.vlgmr.msrb.gmra.mxu1 %v5177_v0  ;;  %1740 = vmatpush.msra.mxu2 %v5104_v50  ;;  %6919 = vst [vmem:[#allocation37_spill] sm:$0xff] %v5441_v15 }
 0x897   :  { %1720 = vmatpush.msra.mxu1 %v5081_v27  ;;  %1760 = vmatpush.msra.mxu3 %v5132_v32  ;;  %v3660_v27 = vld [vmem:[%s6562_s0 + $0x3] ss:$8 sm:$0x3] }
 0x898   :  { %1915 = vmatpush.msrb.mxu0 %v5251_v16 }
 0x899   :  { %1925 = vmatpush.msrb.mxu1 %v5257_v20 }
 0x89a   :  { %1916 = vmatpush.msrb.mxu0 %v5254_v19 }
 0x89b   :  { %1926 = vmatpush.msrb.mxu1 %v5269_v29 }
 0x89c   :  { %1917 = vmatpush.msrb.mxu0 %v5265_v49  ;;  %v5409_v49 = vld [vmem:[#allocation3 + $0x160] sm:$0xff] }
 0x89d   :  { %1927 = vmatpush.msrb.mxu1 %v5281_v41  ;;  %6911 = vst [vmem:[#allocation27_spill] sm:$0xff] %v5409_v49 }
 0x89e   :  { %1918 = vmatpush.msrb.mxu0 %v5277_v45  ;;  %v5405_v45 = vld [vmem:[#allocation3 + $0xb8] sm:$0xff] }
 0x89f   :  { %1928 = vmatpush.msrb.mxu1 %v5293_v63  ;;  %6910 = vst [vmem:[#allocation26_spill] sm:$0xff] %v5405_v45 }
 0x8a0   :  { %1919 = vmatpush.msrb.mxu0 %v5289_v61  ;;  %v5403_v61 = vld [vmem:[#allocation3 + $0xb0] sm:$0xff] }
 0x8a1   :  { %6909 = vst [vmem:[#allocation25_spill] sm:$0xff] %v5403_v61 }
 0x90b   :  { %v1483_v54 = vpop.f32.mrf.mxu1 }
 0x90c   :  { %v1484_v58 = vadd.f32 %v1483_v54, %v1456_v52  ;;  %v5297_v52 = vld [vmem:[#allocation3 + $0x1f8] sm:$0xff] }
 0x911   :  { %v1503_v56 = vpop.f32.mrf.mxu2 }
 0x912   :  { %v1504_v36 = vadd.f32 %v1503_v56, %v1457_v40  ;;  %v5222_v9 = vpop.f32.mrf.mxu3  ;;  %v5295_v40 = vld [vmem:[#allocation3 + $0x1f0] sm:$0xff]  ;;  %v5303_v56 = vld [vmem:[#allocation3] sm:$0xff] }
 0x913   :  { %v5299_v54 = vpop.f32.mrf.mxu1  ;;  %6899 = vst [vmem:[#allocation13_spill] sm:$0xff] %v5303_v56  ;;  %1920 = vmatpush.msrb.mxu0 %v5303_v56 }
 0x914   :  { %v1570_v8 = vrot.slane %v1504_v36, 7  ;;  %v5307_v36 = vld [vmem:[#allocation3 + $0x1c0] sm:$0xff] }
 0x915   :  { %1929 = vmatpush.msrb.mxu1 %v5307_v36 }
 0x916   :  { %v1571_v50 = vsel %vm251_vm0, %v1484_v58, %v1570_v8  ;;  %v5309_v58 = vld [vmem:[#allocation3 + $0x1c8] sm:$0xff]  ;;  %v5311_v8 = vld [vmem:[#allocation3 + $0x1d0] sm:$0xff] }
 0x917   :  { %v1573_v38 = vadd.f32 %v3660_v27, %v1571_v50  ;;  %v5316_v27 = vld [vmem:[%s6569_s7] sm:$0x7] }
 0x918   :  { %v5320_v50 = vld [vmem:[#allocation3 + $0x278] sm:$0xff] }
 0x919   :  { %v1578_v2 = vperm.slane %v1573_v38, %v6793_v31  ;;  %6900 = vst [vmem:[#allocation12_spill] sm:$0xff] %v5320_v50  ;;  %1985 = vmatpush.msra.mxu0 %v5320_v50  ;;  %v5324_v38 = vld [vmem:[#allocation3 + $0x198] sm:$0xff]  ;;  %v5397_v50 = vld [vmem:[#allocation3 + $0x188] sm:$0xff] }
 0x91a   :  { %1930 = vmatpush.msrb.mxu1 %v5324_v38  ;;  %6908 = vst [vmem:[#allocation24_spill] sm:$0xff] %v5397_v50 }
 0x91b   :  { %v1583_v32 = vperm.slane %v1578_v2, %v6794_v62  ;;  %v5326_v2 = vld [vmem:[#allocation3 + $0x1a0] sm:$0xff] }
 0x91d   :  { %v1584_v1 = vsel %vm265_vm1, %v1583_v32, -inf }
 0x91e   :  { %1585 = vmax.xlane.f32.xlu0 %v1584_v1  ;;  %v5332_v1 = vld [vmem:[#allocation3 + $0x250] sm:$0xff] }
 0x91f   :  { %6901 = vst [vmem:[#allocation15_spill] sm:$0xff] %v5332_v1  ;;  %1986 = vmatpush.msra.mxu0 %v5332_v1 }
 0x991   :  { %v1586_v28 = vpop.xlane.xlu0 %1585 }
 0x992   :  { %v1587_v47 = vsub.f32 %v1583_v32, %v1586_v28  ;;  %v5328_v32 = vld [vmem:[#allocation3 + $0x1a8] sm:$0xff]  ;;  %v1458_v28 = vperm.slane %v5200_v5, 2 }
 0x994   :  { %v1588_v53 = vmul.f32 1.442695, %v1587_v47  ;;  %v1696_v47 = vperm.slane %v5316_v27, 0 }
 0x996   :  { %3740 = vpow2.f32 %v1588_v53  ;;  %v5338_v53 = vld [vmem:[#allocation3 + $0x170] sm:$0xff] }
 0x997   :  { %1931 = vmatpush.msrb.mxu1 %v5338_v53 }
 0x99c   :  { %v3741_v33 = vpop.eup %3740 }
 0x99d   :  { %v1590_v44 = vsel %vm265_vm1, %v3741_v33, 0.0 }
 0x99e   :  { %1591 = vadd.xlane.f32.xlu1 %v1590_v44  ;;  %v5342_v44 = vld [vmem:[#allocation3 + $0x180] sm:$0xff] }
 0xa11   :  { %v1592_v48 = vpop.xlane.xlu1 %1591 }
 0xa12   :  { %3742 = vrcp.f32 %v1592_v48 }
 0xa18   :  { %v3743_v21 = vpop.eup %3742 }
 0xa19   :  { %v1594_v30 = vmul.f32 %v3743_v21, %v1592_v48  ;;  %v5346_v48 = vld [vmem:[#allocation3 + $0x228] sm:$0xff] }
 0xa1a   :  { %6902 = vst [vmem:[#allocation20_spill] sm:$0xff] %v5346_v48  ;;  %1987 = vmatpush.msra.mxu0 %v5346_v48  ;;  %v5393_v48 = vld [vmem:[#allocation3 + $0xe0] sm:$0xff] }
 0xa1b   :  { %v1595_v60 = vsub.f32 2.0, %v1594_v30  ;;  %v5352_v30 = vld [vmem:[#allocation3 + $0x150] sm:$0xff]  ;;  %6907 = vst [vmem:[#allocation23_spill] sm:$0xff] %v5393_v48 }
 0xa1d   :  { %v1596_v34 = vmul.f32 %v3743_v21, %v1595_v60  ;;  %v5350_v21 = vld [vmem:[#allocation3 + $0x148] sm:$0xff]  ;;  %v5354_v60 = vld [vmem:[#allocation3 + $0x158] sm:$0xff] }
 0xa1e   :  { %1932 = vmatpush.msrb.mxu1 %v5350_v21 }
 0xa1f   :  { %v1597_v6 = vmul.f32 %v3741_v33, %v1596_v34  ;;  %v5340_v33 = vld [vmem:[#allocation3 + $0x178] sm:$0xff] }
 0xa21   :  { %v1601_v7 = vperm.slane %v1597_v6, %v6847_v26  ;;  %v5358_v6 = vld [vmem:[#allocation3 + $0x200] sm:$0xff]  ;;  %v1698_v26 = vperm.slane %v5316_v27, 2 }
 0xa22   :  { %6903 = vst [vmem:[#allocation14_spill] sm:$0xff] %v5358_v6  ;;  %1988 = vmatpush.msra.mxu0 %v5358_v6  ;;  %v5385_v6 = vld [vmem:[#allocation3 + $0x1b0] sm:$0xff] }
 0xa23   :  { %v1635_v42 = vperm.slane %v1601_v7, 0  ;;  %v1636_v51 = vperm.slane %v1601_v7, 4  ;;  %v1524_v7 = vadd.f32 %v5222_v9, %v1458_v28  ;;  %v5379_v28 = vld [vmem:[#allocation3 + $0x100] sm:$0xff]  ;;  %6905 = vst [vmem:[#allocation16_spill] sm:$0xff] %v5385_v6 }
 0xa25   :  { %1655 = vmatmul.f32.vlgmr.msrb.gmra.mxu2 %v1635_v42  ;;  %1675 = vmatmul.f32.vlgmr.msrb.gmra.mxu3 %v1636_v51  ;;  %v5363_v51 = vld [vmem:[#allocation3 + $0x120] sm:$0xff] }
 0xa26   :  { %1945 = vmatpush.msrb.mxu2 %v5259_v24  ;;  %1965 = vmatpush.msrb.mxu3 %v5261_v25 }
 0xa27   :  { %1933 = vmatpush.msrb.mxu1 %v5363_v51 }
 0xa28   :  { %1946 = vmatpush.msrb.mxu2 %v5271_v57  ;;  %1966 = vmatpush.msrb.mxu3 %v5273_v59 }
 0xa2a   :  { %1947 = vmatpush.msrb.mxu2 %v5283_v43  ;;  %1967 = vmatpush.msrb.mxu3 %v5285_v23 }
 0xa2c   :  { %1948 = vmatpush.msrb.mxu2 %v5295_v40  ;;  %1968 = vmatpush.msrb.mxu3 %v5297_v52 }
 0xa2e   :  { %1949 = vmatpush.msrb.mxu2 %v5309_v58  ;;  %1969 = vmatpush.msrb.mxu3 %v5311_v8 }
 0xa30   :  { %1950 = vmatpush.msrb.mxu2 %v5326_v2  ;;  %1970 = vmatpush.msrb.mxu3 %v5328_v32 }
 0xa32   :  { %1951 = vmatpush.msrb.mxu2 %v5340_v33  ;;  %1971 = vmatpush.msrb.mxu3 %v5342_v44 }
 0xa34   :  { %1952 = vmatpush.msrb.mxu2 %v5352_v30  ;;  %1972 = vmatpush.msrb.mxu3 %v5354_v60 }
 0xaa8   :  { %v1656_v3 = vpop.f32.mrf.mxu2  ;;  %v1676_v4 = vpop.f32.mrf.mxu3 }
 0xaa9   :  { %v1677_v10 = vadd.f32 %v1676_v4, %v1656_v3  ;;  %v5365_v3 = vld [vmem:[#allocation3 + $0x128] sm:$0xff]  ;;  %v5367_v4 = vld [vmem:[#allocation3 + $0x130] sm:$0xff] }
 0xaaa   :  { %1953 = vmatpush.msrb.mxu2 %v5365_v3  ;;  %1973 = vmatpush.msrb.mxu3 %v5367_v4 }
 0xaab   :  { %v1680_v13 = vadd.f32 %v1679_v39, %v1677_v10  ;;  %v5371_v39 = vld [vmem:[#allocation3 + $0x1d8] sm:$0xff]  ;;  %v1459_v10 = vperm.slane %v5200_v5, 3 }
 0xaac   :  { %6904 = vst [vmem:[#allocation21_spill] sm:$0xff] %v5371_v39  ;;  %1989 = vmatpush.msra.mxu0 %v5371_v39  ;;  %1954 = vmatpush.msrb.mxu2 %v5379_v28  ;;  %v5391_v39 = vld [vmem:[#allocation3 + $0xd8] sm:$0xff] }
 0xaad   :  { %v1681_v14 = vmax.f32 %v1680_v13, 0.0  ;;  %v1697_v13 = vperm.slane %v5316_v27, 1  ;;  %6906 = vst [vmem:[#allocation22_spill] sm:$0xff] %v5391_v39 }
 0xaae   :  { %1990 = vmatpush.msra.mxu0 %v5385_v6  ;;  %1955 = vmatpush.msrb.mxu2 %v5391_v39  ;;  %v5401_v6 = vld [vmem:[#allocation3 + $0xa8] sm:$0xff] }
 0xaaf   :  { %3661 = vmatmul.msk.f32.vlgmr.msra.gmra.mxu1 %vm384_vm2, %v1681_v14  ;;  %3662 = vmatmul.msk.f32.vlgmr.msra.gmra.mxu2 %vm384_vm2, %v1681_v14 }
 0xab0   :  { %3663 = vmatmul.msk.f32.vlgmr.msra.gmra.mxu3 %vm384_vm2, %v1681_v14  ;;  %v5377_v14 = vld [vmem:[#allocation3 + $0xf8] sm:$0xff]  ;;  %1991 = vmatpush.msra.mxu0 %v5397_v50  ;;  %v5433_v50 = vld [vmem:[#allocation3 + $0x110] sm:$0xff] }
 0xab1   :  { %1934 = vmatpush.msrb.mxu1 %v5377_v14  ;;  %1956 = vmatpush.msrb.mxu2 %v5403_v61  ;;  %6917 = vst [vmem:[#allocation33_spill] sm:$0xff] %v5433_v50 }
 0xab2   :  { %1992 = vmatpush.msra.mxu0 %v5409_v49  ;;  %v5429_v49 = vld [vmem:[#allocation3 + $0x68] sm:$0xff] }
 0xab3   :  { %6916 = vst [vmem:[#allocation32_spill] sm:$0xff] %v5429_v49 }
 0xb2c   :  { %v1722_v34 = vpop.f32.mrf.mxu1 }
 0xb2d   :  { %v1723_v42 = vadd.f32 %v1722_v34, %v1696_v47  ;;  %v5381_v47 = vld [vmem:[#allocation3 + $0x108] sm:$0xff]  ;;  %v1543_v34 = vpop.f32.mrf.mxu0 }
 0xb2e   :  { %1974 = vmatpush.msrb.mxu3 %v5381_v47  ;;  %v1544_v56 = vadd.f32 %v1543_v34, %v1459_v10  ;;  %v5415_v10 = vld [vmem:[#allocation3 + $0x88] sm:$0xff]  ;;  %v5421_v34 = vld [vmem:[#allocation3 + $0x138] sm:$0xff] }
 0xb2f   :  { %v1765_v9 = vadd.f32 %v1723_v42, %v1524_v7  ;;  %v5389_v42 = vld [vmem:[#allocation3 + $0xd0] sm:$0xff]  ;;  %6912 = vst [vmem:[#allocation28_spill] sm:$0xff] %v5415_v10  ;;  %1957 = vmatpush.msrb.mxu2 %v5415_v10  ;;  %1993 = vmatpush.msra.mxu0 %v5421_v34 }
 0xb30   :  { %1935 = vmatpush.msrb.mxu1 %v5389_v42  ;;  %1975 = vmatpush.msrb.mxu3 %v5393_v48  ;;  %6914 = vst [vmem:[#allocation30_spill] sm:$0xff] %v5421_v34  ;;  %v5439_v34 = vld [vmem:[#allocation3 + $0x38] sm:$0xff] }
 0xb31   :  { %v3664_v7 = vmul.f32 -1.442695, %v1765_v9  ;;  %1994 = vmatpush.msra.mxu0 %v5433_v50  ;;  %6918 = vst [vmem:[#allocation17_spill] sm:$0xff] %v5439_v34  ;;  %v5451_v50 = vld [vmem:[#allocation3 + $0x10] sm:$0xff] }
 0xb32   :  { %v1742_v1 = vpop.f32.mrf.mxu2  ;;  %1936 = vmatpush.msrb.mxu1 %v5401_v6  ;;  %1976 = vmatpush.msrb.mxu3 %v5405_v45  ;;  %6921 = vst [vmem:[#allocation43_spill] sm:$0xff] %v5451_v50 }
 0xb33   :  { %3744 = vpow2.f32 %v3664_v7  ;;  %v1743_v9 = vadd.f32 %v1742_v1, %v1697_v13  ;;  %v5413_v1 = vld [vmem:[#allocation3 + $0x80] sm:$0xff]  ;;  %v5417_v13 = vld [vmem:[#allocation3 + $0x90] sm:$0xff]  ;;  %1995 = vmatpush.msra.mxu0 %v5445_v11 }
 0xb34   :  { %6913 = vst [vmem:[#allocation29_spill] sm:$0xff] %v5417_v13  ;;  %1937 = vmatpush.msrb.mxu1 %v5413_v1  ;;  %1977 = vmatpush.msrb.mxu3 %v5417_v13  ;;  %v5463_v11 = vld [vmem:[#allocation3 + $0x70] sm:$0xff] }
 0xb35   :  { %v1785_v19 = vadd.f32 %v1743_v9, %v1544_v56  ;;  %v5425_v56 = vld [vmem:[#allocation3 + $0x58] sm:$0xff]  ;;  %v5427_v9 = vld [vmem:[#allocation3 + $0x60] sm:$0xff]  ;;  %6925 = vst [vmem:[#allocation51_spill] sm:$0xff] %v5463_v11 }
 0xb36   :  { %6915 = vst [vmem:[#allocation31_spill] sm:$0xff] %v5427_v9  ;;  %1938 = vmatpush.msrb.mxu1 %v5425_v56  ;;  %1958 = vmatpush.msrb.mxu2 %v5427_v9 }
 0xb37   :  { %v3665_v7 = vmul.f32 -1.442695, %v1785_v19  ;;  %1978 = vmatpush.msrb.mxu3 %v5429_v49  ;;  %v5437_v19 = vld [vmem:[#allocation3 + $0x30] sm:$0xff]  ;;  %v1762_v49 = vpop.f32.mrf.mxu3 }
 0xb38   :  { %1939 = vmatpush.msrb.mxu1 %v5437_v19  ;;  %1959 = vmatpush.msrb.mxu2 %v5439_v34 }
 0xb39   :  { %v3745_v16 = vpop.eup %3744  ;;  %3746 = vpow2.f32 %v3665_v7  ;;  %1979 = vmatpush.msrb.mxu3 %v5441_v15  ;;  %v5449_v7 = vld [vmem:[#allocation3 + $0x8] sm:$0xff]  ;;  %v1460_v15 = vperm.slane %v5200_v5, 4 }
 0xb3a   :  { %v1769_v12 = vadd.f32 1.0, %v3745_v16  ;;  %1940 = vmatpush.msrb.mxu1 %v5449_v7  ;;  %1960 = vmatpush.msrb.mxu2 %v5451_v50  ;;  %v5457_v16 = vld [vmem:[#allocation3 + $0xc0] sm:$0xff] }
 0xb3b   :  { %6923 = vst [vmem:[#allocation49_spill] sm:$0xff] %v5457_v16  ;;  %1980 = vmatpush.msrb.mxu3 %v5453_v46  ;;  %1996 = vmatpush.msra.mxu0 %v5457_v16 }
 0xb3c   :  { %3748 = vrcp.f32 %v1769_v12  ;;  %v1781_v46 = vand.u32 2147483648, %v1769_v12  ;;  %vm1775_vm15 = vweird.f32 %v1769_v12 }
 0xb3d   :  { %1997 = vmatpush.msra.mxu0 %v5461_v22 }
 0xb3e   :  { %v1782_v13 = vor.u32 1.1754944e-38, %v1781_v46 }
 0xb3f   :  { %v3747_v18 = vpop.eup %3746  ;;  %1998 = vmatpush.msra.mxu0 %v5463_v11 }
 0xb40   :  { %v1789_v17 = vadd.f32 1.0, %v3747_v18  ;;  %v1779_v18 = vand.u32 2147483647, %v1769_v12 }
 0xb41   :  { %1999 = vmatpush.msra.mxu0 %v5466_v35  ;;  %v1564_v35 = vadd.f32 %v5299_v54, %v1460_v15 }
 0xb42   :  { %v3749_v55 = vpop.eup %3748  ;;  %3750 = vrcp.f32 %v1789_v17  ;;  %vm1780_vm4 = vcmp.eq.f32.partialorder %v1779_v18, 8.507059e+37  ;;  %v1799_v48 = vand.u32 2147483647, %v1789_v17  ;;  %vm1795_vm6 = vweird.f32 %v1789_v17 }
 0xb43   :  { %v1771_v50 = vmul.f32 %v3749_v55, %v1769_v12  ;;  %2000 = vmatpush.msra.mxu0 %v5469_v37  ;;  %vm1776_vm14 = vweird.f32 %v3749_v55  ;;  %v1763_v37 = vadd.f32 %v1762_v49, %v1698_v26 }
 0xb44   :  { %vm1777_vm3 = vmor %vm1775_vm15, %vm1776_vm14  ;;  %vm1800_vm8 = vcmp.eq.f32.partialorder %v1799_v48, 8.507059e+37  ;;  %v5521_v48 = vld [vmem:[%s6564_s2 + $0xf8] sm:$0xff] }
 0xb45   :  { %v1772_v16 = vsub.f32 1.0, %v1771_v50  ;;  %2098 = vmatpush.msra.mxu2 %v5521_v48 }
 0xb47   :  { %v1773_v34 = vmul.f32 %v3749_v55, %v1772_v16  ;;  %v1801_v16 = vand.u32 2147483648, %v1789_v17 }
 0xb48   :  { %v3751_v22 = vpop.eup %3750 }
 0xb49   :  { %v1791_v11 = vmul.f32 %v3751_v22, %v1789_v17  ;;  %v1774_v9 = vadd.f32 %v3749_v55, %v1773_v34  ;;  %vm1796_vm5 = vweird.f32 %v3751_v22  ;;  %v1802_v12 = vor.u32 1.1754944e-38, %v1801_v16  ;;  %v5579_v16 = vld [vmem:[%s6564_s2 + $0xc8] sm:$0xff] }
 0xb4a   :  { %vm1797_vm7 = vmor %vm1795_vm6, %vm1796_vm5 }
 0xb4b   :  { %v1792_v50 = vsub.f32 1.0, %v1791_v11  ;;  %v1778_v10 = vsel %vm1777_vm3, %v3749_v55, %v1774_v9 }
 0xb4c   :  { %v1783_v45 = vsel %vm1780_vm4, %v1782_v13, %v1778_v10  ;;  %v5556_v10 = vld [vmem:[%s6564_s2 + $0xd8] sm:$0xff]  ;;  %v2051_v13 = vld [vmem:[%s6564_s2 + $0x50] sm:$0xff] }
 0xb4d   :  { %v1793_v5 = vmul.f32 %v3751_v22, %v1792_v50  ;;  %v1805_v61 = vmul.f32 %v1783_v45, %v1564_v35 }
 0xb4f   :  { %v1794_v27 = vadd.f32 %v3751_v22, %v1793_v5  ;;  %v1806_v39 = vadd.f32 %v1805_v61, %v1763_v37  ;;  %v2050_v5 = vld [vmem:[%s6564_s2 + $0x48] sm:$0xff] }
 0xb51   :  { %v1798_v34 = vsel %vm1797_vm7, %v3751_v22, %v1794_v27  ;;  %3752 = vtanh.f32 %v1806_v39  ;;  %v5538_v39 = vld [vmem:[%s6564_s2 + $0xe8] sm:$0xff]  ;;  %v2049_v27 = vld [vmem:[%s6564_s2 + $0x40] sm:$0xff] }
 0xb52   :  { %v1803_v46 = vsel %vm1800_vm8, %v1802_v12, %v1798_v34  ;;  %v5588_v34 = vld [vmem:[%s6564_s2 + $0xc0] sm:$0xff]  ;;  %v2048_v12 = vld [vmem:[%s6564_s2 + $0x38] sm:$0xff] }
 0xb53   :  { %v1808_v15 = vsub.f32 1.0, %v1803_v46  ;;  %v1810_v26 = vmul.f32 %v1803_v46, %v5177_v0  ;;  %v5504_v0 = vld [vmem:[%s6567_s5] sm:$0x1f]  ;;  %v5597_v46 = vld [vmem:[%s6564_s2 + $0xb8] sm:$0xff] }
 0xb54   :  { %v1896_v37 = vperm.slane %v5504_v0, 1  ;;  %v1895_v35 = vperm.slane %v5504_v0, 0 }
 0xb57   :  { %v3753_v11 = vpop.eup %3752 }
 0xb58   :  { %v1809_v55 = vmul.f32 %v3753_v11, %v1808_v15  ;;  %v2047_v15 = vld [vmem:[%s6564_s2 + $0x30] sm:$0xff] }
 0xb59   :  { %v5606_v11 = vld [vmem:[%s6564_s2 + $0xb0] sm:$0xff] }
 0xb5a   :  { %v5477_v49 = vadd.f32 %v1810_v26, %v1809_v55  ;;  %v2046_v55 = vld [vmem:[%s6564_s2 + $0x28] sm:$0xff] }
 0xb5b   :  { %v5615_v26 = vld [vmem:[%s6564_s2 + $0xa8] sm:$0xff] }
 0xb5c   :  { %1812 = vst [vmem:[#allocation2 + $0x3] sm:$0x1] %v5477_v49  ;;  %1921 = vmatmul.f32.vlgmr.msrb.gmra.mxu0 %v5477_v49  ;;  %1941 = vmatmul.f32.vlgmr.msrb.gmra.mxu1 %v5477_v49 }
 0xb5d   :  { %1961 = vmatmul.f32.vlgmr.msrb.gmra.mxu2 %v5477_v49  ;;  %1981 = vmatmul.f32.vlgmr.msrb.gmra.mxu3 %v5477_v49 }
 0xb5e   :  { %2364 = vmatpush.msrb.mxu0 %v5257_v20 }
 0xb60   :  { %2365 = vmatpush.msrb.mxu0 %v5269_v29 }
 0xb62   :  { %2366 = vmatpush.msrb.mxu0 %v5281_v41  ;;  %v3666_v41 = vld [vmem:[%s6562_s0 + $0x4] ss:$8 sm:$0x3] }
 0xb64   :  { %2001 = vmatmul.f32.vlgmr.msra.gmra.mxu0 %v5477_v49 }
 0xb65   :  { %2367 = vmatpush.msrb.mxu0 %v5293_v63 }
 0xb67   :  { %2368 = vmatpush.msrb.mxu0 %v5307_v36 }
 0xb69   :  { %2369 = vmatpush.msrb.mxu0 %v5324_v38 }
 0xb6b   :  { %2370 = vmatpush.msrb.mxu0 %v5338_v53  ;;  %v2056_v53 = vld [vmem:[%s6564_s2 + $0x78] sm:$0xff] }
 0xb6c   :  { %2078 = vmatpush.msra.mxu1 %v2056_v53 }
 0xb6d   :  { %2371 = vmatpush.msrb.mxu0 %v5350_v21  ;;  %v2055_v21 = vld [vmem:[%s6564_s2 + $0x70] sm:$0xff] }
 0xb6e   :  { %2079 = vmatpush.msra.mxu1 %v2055_v21 }
 0xb6f   :  { %2372 = vmatpush.msrb.mxu0 %v5363_v51  ;;  %v2054_v51 = vld [vmem:[%s6564_s2 + $0x68] sm:$0xff] }
 0xb70   :  { %2080 = vmatpush.msra.mxu1 %v2054_v51 }
 0xb71   :  { %2373 = vmatpush.msrb.mxu0 %v5377_v14  ;;  %v2053_v14 = vld [vmem:[%s6564_s2 + $0x60] sm:$0xff] }
 0xb72   :  { %2081 = vmatpush.msra.mxu1 %v2053_v14 }
 0xb73   :  { %2374 = vmatpush.msrb.mxu0 %v5389_v42  ;;  %v5547_v42 = vld [vmem:[%s6564_s2 + $0xe0] sm:$0xff] }
 0xb75   :  { %2375 = vmatpush.msrb.mxu0 %v5401_v6  ;;  %v5530_v6 = vld [vmem:[%s6564_s2 + $0xf0] sm:$0xff] }
 0xb76   :  { %2099 = vmatpush.msra.mxu2 %v5530_v6 }
 0xb77   :  { %2376 = vmatpush.msrb.mxu0 %v5413_v1  ;;  %v2052_v1 = vld [vmem:[%s6564_s2 + $0x58] sm:$0xff] }
 0xb78   :  { %2100 = vmatpush.msra.mxu2 %v5538_v39  ;;  %2082 = vmatpush.msra.mxu1 %v2052_v1 }
 0xb79   :  { %2377 = vmatpush.msrb.mxu0 %v5425_v56  ;;  %v5565_v56 = vld [vmem:[%s6564_s2 + $0xd0] sm:$0xff] }
 0xb7a   :  { %2101 = vmatpush.msra.mxu2 %v5547_v42  ;;  %2083 = vmatpush.msra.mxu1 %v2051_v13 }
 0xb7b   :  { %2378 = vmatpush.msrb.mxu0 %v5437_v19 }
 0xb7c   :  { %2102 = vmatpush.msra.mxu2 %v5556_v10  ;;  %2084 = vmatpush.msra.mxu1 %v2050_v5 }
 0xb7d   :  { %2379 = vmatpush.msrb.mxu0 %v5449_v7 }
 0xb7e   :  { %2103 = vmatpush.msra.mxu2 %v5565_v56  ;;  %2085 = vmatpush.msra.mxu1 %v2049_v27 }
 0xb7f   :  { %2517 = vmatpush.msra.mxu0 %v2056_v53  ;;  %v2127_v53 = vld [vmem:[%s6568_s6 + $0x30] sm:$0xff] }
 0xb80   :  { %2104 = vmatpush.msra.mxu2 %v5579_v16  ;;  %2086 = vmatpush.msra.mxu1 %v2048_v12 }
 0xb81   :  { %2518 = vmatpush.msra.mxu0 %v2055_v21  ;;  %v2121_v21 = vld [vmem:[%s6568_s6] sm:$0xff] }
 0xb82   :  { %2105 = vmatpush.msra.mxu2 %v5588_v34  ;;  %2087 = vmatpush.msra.mxu1 %v2047_v15 }
 0xb83   :  { %2519 = vmatpush.msra.mxu0 %v2054_v51  ;;  %v5733_v51 = vld [vmem:[%s6568_s6 + $0x38] sm:$0xff] }
 0xb84   :  { %2106 = vmatpush.msra.mxu2 %v5597_v46  ;;  %2088 = vmatpush.msra.mxu1 %v2046_v55 }
 0xb85   :  { %2520 = vmatpush.msra.mxu0 %v2053_v14  ;;  %v5745_v14 = vld [vmem:[%s6568_s6 + $0x8] sm:$0xff] }
 0xb86   :  { %2107 = vmatpush.msra.mxu2 %v5606_v11 }
 0xb87   :  { %2521 = vmatpush.msra.mxu0 %v2052_v1 }
 0xb88   :  { %2108 = vmatpush.msra.mxu2 %v5615_v26 }
 0xb89   :  { %2522 = vmatpush.msra.mxu0 %v2051_v13  ;;  %v2118_v13 = vld [vmem:[%s6563_s1 + $0x4] sm:$0x1] }
 0xb8b   :  { %2523 = vmatpush.msra.mxu0 %v2050_v5  ;;  %v5773_v5 = vld [vmem:[%s6568_s6 + $0x10] sm:$0xff] }
 0xb8d   :  { %2524 = vmatpush.msra.mxu0 %v2049_v27  ;;  %v6942_v27 = vld [vmem:[#allocation35_spill] sm:$0xff] }
 0xb8f   :  { %2525 = vmatpush.msra.mxu0 %v2048_v12  ;;  %v6944_v12 = vld [vmem:[#allocation19_spill] sm:$0xff] }
 0xb91   :  { %2526 = vmatpush.msra.mxu0 %v2047_v15  ;;  %v6946_v15 = vld [vmem:[#allocation39_spill] sm:$0xff] }
 0xb93   :  { %2527 = vmatpush.msra.mxu0 %v2046_v55  ;;  %v6948_v55 = vld [vmem:[#allocation42_spill] sm:$0xff] }
 0xbd9   :  { %v1922_v17 = vpop.f32.mrf.mxu0  ;;  %v1942_v22 = vpop.f32.mrf.mxu1 }
 0xbda   :  { %v1943_v20 = vadd.f32 %v1942_v22, %v1896_v37  ;;  %v1923_v29 = vadd.f32 %v1922_v17, %v1895_v35  ;;  %v2045_v37 = vld [vmem:[%s6564_s2 + $0x20] sm:$0xff]  ;;  %v2044_v17 = vld [vmem:[%s6564_s2 + $0x18] sm:$0xff] }
 0xbdb   :  { %v5624_v35 = vld [vmem:[%s6564_s2 + $0xa0] sm:$0xff]  ;;  %2089 = vmatpush.msra.mxu1 %v2045_v37  ;;  %v5633_v22 = vld [vmem:[%s6564_s2 + $0x98] sm:$0xff]  ;;  %2528 = vmatpush.msra.mxu0 %v2045_v37  ;;  %v6950_v37 = vld [vmem:[#allocation45_spill] sm:$0xff] }
 0xbdc   :  { %v2009_v45 = vrot.slane %v1943_v20, 7  ;;  %2109 = vmatpush.msra.mxu2 %v5624_v35  ;;  %v2043_v20 = vld [vmem:[%s6564_s2 + $0x10] sm:$0xff] }
 0xbdd   :  { %2090 = vmatpush.msra.mxu1 %v2044_v17  ;;  %2529 = vmatpush.msra.mxu0 %v2044_v17  ;;  %v6952_v17 = vld [vmem:[#allocation48_spill] sm:$0xff] }
 0xbde   :  { %v2010_v61 = vsel %vm251_vm0, %v1923_v29, %v2009_v45  ;;  %2110 = vmatpush.msra.mxu2 %v5633_v22  ;;  %v5642_v29 = vld [vmem:[%s6564_s2 + $0x90] sm:$0xff]  ;;  %v2042_v45 = vld [vmem:[%s6564_s2 + $0x8] sm:$0xff] }
 0xbdf   :  { %v2012_v63 = vadd.f32 %v3666_v41, %v2010_v61  ;;  %2091 = vmatpush.msra.mxu1 %v2043_v20  ;;  %v5651_v41 = vld [vmem:[%s6564_s2 + $0x88] sm:$0xff]  ;;  %v2041_v61 = vld [vmem:[%s6564_s2] sm:$0xff]  ;;  %2530 = vmatpush.msra.mxu0 %v2043_v20 }
 0xbe0   :  { %2111 = vmatpush.msra.mxu2 %v5642_v29  ;;  %v6954_v20 = vld [vmem:[#allocation11_spill] sm:$0xff] }
 0xbe1   :  { %v2017_v54 = vperm.slane %v2012_v63, %v6793_v31  ;;  %v5659_v63 = vld [vmem:[%s6564_s2 + $0x80] sm:$0xff]  ;;  %2092 = vmatpush.msra.mxu1 %v2042_v45  ;;  %2531 = vmatpush.msra.mxu0 %v2042_v45  ;;  %v6956_v45 = vld [vmem:[#allocation13_spill] sm:$0xff] }
 0xbe2   :  { %2112 = vmatpush.msra.mxu2 %v5651_v41 }
 0xbe3   :  { %v2022_v36 = vperm.slane %v2017_v54, %v6794_v62  ;;  %2093 = vmatpush.msra.mxu1 %v2041_v61  ;;  %2532 = vmatpush.msra.mxu0 %v2041_v61  ;;  %v6939_v54 = vld [vmem:[#allocation43_spill] sm:$0xff] }
 0xbe4   :  { %2113 = vmatpush.msra.mxu2 %v5659_v63  ;;  %v6958_v61 = vld [vmem:[#allocation15_spill] sm:$0xff] }
 0xbe5   :  { %v2023_v38 = vsel %vm265_vm1, %v2022_v36, -inf  ;;  %2384 = vmatpush.msrb.mxu1 %v5259_v24 }
 0xbe6   :  { %2024 = vmax.xlane.f32.xlu2 %v2023_v38  ;;  %2404 = vmatpush.msrb.mxu2 %v5261_v25  ;;  %v2130_v38 = vld [vmem:[%s6568_s6 + $0x48] sm:$0xff] }
 0xbe7   :  { %2385 = vmatpush.msrb.mxu1 %v5271_v57  ;;  %2156 = vmatpush.msra.mxu3 %v2130_v38 }
 0xbe8   :  { %2405 = vmatpush.msrb.mxu2 %v5273_v59  ;;  %v6928_v59 = vld [vmem:[#allocation22_spill] sm:$0xff] }
 0xbe9   :  { %2386 = vmatpush.msrb.mxu1 %v5283_v43  ;;  %v6929_v43 = vld [vmem:[#allocation23_spill] sm:$0xff]  ;;  %2157 = vmatpush.msra.mxu3 %v2127_v53 }
 0xbea   :  { %2406 = vmatpush.msrb.mxu2 %v5285_v23 }
 0xbeb   :  { %2387 = vmatpush.msrb.mxu1 %v5295_v40  ;;  %v6930_v40 = vld [vmem:[#allocation25_spill] sm:$0xff] }
 0xbec   :  { %2407 = vmatpush.msrb.mxu2 %v5297_v52  ;;  %v6931_v52 = vld [vmem:[#allocation26_spill] sm:$0xff] }
 0xbed   :  { %2388 = vmatpush.msrb.mxu1 %v5309_v58 }
 0xbee   :  { %2408 = vmatpush.msrb.mxu2 %v5311_v8  ;;  %v6932_v8 = vld [vmem:[#allocation28_spill] sm:$0xff] }
 0xbef   :  { %2389 = vmatpush.msrb.mxu1 %v5326_v2  ;;  %v6933_v2 = vld [vmem:[#allocation29_spill] sm:$0xff] }
 0xbf0   :  { %2409 = vmatpush.msrb.mxu2 %v5328_v32 }
 0xbf1   :  { %2390 = vmatpush.msrb.mxu1 %v5340_v33  ;;  %v6934_v33 = vld [vmem:[#allocation31_spill] sm:$0xff] }
 0xbf2   :  { %2410 = vmatpush.msrb.mxu2 %v5342_v44  ;;  %v6935_v44 = vld [vmem:[#allocation32_spill] sm:$0xff] }
 0xbf3   :  { %2391 = vmatpush.msrb.mxu1 %v5352_v30  ;;  %v6936_v30 = vld [vmem:[#allocation36_spill] sm:$0xff] }
 0xbf4   :  { %2411 = vmatpush.msrb.mxu2 %v5354_v60 }
 0xbf5   :  { %2392 = vmatpush.msrb.mxu1 %v5365_v3  ;;  %v6937_v3 = vld [vmem:[#allocation17_spill] sm:$0xff] }
 0xbf6   :  { %2412 = vmatpush.msrb.mxu2 %v5367_v4  ;;  %v6938_v4 = vld [vmem:[#allocation37_spill] sm:$0xff] }
 0xbf7   :  { %2393 = vmatpush.msrb.mxu1 %v5379_v28 }
 0xbf8   :  { %2413 = vmatpush.msrb.mxu2 %v5381_v47 }
 0xbf9   :  { %2394 = vmatpush.msrb.mxu1 %v6928_v59  ;;  %v6963_v59 = vld [vmem:[#allocation24_spill] sm:$0xff] }
 0xbfa   :  { %2414 = vmatpush.msrb.mxu2 %v6929_v43  ;;  %v6964_v43 = vld [vmem:[#allocation27_spill] sm:$0xff] }
 0xbfb   :  { %2395 = vmatpush.msrb.mxu1 %v6930_v40  ;;  %v6966_v40 = vld [vmem:[#allocation33_spill] sm:$0xff] }
 0xbfc   :  { %2415 = vmatpush.msrb.mxu2 %v6931_v52  ;;  %v6967_v52 = vld [vmem:[#allocation40_spill] sm:$0xff] }
 0xbfd   :  { %2396 = vmatpush.msrb.mxu1 %v6932_v8  ;;  %v6969_v8 = vld [vmem:[#allocation50_spill] sm:$0xff] }
 0xbfe   :  { %2416 = vmatpush.msrb.mxu2 %v6933_v2  ;;  %v6970_v2 = vld [vmem:[#allocation51_spill] sm:$0xff] }
 0xbff   :  { %2397 = vmatpush.msrb.mxu1 %v6934_v33  ;;  %v6972_v33 = vld [vmem:[#allocation53_spill] sm:$0xff] }
 0xc00   :  { %2417 = vmatpush.msrb.mxu2 %v6935_v44  ;;  %v1982_v44 = vpop.f32.mrf.mxu3 }
 0xc01   :  { %2398 = vmatpush.msrb.mxu1 %v6937_v3  ;;  %v1897_v3 = vperm.slane %v5504_v0, 2 }
 0xc02   :  { %2418 = vmatpush.msrb.mxu2 %v6938_v4 }
 0xc03   :  { %2399 = vmatpush.msrb.mxu1 %v6939_v54 }
 0xc59   :  { %v2025_v9 = vpop.xlane.xlu2 %2024 }
 0xc5a   :  { %v2026_v19 = vsub.f32 %v2022_v36, %v2025_v9  ;;  %v6940_v36 = vld [vmem:[#allocation46_spill] sm:$0xff] }
 0xc5b   :  { %2419 = vmatpush.msrb.mxu2 %v6940_v36 }
 0xc5c   :  { %v2027_v7 = vmul.f32 1.442695, %v2026_v19 }
 0xc5e   :  { %3754 = vpow2.f32 %v2027_v7  ;;  %v5755_v7 = vld [vmem:[%s6568_s6 + $0x58] sm:$0xff] }
 0xc64   :  { %v5569_v18 = vpop.eup %3754 }
 0xc65   :  { %v2029_v50 = vsel %vm265_vm1, %v5569_v18, 0.0 }
 0xc66   :  { %2030 = vadd.xlane.f32.xlu0 %v2029_v50  ;;  %v5767_v50 = vld [vmem:[%s6568_s6 + $0x28] sm:$0xff] }
 0xcd9   :  { %v2031_v24 = vpop.xlane.xlu0 %2030 }
 0xcda   :  { %3756 = vrcp.f32 %v2031_v24 }
 0xce0   :  { %v3757_v25 = vpop.eup %3756 }
 0xce1   :  { %v2033_v57 = vmul.f32 %v3757_v25, %v2031_v24  ;;  %v6960_v24 = vld [vmem:[#allocation14_spill] sm:$0xff] }
 0xce3   :  { %v2034_v23 = vsub.f32 2.0, %v2033_v57  ;;  %v6962_v57 = vld [vmem:[#allocation16_spill] sm:$0xff] }
 0xce5   :  { %v2035_v58 = vmul.f32 %v3757_v25, %v2034_v23  ;;  %v6961_v25 = vld [vmem:[#allocation21_spill] sm:$0xff]  ;;  %v6965_v23 = vld [vmem:[#allocation30_spill] sm:$0xff] }
 0xce7   :  { %v2036_v32 = vmul.f32 %v5569_v18, %v2035_v58  ;;  %v5761_v18 = vld [vmem:[%s6568_s6 + $0x40] sm:$0xff]  ;;  %v6968_v58 = vld [vmem:[#allocation49_spill] sm:$0xff] }
 0xce9   :  { %v2040_v60 = vperm.slane %v2036_v32, %v6936_v30  ;;  %v6971_v32 = vld [vmem:[#allocation52_spill] sm:$0xff] }
 0xceb   :  { %v2074_v28 = vperm.slane %v2040_v60, 0  ;;  %v2075_v47 = vperm.slane %v2040_v60, 4  ;;  %v2133_v60 = vld [vmem:[%s6569_s7] sm:$0x7] }
 0xcec   :  { %v2135_v4 = vperm.slane %v2133_v60, 0 }
 0xced   :  { %2094 = vmatmul.f32.vlgmr.msra.gmra.mxu1 %v2074_v28  ;;  %2114 = vmatmul.f32.vlgmr.msra.gmra.mxu2 %v2075_v47 }
 0xcee   :  { %2537 = vmatpush.msra.mxu1 %v5521_v48  ;;  %2595 = vmatpush.msra.mxu2 %v2130_v38  ;;  %v2124_v48 = vld [vmem:[%s6568_s6 + $0x18] sm:$0xff]  ;;  %v1898_v38 = vperm.slane %v5504_v0, 3 }
 0xcef   :  { %2158 = vmatpush.msra.mxu3 %v2124_v48 }
 0xcf0   :  { %2538 = vmatpush.msra.mxu1 %v5530_v6  ;;  %2596 = vmatpush.msra.mxu2 %v2127_v53  ;;  %v5728_v6 = vld [vmem:[%s6568_s6 + $0x50] sm:$0xff] }
 0xcf1   :  { %2159 = vmatpush.msra.mxu3 %v2121_v21 }
 0xcf2   :  { %2539 = vmatpush.msra.mxu1 %v5538_v39  ;;  %2597 = vmatpush.msra.mxu2 %v2124_v48  ;;  %v5739_v39 = vld [vmem:[%s6568_s6 + $0x20] sm:$0xff]  ;;  %v2136_v48 = vperm.slane %v2133_v60, 1 }
 0xcf3   :  { %2176 = vmatpush.msrb.mxu3 %v5728_v6 }
 0xcf4   :  { %2540 = vmatpush.msra.mxu1 %v5547_v42  ;;  %2598 = vmatpush.msra.mxu2 %v2121_v21  ;;  %v1962_v42 = vpop.f32.mrf.mxu2 }
 0xcf5   :  { %2177 = vmatpush.msrb.mxu3 %v5733_v51  ;;  %v1963_v47 = vadd.f32 %v1962_v42, %v1897_v3 }
 0xcf6   :  { %2541 = vmatpush.msra.mxu1 %v5556_v10 }
 0xcf7   :  { %2178 = vmatpush.msrb.mxu3 %v5739_v39 }
 0xcf8   :  { %2542 = vmatpush.msra.mxu1 %v5565_v56 }
 0xcf9   :  { %2179 = vmatpush.msrb.mxu3 %v5745_v14 }
 0xcfa   :  { %2543 = vmatpush.msra.mxu1 %v5579_v16  ;;  %v6941_v16 = vld [vmem:[#allocation34_spill] sm:$0xff] }
 0xcfc   :  { %2544 = vmatpush.msra.mxu1 %v5588_v34  ;;  %v6943_v34 = vld [vmem:[#allocation18_spill] sm:$0xff] }
 0xcfe   :  { %2545 = vmatpush.msra.mxu1 %v5597_v46  ;;  %v6945_v46 = vld [vmem:[#allocation38_spill] sm:$0xff] }
 0xd00   :  { %2546 = vmatpush.msra.mxu1 %v5606_v11  ;;  %v6947_v11 = vld [vmem:[#allocation41_spill] sm:$0xff] }
 0xd02   :  { %2547 = vmatpush.msra.mxu1 %v5615_v26  ;;  %v6949_v26 = vld [vmem:[#allocation44_spill] sm:$0xff] }
 0xd04   :  { %2548 = vmatpush.msra.mxu1 %v5624_v35  ;;  %v6951_v35 = vld [vmem:[#allocation47_spill] sm:$0xff] }
 0xd06   :  { %2549 = vmatpush.msra.mxu1 %v5633_v22  ;;  %v6953_v22 = vld [vmem:[#allocation9_spill] sm:$0xff] }
 0xd08   :  { %2550 = vmatpush.msra.mxu1 %v5642_v29  ;;  %v6955_v29 = vld [vmem:[#allocation10_spill] sm:$0xff] }
 0xd0a   :  { %2551 = vmatpush.msra.mxu1 %v5651_v41  ;;  %v6957_v41 = vld [vmem:[#allocation12_spill] sm:$0xff] }
 0xd0c   :  { %2552 = vmatpush.msra.mxu1 %v5659_v63  ;;  %v6959_v63 = vld [vmem:[#allocation20_spill] sm:$0xff] }
 0xd6a   :  { %v2095_v1 = vpop.f32.mrf.mxu1 }
 0xd70   :  { %v2115_v10 = vpop.f32.mrf.mxu2 }
 0xd71   :  { %v2116_v56 = vadd.f32 %v2115_v10, %v2095_v1  ;;  %v1983_v1 = vadd.f32 %v1982_v44, %v1898_v38 }
 0xd73   :  { %v2119_v9 = vadd.f32 %v2118_v13, %v2116_v56 }
 0xd75   :  { %v2120_v19 = vmax.f32 %v2119_v9, 0.0 }
 0xd77   :  { %3667 = vmatmul.msk.f32.vlgmr.msra.gmra.mxu3 %vm384_vm2, %v2120_v19 }
 0xd78   :  { %2196 = vmatpush.msra.mxu3 %v5755_v7 }
 0xd7a   :  { %2197 = vmatpush.msra.mxu3 %v5761_v18 }
 0xd7c   :  { %2198 = vmatpush.msra.mxu3 %v5767_v50 }
 0xd7e   :  { %2199 = vmatpush.msra.mxu3 %v5773_v5 }
 0xd7f   :  { %3668 = vmatmul.msk.f32.vlgmr.msrb.gmra.mxu3 %vm384_vm2, %v2120_v19 }
 0xd80   :  { %2344 = vmatpush.msrb.mxu3 %v6941_v16 }
 0xd82   :  { %2345 = vmatpush.msrb.mxu3 %v6942_v27 }
 0xd84   :  { %2346 = vmatpush.msrb.mxu3 %v6943_v34 }
 0xd86   :  { %2347 = vmatpush.msrb.mxu3 %v6944_v12 }
 0xd87   :  { %3669 = vmatmul.msk.f32.vlgmr.msra.gmra.mxu3 %vm384_vm2, %v2120_v19 }
 0xd88   :  { %2348 = vmatpush.msrb.mxu3 %v6945_v46 }
 0xd8a   :  { %2349 = vmatpush.msrb.mxu3 %v6946_v15  ;;  %v1899_v15 = vperm.slane %v5504_v0, 4 }
 0xd8c   :  { %2350 = vmatpush.msrb.mxu3 %v6947_v11 }
 0xd8e   :  { %2351 = vmatpush.msrb.mxu3 %v6948_v55 }
 0xd90   :  { %2352 = vmatpush.msrb.mxu3 %v6949_v26  ;;  %v2002_v26 = vpop.f32.mrf.mxu0 }
 0xd92   :  { %2353 = vmatpush.msrb.mxu3 %v6950_v37  ;;  %v2137_v37 = vperm.slane %v2133_v60, 2 }
 0xd94   :  { %2354 = vmatpush.msrb.mxu3 %v6951_v35 }
 0xd96   :  { %2355 = vmatpush.msrb.mxu3 %v6952_v17 }
 0xd98   :  { %2356 = vmatpush.msrb.mxu3 %v6953_v22 }
 0xd9a   :  { %2357 = vmatpush.msrb.mxu3 %v6954_v20 }
 0xd9c   :  { %2358 = vmatpush.msrb.mxu3 %v6955_v29  ;;  %v2003_v29 = vadd.f32 %v2002_v26, %v1899_v15  ;;  %v2557_v26 = vld [vmem:[%s6563_s1 + $0x5] sm:$0x1] }
 0xd9e   :  { %2359 = vmatpush.msrb.mxu3 %v6956_v45 }
 0xda0   :  { %2424 = vmatpush.msra.mxu3 %v6957_v41 }
 0xda2   :  { %2425 = vmatpush.msra.mxu3 %v6958_v61 }
 0xda4   :  { %2426 = vmatpush.msra.mxu3 %v6959_v63 }
 0xda6   :  { %2427 = vmatpush.msra.mxu3 %v6960_v24 }
 0xda8   :  { %2428 = vmatpush.msra.mxu3 %v6961_v25 }
 0xdaa   :  { %2429 = vmatpush.msra.mxu3 %v6962_v57 }
 0xdac   :  { %2430 = vmatpush.msra.mxu3 %v6963_v59 }
 0xdae   :  { %2431 = vmatpush.msra.mxu3 %v6964_v43 }
 0xdb0   :  { %2432 = vmatpush.msra.mxu3 %v6965_v23 }
 0xdb2   :  { %2433 = vmatpush.msra.mxu3 %v6966_v40 }
 0xdb4   :  { %2434 = vmatpush.msra.mxu3 %v6967_v52 }
 0xdb6   :  { %2435 = vmatpush.msra.mxu3 %v6968_v58 }
 0xdb8   :  { %2436 = vmatpush.msra.mxu3 %v6969_v8 }
 0xdba   :  { %2437 = vmatpush.msra.mxu3 %v6970_v2 }
 0xdbc   :  { %2438 = vmatpush.msra.mxu3 %v6971_v32 }
 0xdbe   :  { %2439 = vmatpush.msra.mxu3 %v6972_v33 }
 0xdfa   :  { %v2161_v28 = vpop.f32.mrf.mxu3 }
 0xdfb   :  { %v2162_v54 = vadd.f32 %v2161_v28, %v2135_v4 }
 0xdfd   :  { %v2204_v36 = vadd.f32 %v2162_v54, %v1963_v47 }
 0xdff   :  { %v3670_v53 = vmul.f32 -1.442695, %v2204_v36 }
 0xe01   :  { %3758 = vpow2.f32 %v3670_v53 }
 0xe02   :  { %v2181_v21 = vpop.f32.mrf.mxu3 }
 0xe03   :  { %v2182_v10 = vadd.f32 %v2181_v21, %v2136_v48 }
 0xe05   :  { %v2224_v13 = vadd.f32 %v2182_v10, %v1983_v1 }
 0xe07   :  { %v3759_v56 = vpop.eup %3758  ;;  %v3671_v9 = vmul.f32 -1.442695, %v2224_v13 }
 0xe08   :  { %v2208_v19 = vadd.f32 1.0, %v3759_v56 }
 0xe09   :  { %3760 = vpow2.f32 %v3671_v9 }
 0xe0a   :  { %3762 = vrcp.f32 %v2208_v19  ;;  %v2220_v46 = vand.u32 2147483648, %v2208_v19  ;;  %v2218_v55 = vand.u32 2147483647, %v2208_v19  ;;  %vm2214_vm10 = vweird.f32 %v2208_v19  ;;  %v2201_v22 = vpop.f32.mrf.mxu3 }
 0xe0b   :  { %v2202_v24 = vadd.f32 %v2201_v22, %v2137_v37  ;;  %v5855_v22 = vld [vmem:[#allocation3 + $0x258] sm:$0xff] }
 0xe0c   :  { %v2221_v20 = vor.u32 1.1754944e-38, %v2220_v46  ;;  %vm2219_vm12 = vcmp.eq.f32.partialorder %v2218_v55, 8.507059e+37  ;;  %6973 = vst [vmem:[#allocation22_spill] sm:$0xff] %v5855_v22 }
 0xe0f   :  { %v3761_v16 = vpop.eup %3760 }
 0xe10   :  { %v3763_v27 = vpop.eup %3762  ;;  %v2228_v34 = vadd.f32 1.0, %v3761_v16 }
 0xe11   :  { %v2210_v42 = vmul.f32 %v3763_v27, %v2208_v19  ;;  %vm2215_vm9 = vweird.f32 %v3763_v27 }
 0xe12   :  { %3764 = vrcp.f32 %v2228_v34  ;;  %vm2216_vm11 = vmor %vm2214_vm10, %vm2215_vm9  ;;  %v2240_v0 = vand.u32 2147483648, %v2228_v34  ;;  %v2238_v59 = vand.u32 2147483647, %v2228_v34  ;;  %vm2234_vm14 = vweird.f32 %v2228_v34 }
 0xe13   :  { %v2211_v12 = vsub.f32 1.0, %v2210_v42 }
 0xe14   :  { %v2241_v40 = vor.u32 1.1754944e-38, %v2240_v0  ;;  %vm2239_vm3 = vcmp.eq.f32.partialorder %v2238_v59, 8.507059e+37  ;;  %v5896_v0 = vld [vmem:[#allocation3 + $0x268] sm:$0xff]  ;;  %v5902_v59 = vld [vmem:[#allocation3 + $0x78] sm:$0xff] }
 0xe15   :  { %v2212_v11 = vmul.f32 %v3763_v27, %v2211_v12  ;;  %6985 = vst [vmem:[#allocation34_spill] sm:$0xff] %v5902_v59 }
 0xe17   :  { %v2213_v35 = vadd.f32 %v3763_v27, %v2212_v11 }
 0xe18   :  { %v3765_v17 = vpop.eup %3764 }
 0xe19   :  { %v2230_v45 = vmul.f32 %v3765_v17, %v2228_v34  ;;  %v2217_v41 = vsel %vm2216_vm11, %v3763_v27, %v2213_v35  ;;  %vm2235_vm13 = vweird.f32 %v3765_v17 }
 0xe1a   :  { %v2222_v61 = vsel %vm2219_vm12, %v2221_v20, %v2217_v41  ;;  %vm2236_vm15 = vmor %vm2234_vm14, %vm2235_vm13  ;;  %v5859_v20 = vld [vmem:[#allocation3 + $0x230] sm:$0xff]  ;;  %v5882_v41 = vld [vmem:[#allocation3 + $0x118] sm:$0xff] }
 0xe1b   :  { %v2231_v63 = vsub.f32 1.0, %v2230_v45  ;;  %v2244_v25 = vmul.f32 %v2222_v61, %v2003_v29  ;;  %6974 = vst [vmem:[#allocation23_spill] sm:$0xff] %v5859_v20  ;;  %v5862_v29 = vld [vmem:[#allocation3 + $0x208] sm:$0xff]  ;;  %v5879_v45 = vld [vmem:[#allocation3 + $0x140] sm:$0xff]  ;;  %v5885_v61 = vld [vmem:[#allocation3 + $0xf0] sm:$0xff] }
 0xe1c   :  { %6975 = vst [vmem:[#allocation25_spill] sm:$0xff] %v5862_v29 }
 0xe1d   :  { %v2232_v57 = vmul.f32 %v3765_v17, %v2231_v63  ;;  %v2245_v43 = vadd.f32 %v2244_v25, %v2202_v24  ;;  %6980 = vst [vmem:[#allocation32_spill] sm:$0xff] %v5879_v45  ;;  %v5888_v63 = vld [vmem:[#allocation3 + $0xc8] sm:$0xff]  ;;  %v5891_v24 = vld [vmem:[#allocation3 + $0xa0] sm:$0xff] }
 0xe1e   :  { %6981 = vst [vmem:[#allocation17_spill] sm:$0xff] %v5882_v41  ;;  %v5894_v25 = vld [vmem:[#allocation3 + $0x260] sm:$0xff] }
 0xe1f   :  { %v2233_v23 = vadd.f32 %v3765_v17, %v2232_v57  ;;  %3766 = vtanh.f32 %v2245_v43  ;;  %6982 = vst [vmem:[#allocation37_spill] sm:$0xff] %v5885_v61  ;;  %v5898_v57 = vld [vmem:[#allocation3 + $0x270] sm:$0xff]  ;;  %v5906_v43 = vld [vmem:[#allocation3 + $0x238] sm:$0xff] }
 0xe20   :  { %6983 = vst [vmem:[#allocation43_spill] sm:$0xff] %v5888_v63 }
 0xe21   :  { %v2237_v52 = vsel %vm2236_vm15, %v3765_v17, %v2233_v23  ;;  %6984 = vst [vmem:[#allocation46_spill] sm:$0xff] %v5891_v24  ;;  %v5908_v23 = vld [vmem:[#allocation3 + $0x240] sm:$0xff] }
 0xe22   :  { %v2242_v58 = vsel %vm2239_vm3, %v2241_v40, %v2237_v52  ;;  %v5910_v40 = vld [vmem:[#allocation3 + $0x248] sm:$0xff]  ;;  %v5914_v52 = vld [vmem:[#allocation3 + $0x50] sm:$0xff] }
 0xe23   :  { %v2247_v8 = vsub.f32 1.0, %v2242_v58  ;;  %v2249_v33 = vmul.f32 %v2242_v58, %v5477_v49  ;;  %v5833_v49 = vld [vmem:[%s6567_s5] sm:$0x1f]  ;;  %6986 = vst [vmem:[#allocation35_spill] sm:$0xff] %v5914_v52  ;;  %v5918_v58 = vld [vmem:[#allocation3 + $0x210] sm:$0xff] }
 0xe24   :  { %v2335_v60 = vperm.slane %v5833_v49, 1  ;;  %v2334_v28 = vperm.slane %v5833_v49, 0 }
 0xe25   :  { %v3767_v2 = vpop.eup %3766 }
 0xe26   :  { %v2248_v32 = vmul.f32 %v3767_v2, %v2247_v8  ;;  %v5920_v8 = vld [vmem:[#allocation3 + $0x218] sm:$0xff]  ;;  %v5922_v2 = vld [vmem:[#allocation3 + $0x220] sm:$0xff] }
 0xe28   :  { %v5818_v44 = vadd.f32 %v2249_v33, %v2248_v32  ;;  %v5926_v32 = vld [vmem:[#allocation3 + $0x28] sm:$0xff] }
 0xe29   :  { %6987 = vst [vmem:[#allocation18_spill] sm:$0xff] %v5926_v32  ;;  %v5930_v33 = vld [vmem:[#allocation3 + $0x1e8] sm:$0xff] }
 0xe2a   :  { %2251 = vst [vmem:[#allocation2 + $0x4] sm:$0x1] %v5818_v44  ;;  %2360 = vmatmul.f32.vlgmr.msrb.gmra.mxu3 %v5818_v44  ;;  %2380 = vmatmul.f32.vlgmr.msrb.gmra.mxu0 %v5818_v44 }
 0xe2b   :  { %2400 = vmatmul.f32.vlgmr.msrb.gmra.mxu1 %v5818_v44  ;;  %2420 = vmatmul.f32.vlgmr.msrb.gmra.mxu2 %v5818_v44 }
 0xe2c   :  { %2615 = vmatpush.msrb.mxu2 %v5728_v6  ;;  %2803 = vmatpush.msrb.mxu3 %v5894_v25 }
 0xe2d   :  { %2823 = vmatpush.msrb.mxu0 %v5896_v0  ;;  %2843 = vmatpush.msrb.mxu1 %v5898_v57 }
 0xe2e   :  { %2616 = vmatpush.msrb.mxu2 %v5733_v51  ;;  %2804 = vmatpush.msrb.mxu3 %v5906_v43 }
 0xe2f   :  { %2824 = vmatpush.msrb.mxu0 %v5908_v23  ;;  %2844 = vmatpush.msrb.mxu1 %v5910_v40 }
 0xe30   :  { %2617 = vmatpush.msrb.mxu2 %v5739_v39  ;;  %v3672_v39 = vld [vmem:[%s6562_s0 + $0x5] ss:$8 sm:$0x3]  ;;  %2805 = vmatpush.msrb.mxu3 %v5918_v58 }
 0xe31   :  { %2825 = vmatpush.msrb.mxu0 %v5920_v8  ;;  %2845 = vmatpush.msrb.mxu1 %v5922_v2 }
 0xe32   :  { %2440 = vmatmul.f32.vlgmr.msra.gmra.mxu3 %v5818_v44  ;;  %2618 = vmatpush.msrb.mxu2 %v5745_v14 }
 0xe33   :  { %2806 = vmatpush.msrb.mxu3 %v5930_v33 }
 0xea7   :  { %v2381_v3 = vpop.f32.mrf.mxu0 }
 0xea8   :  { %v2382_v4 = vadd.f32 %v2381_v3, %v2335_v60  ;;  %v5846_v15 = vpop.f32.mrf.mxu1  ;;  %v5932_v60 = vld [vmem:[#allocation3 + $0x1f0] sm:$0xff]  ;;  %v5934_v3 = vld [vmem:[#allocation3 + $0x1f8] sm:$0xff] }
 0xea9   :  { %2826 = vmatpush.msrb.mxu0 %v5932_v60  ;;  %2846 = vmatpush.msrb.mxu1 %v5934_v3 }
 0xeaa   :  { %v2448_v47 = vrot.slane %v2382_v4, 7 }
 0xead   :  { %v2361_v6 = vpop.f32.mrf.mxu3 }
 0xeae   :  { %v2362_v51 = vadd.f32 %v2361_v6, %v2334_v28  ;;  %v5936_v4 = vpop.f32.mrf.mxu2  ;;  %v5940_v28 = vld [vmem:[#allocation3] sm:$0xff] }
 0xeaf   :  { %6988 = vst [vmem:[#allocation19_spill] sm:$0xff] %v5940_v28  ;;  %v5944_v6 = vld [vmem:[#allocation3 + $0x1c0] sm:$0xff] }
 0xeb0   :  { %v2449_v14 = vsel %vm251_vm0, %v2362_v51, %v2448_v47  ;;  %v5946_v47 = vld [vmem:[#allocation3 + $0x1c8] sm:$0xff]  ;;  %v5948_v51 = vld [vmem:[#allocation3 + $0x1d0] sm:$0xff]  ;;  %2807 = vmatpush.msrb.mxu3 %v5944_v6 }
 0xeb1   :  { %v2451_v54 = vadd.f32 %v3672_v39, %v2449_v14  ;;  %v5953_v39 = vld [vmem:[%s6569_s7] sm:$0x7]  ;;  %2827 = vmatpush.msrb.mxu0 %v5946_v47  ;;  %2847 = vmatpush.msrb.mxu1 %v5948_v51 }
 0xeb2   :  { %v5957_v14 = vld [vmem:[#allocation3 + $0x278] sm:$0xff] }
 0xeb3   :  { %v2456_v36 = vperm.slane %v2451_v54, %v6793_v31  ;;  %6989 = vst [vmem:[#allocation38_spill] sm:$0xff] %v5957_v14  ;;  %v5961_v54 = vld [vmem:[#allocation3 + $0x198] sm:$0xff] }
 0xeb4   :  { %2808 = vmatpush.msrb.mxu3 %v5961_v54 }
 0xeb5   :  { %v2461_v38 = vperm.slane %v2456_v36, %v6794_v62  ;;  %v5963_v36 = vld [vmem:[#allocation3 + $0x1a0] sm:$0xff] }
 0xeb6   :  { %2828 = vmatpush.msrb.mxu0 %v5963_v36 }
 0xeb7   :  { %v2462_v53 = vsel %vm265_vm1, %v2461_v38, -inf }
 0xeb8   :  { %2463 = vmax.xlane.f32.xlu1 %v2462_v53  ;;  %v5969_v53 = vld [vmem:[#allocation3 + $0x250] sm:$0xff] }
 0xeb9   :  { %6990 = vst [vmem:[#allocation39_spill] sm:$0xff] %v5969_v53 }
 0xf2b   :  { %v2464_v48 = vpop.xlane.xlu1 %2463 }
 0xf2c   :  { %v2465_v21 = vsub.f32 %v2461_v38, %v2464_v48  ;;  %v5965_v38 = vld [vmem:[#allocation3 + $0x1a8] sm:$0xff]  ;;  %v2336_v48 = vperm.slane %v5833_v49, 2 }
 0xf2d   :  { %2848 = vmatpush.msrb.mxu1 %v5965_v38 }
 0xf2e   :  { %v2466_v1 = vmul.f32 1.442695, %v2465_v21  ;;  %v2574_v21 = vperm.slane %v5953_v39, 0 }
 0xf30   :  { %3768 = vpow2.f32 %v2466_v1  ;;  %v5975_v1 = vld [vmem:[#allocation3 + $0x170] sm:$0xff] }
 0xf31   :  { %2809 = vmatpush.msrb.mxu3 %v5975_v1 }
 0xf36   :  { %v3769_v10 = vpop.eup %3768 }
 0xf37   :  { %v2468_v13 = vsel %vm265_vm1, %v3769_v10, 0.0 }
 0xf38   :  { %2469 = vadd.xlane.f32.xlu2 %v2468_v13  ;;  %v5979_v13 = vld [vmem:[#allocation3 + $0x180] sm:$0xff] }
 0xf39   :  { %2849 = vmatpush.msrb.mxu1 %v5979_v13 }
 0xfab   :  { %v2470_v56 = vpop.xlane.xlu2 %2469 }
 0xfac   :  { %3770 = vrcp.f32 %v2470_v56 }
 0xfb2   :  { %v3771_v9 = vpop.eup %3770 }
 0xfb3   :  { %v2472_v19 = vmul.f32 %v3771_v9, %v2470_v56  ;;  %v5983_v56 = vld [vmem:[#allocation3 + $0x228] sm:$0xff] }
 0xfb4   :  { %6991 = vst [vmem:[#allocation41_spill] sm:$0xff] %v5983_v56 }
 0xfb5   :  { %v2473_v16 = vsub.f32 2.0, %v2472_v19  ;;  %v5989_v19 = vld [vmem:[#allocation3 + $0x150] sm:$0xff] }
 0xfb7   :  { %v2474_v27 = vmul.f32 %v3771_v9, %v2473_v16  ;;  %v5987_v9 = vld [vmem:[#allocation3 + $0x148] sm:$0xff]  ;;  %v5991_v16 = vld [vmem:[#allocation3 + $0x158] sm:$0xff] }
 0xfb8   :  { %2810 = vmatpush.msrb.mxu3 %v5987_v9  ;;  %2850 = vmatpush.msrb.mxu1 %v5991_v16 }
 0xfb9   :  { %v2475_v34 = vmul.f32 %v3769_v10, %v2474_v27  ;;  %v5977_v10 = vld [vmem:[#allocation3 + $0x178] sm:$0xff] }
 0xfba   :  { %2829 = vmatpush.msrb.mxu0 %v5977_v10 }
 0xfbb   :  { %v2479_v42 = vperm.slane %v2475_v34, %v6936_v30  ;;  %v5995_v34 = vld [vmem:[#allocation3 + $0x200] sm:$0xff] }
 0xfbc   :  { %2830 = vmatpush.msrb.mxu0 %v5989_v19  ;;  %6992 = vst [vmem:[#allocation42_spill] sm:$0xff] %v5995_v34 }
 0xfbd   :  { %v2513_v12 = vperm.slane %v2479_v42, 0  ;;  %v2514_v46 = vperm.slane %v2479_v42, 4  ;;  %v2402_v42 = vadd.f32 %v5846_v15, %v2336_v48  ;;  %v6012_v15 = vld [vmem:[#allocation3 + $0xf8] sm:$0xff]  ;;  %v2337_v48 = vperm.slane %v5833_v49, 3 }
 0xfbf   :  { %2533 = vmatmul.f32.vlgmr.msra.gmra.mxu0 %v2513_v12  ;;  %2553 = vmatmul.f32.vlgmr.msra.gmra.mxu1 %v2514_v46  ;;  %v6000_v46 = vld [vmem:[#allocation3 + $0x120] sm:$0xff] }
 0xfc0   :  { %2811 = vmatpush.msrb.mxu3 %v6000_v46 }
 0xfc2   :  { %2812 = vmatpush.msrb.mxu3 %v6012_v15 }
0x103c   :  { %v2534_v11 = vpop.f32.mrf.mxu0  ;;  %v2554_v55 = vpop.f32.mrf.mxu1 }
0x103d   :  { %v2555_v37 = vadd.f32 %v2554_v55, %v2534_v11  ;;  %v6002_v11 = vld [vmem:[#allocation3 + $0x128] sm:$0xff]  ;;  %v6004_v55 = vld [vmem:[#allocation3 + $0x130] sm:$0xff] }
0x103e   :  { %2831 = vmatpush.msrb.mxu0 %v6002_v11  ;;  %2851 = vmatpush.msrb.mxu1 %v6004_v55 }
0x103f   :  { %v2558_v35 = vadd.f32 %v2557_v26, %v2555_v37  ;;  %v6008_v26 = vld [vmem:[#allocation3 + $0x1d8] sm:$0xff] }
0x1040   :  { %6993 = vst [vmem:[#allocation44_spill] sm:$0xff] %v6008_v26 }
0x1041   :  { %v2559_v17 = vmax.f32 %v2558_v35, 0.0  ;;  %v6014_v35 = vld [vmem:[#allocation3 + $0x100] sm:$0xff] }
0x1042   :  { %2832 = vmatpush.msrb.mxu0 %v6014_v35 }
0x1043   :  { %3673 = vmatmul.msk.f32.vlgmr.msra.gmra.mxu2 %vm384_vm2, %v2559_v17 }
0x1044   :  { %2635 = vmatpush.msra.mxu2 %v5755_v7  ;;  %v5867_v7 = vld [vmem:[#allocation3 + $0x1e0] sm:$0xff] }
0x1045   :  { %6976 = vst [vmem:[#allocation26_spill] sm:$0xff] %v5867_v7 }
0x1046   :  { %2636 = vmatpush.msra.mxu2 %v5761_v18  ;;  %v5870_v18 = vld [vmem:[#allocation3 + $0x1b8] sm:$0xff] }
0x1047   :  { %6977 = vst [vmem:[#allocation28_spill] sm:$0xff] %v5870_v18 }
0x1048   :  { %2637 = vmatpush.msra.mxu2 %v5767_v50  ;;  %v5873_v50 = vld [vmem:[#allocation3 + $0x190] sm:$0xff] }
0x1049   :  { %6978 = vst [vmem:[#allocation29_spill] sm:$0xff] %v5873_v50 }
0x104a   :  { %2638 = vmatpush.msra.mxu2 %v5773_v5  ;;  %v5876_v5 = vld [vmem:[#allocation3 + $0x168] sm:$0xff] }
0x104b   :  { %3674 = vmatmul.msk.f32.vlgmr.msrb.gmra.mxu2 %vm384_vm2, %v2559_v17  ;;  %6979 = vst [vmem:[#allocation31_spill] sm:$0xff] %v5876_v5 }
0x104c   :  { %2783 = vmatpush.msrb.mxu2 %v5855_v22 }
0x104e   :  { %2784 = vmatpush.msrb.mxu2 %v5859_v20  ;;  %v6107_v20 = vld [vmem:[#allocation3 + $0x20] sm:$0xff] }
0x104f   :  { %7016 = vst [vmem:[#allocation53_spill] sm:$0xff] %v6107_v20 }
0x1050   :  { %2785 = vmatpush.msrb.mxu2 %v5862_v29 }
0x1052   :  { %2786 = vmatpush.msrb.mxu2 %v5867_v7 }
0x1053   :  { %3675 = vmatmul.msk.f32.vlgmr.msra.gmra.mxu2 %vm384_vm2, %v2559_v17  ;;  %v6016_v17 = vld [vmem:[#allocation3 + $0x108] sm:$0xff] }
0x1054   :  { %2787 = vmatpush.msrb.mxu2 %v5870_v18  ;;  %2852 = vmatpush.msrb.mxu1 %v6016_v17 }
0x1056   :  { %2788 = vmatpush.msrb.mxu2 %v5873_v50  ;;  %v6104_v50 = vld [vmem:[#allocation3 + $0x48] sm:$0xff] }
0x1057   :  { %7015 = vst [vmem:[#allocation52_spill] sm:$0xff] %v6104_v50 }
0x1058   :  { %2789 = vmatpush.msrb.mxu2 %v5876_v5  ;;  %v6091_v5 = vld [vmem:[#allocation3 + $0x18] sm:$0xff] }
0x1059   :  { %7011 = vst [vmem:[#allocation40_spill] sm:$0xff] %v6091_v5 }
0x105a   :  { %2790 = vmatpush.msrb.mxu2 %v5879_v45  ;;  %v6083_v45 = vld [vmem:[#allocation3 + $0xe8] sm:$0xff] }
0x105b   :  { %7009 = vst [vmem:[#allocation30_spill] sm:$0xff] %v6083_v45 }
0x105c   :  { %2791 = vmatpush.msrb.mxu2 %v5882_v41 }
0x105e   :  { %2792 = vmatpush.msrb.mxu2 %v5885_v61 }
0x1060   :  { %2793 = vmatpush.msrb.mxu2 %v5888_v63 }
0x1062   :  { %2794 = vmatpush.msrb.mxu2 %v5891_v24  ;;  %v6059_v24 = vld [vmem:[#allocation3 + $0x138] sm:$0xff] }
0x1063   :  { %7003 = vst [vmem:[#allocation20_spill] sm:$0xff] %v6059_v24 }
0x1064   :  { %2795 = vmatpush.msrb.mxu2 %v5902_v59  ;;  %v6055_v59 = vld [vmem:[#allocation3 + $0x90] sm:$0xff] }
0x1065   :  { %7002 = vst [vmem:[#allocation15_spill] sm:$0xff] %v6055_v59 }
0x1066   :  { %2796 = vmatpush.msrb.mxu2 %v5914_v52  ;;  %v6053_v52 = vld [vmem:[#allocation3 + $0x88] sm:$0xff] }
0x1067   :  { %7001 = vst [vmem:[#allocation12_spill] sm:$0xff] %v6053_v52 }
0x1068   :  { %2797 = vmatpush.msrb.mxu2 %v5926_v32  ;;  %v2422_v32 = vadd.f32 %v5936_v4, %v2337_v48  ;;  %v6063_v4 = vld [vmem:[#allocation3 + $0x58] sm:$0xff]  ;;  %v6067_v48 = vld [vmem:[#allocation3 + $0x68] sm:$0xff] }
0x1069   :  { %7005 = vst [vmem:[#allocation21_spill] sm:$0xff] %v6067_v48 }
0x106a   :  { %2798 = vmatpush.msrb.mxu2 %v5940_v28  ;;  %v6046_v28 = vld [vmem:[#allocation3 + $0x160] sm:$0xff] }
0x106b   :  { %7000 = vst [vmem:[#allocation13_spill] sm:$0xff] %v6046_v28 }
0x106c   :  { %2863 = vmatpush.msra.mxu2 %v5957_v14 }
0x106e   :  { %2864 = vmatpush.msra.mxu2 %v5969_v53  ;;  %v6042_v53 = vld [vmem:[#allocation3 + $0xb8] sm:$0xff] }
0x106f   :  { %6999 = vst [vmem:[#allocation10_spill] sm:$0xff] %v6042_v53 }
0x1070   :  { %2865 = vmatpush.msra.mxu2 %v5983_v56  ;;  %v6034_v56 = vld [vmem:[#allocation3 + $0x188] sm:$0xff] }
0x1071   :  { %6997 = vst [vmem:[#allocation9_spill] sm:$0xff] %v6034_v56 }
0x1072   :  { %2866 = vmatpush.msra.mxu2 %v5995_v34  ;;  %v6030_v34 = vld [vmem:[#allocation3 + $0xe0] sm:$0xff] }
0x1073   :  { %6996 = vst [vmem:[#allocation48_spill] sm:$0xff] %v6030_v34  ;;  %2853 = vmatpush.msrb.mxu1 %v6030_v34 }
0x1074   :  { %2867 = vmatpush.msra.mxu2 %v6008_v26  ;;  %v6028_v26 = vld [vmem:[#allocation3 + $0xd8] sm:$0xff] }
0x1075   :  { %6995 = vst [vmem:[#allocation47_spill] sm:$0xff] %v6028_v26  ;;  %2833 = vmatpush.msrb.mxu0 %v6028_v26  ;;  %2854 = vmatpush.msrb.mxu1 %v6042_v53 }
0x1077   :  { %2855 = vmatpush.msrb.mxu1 %v6055_v59 }
0x1079   :  { %2856 = vmatpush.msrb.mxu1 %v6067_v48 }
0x10c6   :  { %v2600_v27 = vpop.f32.mrf.mxu2 }
0x10c7   :  { %v2601_v12 = vadd.f32 %v2600_v27, %v2574_v21  ;;  %v6021_v21 = vld [vmem:[#allocation3 + $0x1b0] sm:$0xff] }
0x10c8   :  { %6994 = vst [vmem:[#allocation45_spill] sm:$0xff] %v6021_v21  ;;  %2868 = vmatpush.msra.mxu2 %v6021_v21  ;;  %v6040_v21 = vld [vmem:[#allocation3 + $0xb0] sm:$0xff] }
0x10c9   :  { %v2643_v37 = vadd.f32 %v2601_v12, %v2402_v42  ;;  %v2575_v42 = vperm.slane %v5953_v39, 1  ;;  %v6026_v12 = vld [vmem:[#allocation3 + $0xd0] sm:$0xff]  ;;  %6998 = vst [vmem:[#allocation11_spill] sm:$0xff] %v6040_v21  ;;  %2834 = vmatpush.msrb.mxu0 %v6040_v21 }
0x10ca   :  { %2813 = vmatpush.msrb.mxu3 %v6026_v12  ;;  %2869 = vmatpush.msra.mxu2 %v6034_v56  ;;  %v6051_v56 = vld [vmem:[#allocation3 + $0x80] sm:$0xff] }
0x10cb   :  { %v3676_v27 = vmul.f32 -1.442695, %v2643_v37  ;;  %v6038_v37 = vld [vmem:[#allocation3 + $0xa8] sm:$0xff]  ;;  %2835 = vmatpush.msrb.mxu0 %v6053_v52 }
0x10cc   :  { %2814 = vmatpush.msrb.mxu3 %v6038_v37  ;;  %2870 = vmatpush.msra.mxu2 %v6046_v28 }
0x10cd   :  { %3772 = vpow2.f32 %v3676_v27 }
0x10ce   :  { %v2620_v14 = vpop.f32.mrf.mxu2  ;;  %2815 = vmatpush.msrb.mxu3 %v6051_v56  ;;  %2871 = vmatpush.msra.mxu2 %v6059_v24  ;;  %v6079_v24 = vld [vmem:[#allocation3 + $0x40] sm:$0xff] }
0x10cf   :  { %v2621_v27 = vadd.f32 %v2620_v14, %v2575_v42  ;;  %v6065_v14 = vld [vmem:[#allocation3 + $0x60] sm:$0xff]  ;;  %v6071_v42 = vld [vmem:[#allocation3 + $0x110] sm:$0xff]  ;;  %7008 = vst [vmem:[#allocation27_spill] sm:$0xff] %v6079_v24  ;;  %2857 = vmatpush.msrb.mxu1 %v6079_v24 }
0x10d0   :  { %7004 = vst [vmem:[#allocation14_spill] sm:$0xff] %v6065_v14  ;;  %2816 = vmatpush.msrb.mxu3 %v6063_v4  ;;  %2836 = vmatpush.msrb.mxu0 %v6065_v14 }
0x10d1   :  { %v2663_v63 = vadd.f32 %v2621_v27, %v2422_v32  ;;  %7006 = vst [vmem:[#allocation16_spill] sm:$0xff] %v6071_v42  ;;  %2872 = vmatpush.msra.mxu2 %v6071_v42  ;;  %v6075_v32 = vld [vmem:[#allocation3 + $0x30] sm:$0xff]  ;;  %v6077_v27 = vld [vmem:[#allocation3 + $0x38] sm:$0xff]  ;;  %2858 = vmatpush.msrb.mxu1 %v6091_v5 }
0x10d2   :  { %7007 = vst [vmem:[#allocation24_spill] sm:$0xff] %v6077_v27  ;;  %2817 = vmatpush.msrb.mxu3 %v6075_v32  ;;  %2837 = vmatpush.msrb.mxu0 %v6077_v27  ;;  %v6089_v42 = vld [vmem:[#allocation3 + $0x10] sm:$0xff]  ;;  %v2441_v27 = vpop.f32.mrf.mxu3 }
0x10d3   :  { %v3773_v28 = vpop.eup %3772  ;;  %v3677_v61 = vmul.f32 -1.442695, %v2663_v63  ;;  %2873 = vmatpush.msra.mxu2 %v6083_v45  ;;  %v6087_v63 = vld [vmem:[#allocation3 + $0x8] sm:$0xff]  ;;  %7010 = vst [vmem:[#allocation33_spill] sm:$0xff] %v6089_v42  ;;  %v6101_v45 = vld [vmem:[#allocation3 + $0x70] sm:$0xff] }
0x10d4   :  { %v2647_v41 = vadd.f32 1.0, %v3773_v28  ;;  %2818 = vmatpush.msrb.mxu3 %v6087_v63  ;;  %2838 = vmatpush.msrb.mxu0 %v6089_v42  ;;  %v6095_v28 = vld [vmem:[#allocation3 + $0xc0] sm:$0xff]  ;;  %7014 = vst [vmem:[#allocation51_spill] sm:$0xff] %v6101_v45  ;;  %v2338_v42 = vperm.slane %v5833_v49, 4 }
0x10d5   :  { %3774 = vpow2.f32 %v3677_v61  ;;  %7012 = vst [vmem:[#allocation49_spill] sm:$0xff] %v6095_v28  ;;  %2874 = vmatpush.msra.mxu2 %v6095_v28  ;;  %v6099_v61 = vld [vmem:[#allocation3 + $0x98] sm:$0xff] }
0x10d6   :  { %3776 = vrcp.f32 %v2647_v41  ;;  %7013 = vst [vmem:[#allocation50_spill] sm:$0xff] %v6099_v61  ;;  %v2659_v5 = vand.u32 2147483648, %v2647_v41  ;;  %v2657_v24 = vand.u32 2147483647, %v2647_v41  ;;  %vm2653_vm5 = vweird.f32 %v2647_v41  ;;  %v2640_v48 = vpop.f32.mrf.mxu2 }
0x10d7   :  { %2875 = vmatpush.msra.mxu2 %v6099_v61 }
0x10d8   :  { %v2660_v14 = vor.u32 1.1754944e-38, %v2659_v5  ;;  %vm2658_vm7 = vcmp.eq.f32.partialorder %v2657_v24, 8.507059e+37 }
0x10d9   :  { %2876 = vmatpush.msra.mxu2 %v6101_v45  ;;  %v2576_v45 = vperm.slane %v5953_v39, 2 }
0x10db   :  { %v3775_v18 = vpop.eup %3774  ;;  %2877 = vmatpush.msra.mxu2 %v6104_v50  ;;  %v2442_v50 = vadd.f32 %v2441_v27, %v2338_v42  ;;  %v2641_v53 = vadd.f32 %v2640_v48, %v2576_v45  ;;  %v6202_v48 = vld [vmem:[%s6564_s2 + $0xd0] sm:$0xff] }
0x10dc   :  { %v3777_v7 = vpop.eup %3776  ;;  %v2667_v29 = vadd.f32 1.0, %v3775_v18 }
0x10dd   :  { %v2649_v22 = vmul.f32 %v3777_v7, %v2647_v41  ;;  %2878 = vmatpush.msra.mxu2 %v6107_v20  ;;  %vm2654_vm4 = vweird.f32 %v3777_v7 }
0x10de   :  { %3778 = vrcp.f32 %v2667_v29  ;;  %vm2655_vm6 = vmor %vm2653_vm5, %vm2654_vm4  ;;  %v2677_v34 = vand.u32 2147483647, %v2667_v29  ;;  %vm2673_vm9 = vweird.f32 %v2667_v29 }
0x10df   :  { %v2650_v28 = vsub.f32 1.0, %v2649_v22 }
0x10e0   :  { %vm2678_vm11 = vcmp.eq.f32.partialorder %v2677_v34, 8.507059e+37  ;;  %v2933_v34 = vld [vmem:[%s6564_s2 + $0x70] sm:$0xff] }
0x10e1   :  { %v2651_v61 = vmul.f32 %v3777_v7, %v2650_v28  ;;  %v2679_v28 = vand.u32 2147483648, %v2667_v29 }
0x10e3   :  { %v2652_v30 = vadd.f32 %v3777_v7, %v2651_v61  ;;  %v2680_v41 = vor.u32 1.1754944e-38, %v2679_v28  ;;  %v6216_v28 = vld [vmem:[%s6564_s2 + $0xc8] sm:$0xff] }
0x10e4   :  { %v3779_v18 = vpop.eup %3778 }
0x10e5   :  { %v2669_v59 = vmul.f32 %v3779_v18, %v2667_v29  ;;  %v2656_v22 = vsel %vm2655_vm6, %v3777_v7, %v2652_v30  ;;  %vm2674_vm8 = vweird.f32 %v3779_v18 }
0x10e6   :  { %v2661_v20 = vsel %vm2658_vm7, %v2660_v14, %v2656_v22  ;;  %vm2675_vm10 = vmor %vm2673_vm9, %vm2674_vm8  ;;  %v2929_v14 = vld [vmem:[%s6564_s2 + $0x50] sm:$0xff] }
0x10e7   :  { %v2670_v52 = vsub.f32 1.0, %v2669_v59  ;;  %v2683_v49 = vmul.f32 %v2661_v20, %v2442_v50 }
0x10e9   :  { %v2671_v21 = vmul.f32 %v3779_v18, %v2670_v52  ;;  %v2684_v26 = vadd.f32 %v2683_v49, %v2641_v53  ;;  %v2928_v49 = vld [vmem:[%s6564_s2 + $0x48] sm:$0xff] }
0x10eb   :  { %v2672_v39 = vadd.f32 %v3779_v18, %v2671_v21  ;;  %3780 = vtanh.f32 %v2684_v26  ;;  %v2932_v26 = vld [vmem:[%s6564_s2 + $0x68] sm:$0xff]  ;;  %v2931_v21 = vld [vmem:[%s6564_s2 + $0x60] sm:$0xff] }
0x10ed   :  { %v2676_v61 = vsel %vm2675_vm10, %v3779_v18, %v2672_v39  ;;  %v2927_v39 = vld [vmem:[%s6564_s2 + $0x40] sm:$0xff] }
0x10ee   :  { %v2681_v5 = vsel %vm2678_vm11, %v2680_v41, %v2676_v61  ;;  %v6225_v41 = vld [vmem:[%s6564_s2 + $0xc0] sm:$0xff]  ;;  %v2926_v61 = vld [vmem:[%s6564_s2 + $0x38] sm:$0xff] }
0x10ef   :  { %v2686_v42 = vsub.f32 1.0, %v2681_v5  ;;  %v2688_v24 = vmul.f32 %v2681_v5, %v5818_v44  ;;  %v6141_v44 = vld [vmem:[%s6567_s5] sm:$0x1f]  ;;  %v6234_v5 = vld [vmem:[%s6564_s2 + $0xb8] sm:$0xff] }
0x10f0   :  { %v2774_v20 = vperm.slane %v6141_v44, 1  ;;  %v2773_v29 = vperm.slane %v6141_v44, 0 }
0x10f1   :  { %v3781_v30 = vpop.eup %3780 }
0x10f2   :  { %v2687_v7 = vmul.f32 %v3781_v30, %v2686_v42  ;;  %v2925_v42 = vld [vmem:[%s6564_s2 + $0x30] sm:$0xff] }
0x10f3   :  { %v6243_v30 = vld [vmem:[%s6564_s2 + $0xb0] sm:$0xff] }
0x10f4   :  { %v6114_v45 = vadd.f32 %v2688_v24, %v2687_v7  ;;  %v2924_v7 = vld [vmem:[%s6564_s2 + $0x28] sm:$0xff] }
0x10f5   :  { %v6252_v24 = vld [vmem:[%s6564_s2 + $0xa8] sm:$0xff] }
0x10f6   :  { %2690 = vst [vmem:[#allocation2 + $0x5] sm:$0x1] %v6114_v45  ;;  %2799 = vmatmul.f32.vlgmr.msrb.gmra.mxu2 %v6114_v45  ;;  %2819 = vmatmul.f32.vlgmr.msrb.gmra.mxu3 %v6114_v45 }
0x10f7   :  { %2839 = vmatmul.f32.vlgmr.msrb.gmra.mxu0 %v6114_v45  ;;  %2859 = vmatmul.f32.vlgmr.msrb.gmra.mxu1 %v6114_v45 }
0x10f8   :  { %3242 = vmatpush.msrb.mxu2 %v5894_v25 }
0x10fa   :  { %3243 = vmatpush.msrb.mxu2 %v5906_v43 }
0x10fc   :  { %3244 = vmatpush.msrb.mxu2 %v5918_v58  ;;  %v3678_v58 = vld [vmem:[%s6562_s0 + $0x6] ss:$8 sm:$0x3] }
0x10fe   :  { %2879 = vmatmul.f32.vlgmr.msra.gmra.mxu2 %v6114_v45 }
0x10ff   :  { %3245 = vmatpush.msrb.mxu2 %v5930_v33 }
0x1101   :  { %3246 = vmatpush.msrb.mxu2 %v5944_v6 }
0x1103   :  { %3247 = vmatpush.msrb.mxu2 %v5961_v54 }
0x1105   :  { %3248 = vmatpush.msrb.mxu2 %v5975_v1 }
0x1107   :  { %3249 = vmatpush.msrb.mxu2 %v5987_v9  ;;  %v6158_v9 = vld [vmem:[%s6564_s2 + $0xf8] sm:$0xff] }
0x1108   :  { %2976 = vmatpush.msra.mxu0 %v6158_v9 }
0x1109   :  { %3250 = vmatpush.msrb.mxu2 %v6000_v46  ;;  %v6167_v46 = vld [vmem:[%s6564_s2 + $0xf0] sm:$0xff] }
0x110a   :  { %2977 = vmatpush.msra.mxu0 %v6167_v46 }
0x110b   :  { %3251 = vmatpush.msrb.mxu2 %v6012_v15  ;;  %v6175_v15 = vld [vmem:[%s6564_s2 + $0xe8] sm:$0xff] }
0x110c   :  { %2978 = vmatpush.msra.mxu0 %v6175_v15 }
0x110d   :  { %3252 = vmatpush.msrb.mxu2 %v6026_v12  ;;  %v6184_v12 = vld [vmem:[%s6564_s2 + $0xe0] sm:$0xff] }
0x110e   :  { %2979 = vmatpush.msra.mxu0 %v6184_v12 }
0x110f   :  { %3253 = vmatpush.msrb.mxu2 %v6038_v37  ;;  %v2930_v37 = vld [vmem:[%s6564_s2 + $0x58] sm:$0xff] }
0x1111   :  { %3254 = vmatpush.msrb.mxu2 %v6051_v56  ;;  %v2934_v56 = vld [vmem:[%s6564_s2 + $0x78] sm:$0xff] }
0x1112   :  { %2956 = vmatpush.msra.mxu3 %v2934_v56 }
0x1113   :  { %3255 = vmatpush.msrb.mxu2 %v6063_v4  ;;  %v6193_v4 = vld [vmem:[%s6564_s2 + $0xd8] sm:$0xff] }
0x1114   :  { %2957 = vmatpush.msra.mxu3 %v2933_v34  ;;  %2980 = vmatpush.msra.mxu0 %v6193_v4 }
0x1115   :  { %3256 = vmatpush.msrb.mxu2 %v6075_v32 }
0x1116   :  { %2958 = vmatpush.msra.mxu3 %v2932_v26  ;;  %2981 = vmatpush.msra.mxu0 %v6202_v48 }
0x1117   :  { %3257 = vmatpush.msrb.mxu2 %v6087_v63 }
0x1118   :  { %2959 = vmatpush.msra.mxu3 %v2931_v21  ;;  %2982 = vmatpush.msra.mxu0 %v6216_v28 }
0x1119   :  { %3395 = vmatpush.msra.mxu2 %v2934_v56  ;;  %v3005_v56 = vld [vmem:[%s6568_s6 + $0x30] sm:$0xff] }
0x111a   :  { %2960 = vmatpush.msra.mxu3 %v2930_v37  ;;  %2983 = vmatpush.msra.mxu0 %v6225_v41 }
0x111b   :  { %3396 = vmatpush.msra.mxu2 %v2933_v34  ;;  %v2999_v34 = vld [vmem:[%s6568_s6] sm:$0xff] }
0x111c   :  { %2961 = vmatpush.msra.mxu3 %v2929_v14  ;;  %2984 = vmatpush.msra.mxu0 %v6234_v5 }
0x111d   :  { %3397 = vmatpush.msra.mxu2 %v2932_v26  ;;  %v6370_v26 = vld [vmem:[%s6568_s6 + $0x38] sm:$0xff] }
0x111e   :  { %2962 = vmatpush.msra.mxu3 %v2928_v49  ;;  %2985 = vmatpush.msra.mxu0 %v6243_v30 }
0x111f   :  { %3398 = vmatpush.msra.mxu2 %v2931_v21  ;;  %v6382_v21 = vld [vmem:[%s6568_s6 + $0x8] sm:$0xff] }
0x1120   :  { %2963 = vmatpush.msra.mxu3 %v2927_v39  ;;  %2986 = vmatpush.msra.mxu0 %v6252_v24 }
0x1121   :  { %3399 = vmatpush.msra.mxu2 %v2930_v37 }
0x1122   :  { %2964 = vmatpush.msra.mxu3 %v2926_v61 }
0x1123   :  { %3400 = vmatpush.msra.mxu2 %v2929_v14  ;;  %v2996_v14 = vld [vmem:[%s6563_s1 + $0x6] sm:$0x1] }
0x1124   :  { %2965 = vmatpush.msra.mxu3 %v2925_v42 }
0x1125   :  { %3401 = vmatpush.msra.mxu2 %v2928_v49  ;;  %v6410_v49 = vld [vmem:[%s6568_s6 + $0x10] sm:$0xff] }
0x1126   :  { %2966 = vmatpush.msra.mxu3 %v2924_v7 }
0x1127   :  { %3402 = vmatpush.msra.mxu2 %v2927_v39  ;;  %v7031_v39 = vld [vmem:[#allocation23_spill] sm:$0xff] }
0x1129   :  { %3403 = vmatpush.msra.mxu2 %v2926_v61  ;;  %v7033_v61 = vld [vmem:[#allocation26_spill] sm:$0xff] }
0x112b   :  { %3404 = vmatpush.msra.mxu2 %v2925_v42  ;;  %v7035_v42 = vld [vmem:[#allocation29_spill] sm:$0xff] }
0x112d   :  { %3405 = vmatpush.msra.mxu2 %v2924_v7  ;;  %v7037_v7 = vld [vmem:[#allocation32_spill] sm:$0xff] }
0x1179   :  { %v2800_v50 = vpop.f32.mrf.mxu2  ;;  %v2820_v25 = vpop.f32.mrf.mxu3 }
0x117a   :  { %v2821_v59 = vadd.f32 %v2820_v25, %v2774_v20  ;;  %v2801_v43 = vadd.f32 %v2800_v50, %v2773_v29  ;;  %v2923_v20 = vld [vmem:[%s6564_s2 + $0x20] sm:$0xff]  ;;  %v2922_v50 = vld [vmem:[%s6564_s2 + $0x18] sm:$0xff] }
0x117b   :  { %v6261_v29 = vld [vmem:[%s6564_s2 + $0xa0] sm:$0xff]  ;;  %2967 = vmatpush.msra.mxu3 %v2923_v20  ;;  %v6270_v25 = vld [vmem:[%s6564_s2 + $0x98] sm:$0xff]  ;;  %3406 = vmatpush.msra.mxu2 %v2923_v20  ;;  %v7039_v20 = vld [vmem:[#allocation37_spill] sm:$0xff] }
0x117c   :  { %v2887_v52 = vrot.slane %v2821_v59, 7  ;;  %2987 = vmatpush.msra.mxu0 %v6261_v29  ;;  %v2921_v59 = vld [vmem:[%s6564_s2 + $0x10] sm:$0xff] }
0x117d   :  { %2968 = vmatpush.msra.mxu3 %v2922_v50  ;;  %3407 = vmatpush.msra.mxu2 %v2922_v50  ;;  %v7041_v50 = vld [vmem:[#allocation46_spill] sm:$0xff] }
0x117e   :  { %v2888_v33 = vsel %vm251_vm0, %v2801_v43, %v2887_v52  ;;  %2988 = vmatpush.msra.mxu0 %v6270_v25  ;;  %v6279_v43 = vld [vmem:[%s6564_s2 + $0x90] sm:$0xff]  ;;  %v2920_v52 = vld [vmem:[%s6564_s2 + $0x8] sm:$0xff] }
0x117f   :  { %v2890_v6 = vadd.f32 %v3678_v58, %v2888_v33  ;;  %2969 = vmatpush.msra.mxu3 %v2921_v59  ;;  %v6288_v58 = vld [vmem:[%s6564_s2 + $0x88] sm:$0xff]  ;;  %v2919_v33 = vld [vmem:[%s6564_s2] sm:$0xff]  ;;  %3408 = vmatpush.msra.mxu2 %v2921_v59 }
0x1180   :  { %2989 = vmatpush.msra.mxu0 %v6279_v43  ;;  %v7043_v59 = vld [vmem:[#allocation35_spill] sm:$0xff] }
0x1181   :  { %v2895_v54 = vperm.slane %v2890_v6, %v6793_v31  ;;  %v6296_v6 = vld [vmem:[%s6564_s2 + $0x80] sm:$0xff]  ;;  %2970 = vmatpush.msra.mxu3 %v2920_v52  ;;  %3409 = vmatpush.msra.mxu2 %v2920_v52 }
0x1182   :  { %2990 = vmatpush.msra.mxu0 %v6288_v58  ;;  %v7045_v52 = vld [vmem:[#allocation19_spill] sm:$0xff] }
0x1183   :  { %v2900_v53 = vperm.slane %v2895_v54, %v6794_v62  ;;  %2971 = vmatpush.msra.mxu3 %v2919_v33  ;;  %3410 = vmatpush.msra.mxu2 %v2919_v33  ;;  %v7028_v54 = vld [vmem:[#allocation33_spill] sm:$0xff]  ;;  %v7047_v33 = vld [vmem:[#allocation39_spill] sm:$0xff] }
0x1184   :  { %2991 = vmatpush.msra.mxu0 %v6296_v6 }
0x1185   :  { %v2901_v1 = vsel %vm265_vm1, %v2900_v53, -inf  ;;  %3262 = vmatpush.msrb.mxu3 %v5896_v0 }
0x1186   :  { %2902 = vmax.xlane.f32.xlu0 %v2901_v1  ;;  %3282 = vmatpush.msrb.mxu0 %v5898_v57  ;;  %v3008_v1 = vld [vmem:[%s6568_s6 + $0x48] sm:$0xff] }
0x1187   :  { %3263 = vmatpush.msrb.mxu3 %v5908_v23  ;;  %3034 = vmatpush.msra.mxu1 %v3008_v1 }
0x1188   :  { %3283 = vmatpush.msrb.mxu0 %v5910_v40  ;;  %v7017_v40 = vld [vmem:[#allocation47_spill] sm:$0xff] }
0x1189   :  { %3264 = vmatpush.msrb.mxu3 %v5920_v8  ;;  %v7018_v8 = vld [vmem:[#allocation48_spill] sm:$0xff]  ;;  %3035 = vmatpush.msra.mxu1 %v3005_v56 }
0x118a   :  { %3284 = vmatpush.msrb.mxu0 %v5922_v2 }
0x118b   :  { %3265 = vmatpush.msrb.mxu3 %v5932_v60  ;;  %v7019_v60 = vld [vmem:[#allocation11_spill] sm:$0xff] }
0x118c   :  { %3285 = vmatpush.msrb.mxu0 %v5934_v3  ;;  %v7020_v3 = vld [vmem:[#allocation10_spill] sm:$0xff] }
0x118d   :  { %3266 = vmatpush.msrb.mxu3 %v5946_v47 }
0x118e   :  { %3286 = vmatpush.msrb.mxu0 %v5948_v51  ;;  %v7021_v51 = vld [vmem:[#allocation12_spill] sm:$0xff] }
0x118f   :  { %3267 = vmatpush.msrb.mxu3 %v5963_v36  ;;  %v7022_v36 = vld [vmem:[#allocation15_spill] sm:$0xff] }
0x1190   :  { %3287 = vmatpush.msrb.mxu0 %v5965_v38 }
0x1191   :  { %3268 = vmatpush.msrb.mxu3 %v5977_v10  ;;  %v7023_v10 = vld [vmem:[#allocation14_spill] sm:$0xff] }
0x1192   :  { %3288 = vmatpush.msrb.mxu0 %v5979_v13  ;;  %v7024_v13 = vld [vmem:[#allocation21_spill] sm:$0xff] }
0x1193   :  { %3269 = vmatpush.msrb.mxu3 %v5989_v19  ;;  %v7025_v19 = vld [vmem:[#allocation36_spill] sm:$0xff] }
0x1194   :  { %3289 = vmatpush.msrb.mxu0 %v5991_v16 }
0x1195   :  { %3270 = vmatpush.msrb.mxu3 %v6002_v11  ;;  %v7026_v11 = vld [vmem:[#allocation24_spill] sm:$0xff] }
0x1196   :  { %3290 = vmatpush.msrb.mxu0 %v6004_v55  ;;  %v7027_v55 = vld [vmem:[#allocation27_spill] sm:$0xff] }
0x1197   :  { %3271 = vmatpush.msrb.mxu3 %v6014_v35 }
0x1198   :  { %3291 = vmatpush.msrb.mxu0 %v6016_v17 }
0x1199   :  { %3272 = vmatpush.msrb.mxu3 %v7017_v40  ;;  %v7052_v40 = vld [vmem:[#allocation9_spill] sm:$0xff] }
0x119a   :  { %3292 = vmatpush.msrb.mxu0 %v7018_v8  ;;  %v7053_v8 = vld [vmem:[#allocation13_spill] sm:$0xff] }
0x119b   :  { %3273 = vmatpush.msrb.mxu3 %v7019_v60  ;;  %v7055_v60 = vld [vmem:[#allocation16_spill] sm:$0xff] }
0x119c   :  { %3293 = vmatpush.msrb.mxu0 %v7020_v3  ;;  %v7056_v3 = vld [vmem:[#allocation30_spill] sm:$0xff] }
0x119d   :  { %3274 = vmatpush.msrb.mxu3 %v7021_v51  ;;  %v7058_v51 = vld [vmem:[#allocation50_spill] sm:$0xff] }
0x119e   :  { %3294 = vmatpush.msrb.mxu0 %v7022_v36  ;;  %v7059_v36 = vld [vmem:[#allocation51_spill] sm:$0xff] }
0x119f   :  { %3275 = vmatpush.msrb.mxu3 %v7023_v10  ;;  %v7061_v10 = vld [vmem:[#allocation53_spill] sm:$0xff] }
0x11a0   :  { %3295 = vmatpush.msrb.mxu0 %v7024_v13  ;;  %v2860_v13 = vpop.f32.mrf.mxu1 }
0x11a1   :  { %3276 = vmatpush.msrb.mxu3 %v7026_v11  ;;  %v2775_v11 = vperm.slane %v6141_v44, 2 }
0x11a2   :  { %3296 = vmatpush.msrb.mxu0 %v7027_v55 }
0x11a3   :  { %3277 = vmatpush.msrb.mxu3 %v7028_v54 }
0x11f9   :  { %v2903_v32 = vpop.xlane.xlu0 %2902 }
0x11fa   :  { %v2904_v27 = vsub.f32 %v2900_v53, %v2903_v32  ;;  %v7029_v53 = vld [vmem:[#allocation40_spill] sm:$0xff] }
0x11fb   :  { %3297 = vmatpush.msrb.mxu0 %v7029_v53 }
0x11fc   :  { %v2905_v63 = vmul.f32 1.442695, %v2904_v27 }
0x11fe   :  { %3782 = vpow2.f32 %v2905_v63  ;;  %v6392_v63 = vld [vmem:[%s6568_s6 + $0x58] sm:$0xff] }
0x1204   :  { %v6206_v18 = vpop.eup %3782 }
0x1205   :  { %v2907_v22 = vsel %vm265_vm1, %v6206_v18, 0.0 }
0x1206   :  { %2908 = vadd.xlane.f32.xlu1 %v2907_v22  ;;  %v6404_v22 = vld [vmem:[%s6568_s6 + $0x28] sm:$0xff] }
0x1279   :  { %v2909_v0 = vpop.xlane.xlu1 %2908 }
0x127a   :  { %3784 = vrcp.f32 %v2909_v0 }
0x1280   :  { %v3785_v57 = vpop.eup %3784 }
0x1281   :  { %v2911_v23 = vmul.f32 %v3785_v57, %v2909_v0  ;;  %v7049_v0 = vld [vmem:[#allocation42_spill] sm:$0xff] }
0x1283   :  { %v2912_v2 = vsub.f32 2.0, %v2911_v23  ;;  %v7051_v23 = vld [vmem:[#allocation45_spill] sm:$0xff] }
0x1285   :  { %v2913_v47 = vmul.f32 %v3785_v57, %v2912_v2  ;;  %v7050_v57 = vld [vmem:[#allocation44_spill] sm:$0xff] }
0x1286   :  { %v7054_v2 = vld [vmem:[#allocation20_spill] sm:$0xff] }
0x1287   :  { %v2914_v38 = vmul.f32 %v6206_v18, %v2913_v47  ;;  %v6398_v18 = vld [vmem:[%s6568_s6 + $0x40] sm:$0xff]  ;;  %v7057_v47 = vld [vmem:[#allocation49_spill] sm:$0xff] }
0x1289   :  { %v2918_v16 = vperm.slane %v2914_v38, %v7025_v19  ;;  %v7060_v38 = vld [vmem:[#allocation52_spill] sm:$0xff] }
0x128b   :  { %v2952_v35 = vperm.slane %v2918_v16, 0  ;;  %v2953_v17 = vperm.slane %v2918_v16, 4  ;;  %v3011_v16 = vld [vmem:[%s6569_s7] sm:$0x7] }
0x128c   :  { %v3013_v55 = vperm.slane %v3011_v16, 0 }
0x128d   :  { %2972 = vmatmul.f32.vlgmr.msra.gmra.mxu3 %v2952_v35  ;;  %2992 = vmatmul.f32.vlgmr.msra.gmra.mxu0 %v2953_v17 }
0x128e   :  { %3415 = vmatpush.msra.mxu3 %v6158_v9  ;;  %3473 = vmatpush.msra.mxu0 %v3008_v1  ;;  %v3002_v9 = vld [vmem:[%s6568_s6 + $0x18] sm:$0xff]  ;;  %v2776_v1 = vperm.slane %v6141_v44, 3 }
0x128f   :  { %3036 = vmatpush.msra.mxu1 %v3002_v9 }
0x1290   :  { %3416 = vmatpush.msra.mxu3 %v6167_v46  ;;  %3474 = vmatpush.msra.mxu0 %v3005_v56  ;;  %v6365_v46 = vld [vmem:[%s6568_s6 + $0x50] sm:$0xff] }
0x1291   :  { %3037 = vmatpush.msra.mxu1 %v2999_v34 }
0x1292   :  { %3417 = vmatpush.msra.mxu3 %v6175_v15  ;;  %3475 = vmatpush.msra.mxu0 %v3002_v9  ;;  %v6376_v15 = vld [vmem:[%s6568_s6 + $0x20] sm:$0xff]  ;;  %v3014_v9 = vperm.slane %v3011_v16, 1 }
0x1293   :  { %3054 = vmatpush.msrb.mxu1 %v6365_v46 }
0x1294   :  { %3418 = vmatpush.msra.mxu3 %v6184_v12  ;;  %3476 = vmatpush.msra.mxu0 %v2999_v34  ;;  %v2840_v12 = vpop.f32.mrf.mxu0 }
0x1295   :  { %3055 = vmatpush.msrb.mxu1 %v6370_v26  ;;  %v2841_v17 = vadd.f32 %v2840_v12, %v2775_v11 }
0x1296   :  { %3419 = vmatpush.msra.mxu3 %v6193_v4 }
0x1297   :  { %3056 = vmatpush.msrb.mxu1 %v6376_v15 }
0x1298   :  { %3420 = vmatpush.msra.mxu3 %v6202_v48 }
0x1299   :  { %3057 = vmatpush.msrb.mxu1 %v6382_v21 }
0x129a   :  { %3421 = vmatpush.msra.mxu3 %v6216_v28  ;;  %v7030_v28 = vld [vmem:[#allocation22_spill] sm:$0xff] }
0x129c   :  { %3422 = vmatpush.msra.mxu3 %v6225_v41  ;;  %v7032_v41 = vld [vmem:[#allocation25_spill] sm:$0xff] }
0x129e   :  { %3423 = vmatpush.msra.mxu3 %v6234_v5  ;;  %v7034_v5 = vld [vmem:[#allocation28_spill] sm:$0xff] }
0x12a0   :  { %3424 = vmatpush.msra.mxu3 %v6243_v30  ;;  %v7036_v30 = vld [vmem:[#allocation31_spill] sm:$0xff] }
0x12a2   :  { %3425 = vmatpush.msra.mxu3 %v6252_v24  ;;  %v7038_v24 = vld [vmem:[#allocation17_spill] sm:$0xff] }
0x12a4   :  { %3426 = vmatpush.msra.mxu3 %v6261_v29  ;;  %v7040_v29 = vld [vmem:[#allocation43_spill] sm:$0xff] }
0x12a6   :  { %3427 = vmatpush.msra.mxu3 %v6270_v25  ;;  %v7042_v25 = vld [vmem:[#allocation34_spill] sm:$0xff] }
0x12a8   :  { %3428 = vmatpush.msra.mxu3 %v6279_v43  ;;  %v7044_v43 = vld [vmem:[#allocation18_spill] sm:$0xff] }
0x12aa   :  { %3429 = vmatpush.msra.mxu3 %v6288_v58  ;;  %v7046_v58 = vld [vmem:[#allocation38_spill] sm:$0xff] }
0x12ac   :  { %3430 = vmatpush.msra.mxu3 %v6296_v6  ;;  %v7048_v6 = vld [vmem:[#allocation41_spill] sm:$0xff] }
0x130a   :  { %v2993_v37 = vpop.f32.mrf.mxu0 }
0x1310   :  { %v2973_v4 = vpop.f32.mrf.mxu3 }
0x1311   :  { %v2994_v48 = vadd.f32 %v2993_v37, %v2973_v4  ;;  %v2861_v37 = vadd.f32 %v2860_v13, %v2776_v1 }
0x1313   :  { %v2997_v32 = vadd.f32 %v2996_v14, %v2994_v48 }
0x1315   :  { %v2998_v27 = vmax.f32 %v2997_v32, 0.0 }
0x1317   :  { %3679 = vmatmul.msk.f32.vlgmr.msra.gmra.mxu1 %vm384_vm2, %v2998_v27 }
0x1318   :  { %3074 = vmatpush.msra.mxu1 %v6392_v63 }
0x131a   :  { %3075 = vmatpush.msra.mxu1 %v6398_v18 }
0x131c   :  { %3076 = vmatpush.msra.mxu1 %v6404_v22 }
0x131e   :  { %3077 = vmatpush.msra.mxu1 %v6410_v49 }
0x131f   :  { %3680 = vmatmul.msk.f32.vlgmr.msrb.gmra.mxu1 %vm384_vm2, %v2998_v27 }
0x1320   :  { %3222 = vmatpush.msrb.mxu1 %v7030_v28 }
0x1322   :  { %3223 = vmatpush.msrb.mxu1 %v7031_v39 }
0x1324   :  { %3224 = vmatpush.msrb.mxu1 %v7032_v41 }
0x1326   :  { %3225 = vmatpush.msrb.mxu1 %v7033_v61 }
0x1327   :  { %3681 = vmatmul.msk.f32.vlgmr.msra.gmra.mxu1 %vm384_vm2, %v2998_v27 }
0x1328   :  { %3226 = vmatpush.msrb.mxu1 %v7034_v5 }
0x132a   :  { %3227 = vmatpush.msrb.mxu1 %v7035_v42  ;;  %v2777_v42 = vperm.slane %v6141_v44, 4 }
0x132c   :  { %3228 = vmatpush.msrb.mxu1 %v7036_v30 }
0x132e   :  { %3229 = vmatpush.msrb.mxu1 %v7037_v7 }
0x1330   :  { %3230 = vmatpush.msrb.mxu1 %v7038_v24  ;;  %v2880_v24 = vpop.f32.mrf.mxu2 }
0x1332   :  { %3231 = vmatpush.msrb.mxu1 %v7039_v20  ;;  %v3015_v20 = vperm.slane %v3011_v16, 2 }
0x1334   :  { %3232 = vmatpush.msrb.mxu1 %v7040_v29 }
0x1336   :  { %3233 = vmatpush.msrb.mxu1 %v7041_v50 }
0x1338   :  { %3234 = vmatpush.msrb.mxu1 %v7042_v25 }
0x133a   :  { %3235 = vmatpush.msrb.mxu1 %v7043_v59 }
0x133c   :  { %3236 = vmatpush.msrb.mxu1 %v7044_v43  ;;  %v2881_v43 = vadd.f32 %v2880_v24, %v2777_v42 }
0x133e   :  { %3237 = vmatpush.msrb.mxu1 %v7045_v52 }
0x1340   :  { %3302 = vmatpush.msra.mxu1 %v7046_v58 }
0x1342   :  { %3303 = vmatpush.msra.mxu1 %v7047_v33 }
0x1344   :  { %3304 = vmatpush.msra.mxu1 %v7048_v6 }
0x1346   :  { %3305 = vmatpush.msra.mxu1 %v7049_v0 }
0x1348   :  { %3306 = vmatpush.msra.mxu1 %v7050_v57 }
0x134a   :  { %3307 = vmatpush.msra.mxu1 %v7051_v23 }
0x134c   :  { %3308 = vmatpush.msra.mxu1 %v7052_v40 }
0x134e   :  { %3309 = vmatpush.msra.mxu1 %v7053_v8 }
0x1350   :  { %3310 = vmatpush.msra.mxu1 %v7054_v2 }
0x1352   :  { %3311 = vmatpush.msra.mxu1 %v7055_v60 }
0x1354   :  { %3312 = vmatpush.msra.mxu1 %v7056_v3 }
0x1356   :  { %3313 = vmatpush.msra.mxu1 %v7057_v47 }
0x1358   :  { %3314 = vmatpush.msra.mxu1 %v7058_v51 }
0x135a   :  { %3315 = vmatpush.msra.mxu1 %v7059_v36 }
0x135c   :  { %3316 = vmatpush.msra.mxu1 %v7060_v38 }
0x135e   :  { %3317 = vmatpush.msra.mxu1 %v7061_v10 }
0x1394   :  { %v3039_v35 = vpop.f32.mrf.mxu1 }
0x1395   :  { %v3040_v54 = vadd.f32 %v3039_v35, %v3013_v55 }
0x1397   :  { %v3082_v53 = vadd.f32 %v3040_v54, %v2841_v17 }
0x1399   :  { %v3682_v56 = vmul.f32 -1.442695, %v3082_v53 }
0x139b   :  { %3786 = vpow2.f32 %v3682_v56 }
0x139c   :  { %v3059_v34 = vpop.f32.mrf.mxu1 }
0x139d   :  { %v3060_v4 = vadd.f32 %v3059_v34, %v3014_v9 }
0x139f   :  { %v3102_v14 = vadd.f32 %v3060_v4, %v2861_v37 }
0x13a1   :  { %v3787_v48 = vpop.eup %3786  ;;  %v3683_v32 = vmul.f32 -1.442695, %v3102_v14 }
0x13a2   :  { %v3086_v27 = vadd.f32 1.0, %v3787_v48 }
0x13a3   :  { %3788 = vpow2.f32 %v3683_v32 }
0x13a4   :  { %3790 = vrcp.f32 %v3086_v27  ;;  %v3098_v5 = vand.u32 2147483648, %v3086_v27  ;;  %v3096_v7 = vand.u32 2147483647, %v3086_v27  ;;  %vm3092_vm13 = vweird.f32 %v3086_v27  ;;  %v3079_v25 = vpop.f32.mrf.mxu1 }
0x13a5   :  { %v3080_v0 = vadd.f32 %v3079_v25, %v3015_v20  ;;  %v3583_v25 = vld [vmem:[%s6570_s8 + $0x60] sm:$0xff] }
0x13a6   :  { %v3099_v59 = vor.u32 1.1754944e-38, %v3098_v5  ;;  %vm3097_vm15 = vcmp.eq.f32.partialorder %v3096_v7, 8.507059e+37 }
0x13a9   :  { %v3789_v28 = vpop.eup %3788 }
0x13aa   :  { %v3791_v39 = vpop.eup %3790  ;;  %v3106_v41 = vadd.f32 1.0, %v3789_v28 }
0x13ab   :  { %v3088_v12 = vmul.f32 %v3791_v39, %v3086_v27  ;;  %vm3093_vm12 = vweird.f32 %v3791_v39 }
0x13ac   :  { %3792 = vrcp.f32 %v3106_v41  ;;  %vm3094_vm14 = vmor %vm3092_vm13, %vm3093_vm12  ;;  %v3118_v44 = vand.u32 2147483648, %v3106_v41  ;;  %v3116_v40 = vand.u32 2147483647, %v3106_v41  ;;  %vm3112_vm4 = vweird.f32 %v3106_v41 }
0x13ad   :  { %v3089_v61 = vsub.f32 1.0, %v3088_v12 }
0x13ae   :  { %v3119_v60 = vor.u32 1.1754944e-38, %v3118_v44  ;;  %vm3117_vm6 = vcmp.eq.f32.partialorder %v3116_v40, 8.507059e+37  ;;  %v3579_v40 = vld [vmem:[%s6570_s8 + $0x40] sm:$0xff] }
0x13af   :  { %v3090_v30 = vmul.f32 %v3791_v39, %v3089_v61 }
0x13b1   :  { %v3091_v29 = vadd.f32 %v3791_v39, %v3090_v30  ;;  %v3435_v30 = vld [vmem:[%s6563_s1 + $0x7] sm:$0x1] }
0x13b2   :  { %v3793_v50 = vpop.eup %3792 }
0x13b3   :  { %v3108_v52 = vmul.f32 %v3793_v50, %v3106_v41  ;;  %v3095_v58 = vsel %vm3094_vm14, %v3791_v39, %v3091_v29  ;;  %vm3113_vm3 = vweird.f32 %v3793_v50  ;;  %v3586_v29 = vld [vmem:[%s6570_s8 + $0x78] sm:$0xff] }
0x13b4   :  { %v3100_v33 = vsel %vm3097_vm15, %v3099_v59, %v3095_v58  ;;  %vm3114_vm5 = vmor %vm3112_vm4, %vm3113_vm3  ;;  %v3582_v58 = vld [vmem:[%s6570_s8 + $0x58] sm:$0xff] }
0x13b5   :  { %v3109_v6 = vsub.f32 1.0, %v3108_v52  ;;  %v3122_v57 = vmul.f32 %v3100_v33, %v2881_v43 }
0x13b7   :  { %v3110_v23 = vmul.f32 %v3793_v50, %v3109_v6  ;;  %v3123_v8 = vadd.f32 %v3122_v57, %v3080_v0  ;;  %v3581_v6 = vld [vmem:[%s6570_s8 + $0x50] sm:$0xff] }
0x13b9   :  { %v3111_v2 = vadd.f32 %v3793_v50, %v3110_v23  ;;  %3794 = vtanh.f32 %v3123_v8  ;;  %v3580_v23 = vld [vmem:[%s6570_s8 + $0x48] sm:$0xff] }
0x13bb   :  { %v3115_v3 = vsel %vm3114_vm5, %v3793_v50, %v3111_v2  ;;  %v6499_v50 = vld [vmem:[%s6569_s7] sm:$0x7]  ;;  %s3872_s7 = smov [#allocation6]  }
0x13bc   :  { %v3120_v47 = vsel %vm3117_vm6, %v3119_v60, %v3115_v3  ;;  %v3453_v44 = vperm.slane %v6499_v50, 1  ;;  %v3578_v3 = vld [vmem:[%s6570_s8 + $0x38] sm:$0xff] }
0x13bd   :  { %v3125_v51 = vsub.f32 1.0, %v3120_v47  ;;  %v3127_v10 = vmul.f32 %v3120_v47, %v6114_v45  ;;  %v6470_v45 = vld [vmem:[%s6567_s5] sm:$0x1f] }
0x13be   :  { %v3213_v16 = vperm.slane %v6470_v45, 1  ;;  %v3212_v11 = vperm.slane %v6470_v45, 0  ;;  %v3215_v0 = vperm.slane %v6470_v45, 3 }
0x13bf   :  { %v3795_v36 = vpop.eup %3794 }
0x13c0   :  { %v3126_v38 = vmul.f32 %v3795_v36, %v3125_v51  ;;  %v3577_v51 = vld [vmem:[%s6570_s8 + $0x30] sm:$0xff] }
0x13c2   :  { %v6455_v13 = vadd.f32 %v3127_v10, %v3126_v38  ;;  %v3576_v10 = vld [vmem:[%s6570_s8 + $0x28] sm:$0xff] }
0x13c4   :  { %3129 = vst [vmem:[#allocation2 + $0x6] sm:$0x1] %v6455_v13  ;;  %3238 = vmatmul.f32.vlgmr.msrb.gmra.mxu1 %v6455_v13  ;;  %3258 = vmatmul.f32.vlgmr.msrb.gmra.mxu2 %v6455_v13 }
0x13c5   :  { %3278 = vmatmul.f32.vlgmr.msrb.gmra.mxu3 %v6455_v13  ;;  %3298 = vmatmul.f32.vlgmr.msrb.gmra.mxu0 %v6455_v13 }
0x13c6   :  { %3493 = vmatpush.msrb.mxu0 %v6365_v46 }
0x13c8   :  { %3494 = vmatpush.msrb.mxu0 %v6370_v26 }
0x13ca   :  { %3495 = vmatpush.msrb.mxu0 %v6376_v15  ;;  %v3684_v15 = vld [vmem:[%s6562_s0 + $0x7] ss:$8 sm:$0x3] }
0x13cc   :  { %3318 = vmatmul.f32.vlgmr.msra.gmra.mxu1 %v6455_v13  ;;  %3496 = vmatpush.msrb.mxu0 %v6382_v21 }
0x1441   :  { %v3239_v55 = vpop.f32.mrf.mxu1 }
0x1442   :  { %v3240_v17 = vadd.f32 %v3239_v55, %v3212_v11  ;;  %v3575_v11 = vld [vmem:[%s6570_s8 + $0x20] sm:$0xff]  ;;  %v3574_v55 = vld [vmem:[%s6570_s8 + $0x18] sm:$0xff] }
0x1447   :  { %v3259_v35 = vpop.f32.mrf.mxu2 }
0x1448   :  { %v3260_v46 = vadd.f32 %v3259_v35, %v3213_v16  ;;  %v3279_v61 = vpop.f32.mrf.mxu3  ;;  %v3573_v35 = vld [vmem:[%s6570_s8 + $0x10] sm:$0xff] }
0x144a   :  { %v3326_v26 = vrot.slane %v3260_v46, 7  ;;  %v3572_v46 = vld [vmem:[%s6570_s8 + $0x8] sm:$0xff] }
0x144c   :  { %v3327_v21 = vsel %vm251_vm0, %v3240_v17, %v3326_v26  ;;  %v3571_v26 = vld [vmem:[%s6570_s8] sm:$0xff] }
0x144d   :  { %v3329_v54 = vadd.f32 %v3684_v15, %v3327_v21 }
0x144f   :  { %v3334_v53 = vperm.slane %v3329_v54, %v6793_v31 }
0x1451   :  { %v3339_v1 = vperm.slane %v3334_v53, %v6794_v62 }
0x1453   :  { %v3340_v56 = vsel %vm265_vm1, %v3339_v1, -inf }
0x1454   :  { %3341 = vmax.xlane.f32.xlu2 %v3340_v56  ;;  %v3216_v56 = vperm.slane %v6470_v45, 4 }
0x14c7   :  { %v3342_v9 = vpop.xlane.xlu2 %3341 }
0x14c8   :  { %v3343_v34 = vsub.f32 %v3339_v1, %v3342_v9 }
0x14ca   :  { %v3344_v37 = vmul.f32 1.442695, %v3343_v34 }
0x14cc   :  { %3796 = vpow2.f32 %v3344_v37  ;;  %v3319_v37 = vpop.f32.mrf.mxu1 }
0x14d2   :  { %v3797_v4 = vpop.eup %3796 }
0x14d3   :  { %v3346_v14 = vsel %vm265_vm1, %v3797_v4, 0.0 }
0x14d4   :  { %3347 = vadd.xlane.f32.xlu0 %v3346_v14 }
0x1547   :  { %v3348_v48 = vpop.xlane.xlu0 %3347 }
0x1548   :  { %3798 = vrcp.f32 %v3348_v48 }
0x154e   :  { %v3799_v32 = vpop.eup %3798 }
0x154f   :  { %v3350_v27 = vmul.f32 %v3799_v32, %v3348_v48 }
0x1551   :  { %v3351_v28 = vsub.f32 2.0, %v3350_v27 }
0x1553   :  { %v3352_v39 = vmul.f32 %v3799_v32, %v3351_v28  ;;  %v3320_v28 = vadd.f32 %v3319_v37, %v3216_v56 }
0x1555   :  { %v3353_v31 = vmul.f32 %v3797_v4, %v3352_v39  ;;  %v3454_v4 = vperm.slane %v6499_v50, 2 }
0x1557   :  { %v3357_v62 = vperm.slane %v3353_v31, %v7025_v19  ;;  %v3299_v19 = vpop.f32.mrf.mxu0 }
0x1558   :  { %v3300_v2 = vadd.f32 %v3299_v19, %v3215_v0 }
0x1559   :  { %v3391_v41 = vperm.slane %v3357_v62, 0  ;;  %v3392_v12 = vperm.slane %v3357_v62, 4 }
0x155b   :  { %3411 = vmatmul.f32.vlgmr.msra.gmra.mxu2 %v3391_v41  ;;  %3431 = vmatmul.f32.vlgmr.msra.gmra.mxu3 %v3392_v12 }
0x15de   :  { %v3412_v5 = vpop.f32.mrf.mxu2  ;;  %v3432_v42 = vpop.f32.mrf.mxu3 }
0x15df   :  { %v3433_v7 = vadd.f32 %v3432_v42, %v3412_v5 }
0x15e1   :  { %v3436_v24 = vadd.f32 %v3435_v30, %v3433_v7 }
0x15e3   :  { %v3437_v20 = vmax.f32 %v3436_v24, 0.0 }
0x15e5   :  { %3685 = vmatmul.msk.f32.vlgmr.msra.gmra.mxu0 %vm384_vm2, %v3437_v20 }
0x15e6   :  { %3513 = vmatpush.msra.mxu0 %v6392_v63  ;;  %v3585_v63 = vld [vmem:[%s6570_s8 + $0x70] sm:$0xff] }
0x15e8   :  { %3514 = vmatpush.msra.mxu0 %v6398_v18  ;;  %v3214_v18 = vperm.slane %v6470_v45, 2 }
0x15ea   :  { %3515 = vmatpush.msra.mxu0 %v6404_v22  ;;  %v3452_v22 = vperm.slane %v6499_v50, 0  ;;  %v3280_v43 = vadd.f32 %v3279_v61, %v3214_v18 }
0x15ec   :  { %3516 = vmatpush.msra.mxu0 %v6410_v49  ;;  %v3584_v49 = vld [vmem:[%s6570_s8 + $0x68] sm:$0xff] }
0x15ed   :  { %3686 = vmatmul.msk.f32.vlgmr.msrb.gmra.mxu0 %vm384_vm2, %v3437_v20 }
0x15ee   :  { %3591 = vmatpush.msrb.mxu0 %v3586_v29 }
0x15f0   :  { %3592 = vmatpush.msrb.mxu0 %v3585_v63 }
0x15f2   :  { %3593 = vmatpush.msrb.mxu0 %v3584_v49 }
0x15f4   :  { %3594 = vmatpush.msrb.mxu0 %v3583_v25  ;;  %v3697_v25 = vld [vmem:[%s6571_s9] ss:$0 sm:$0xff] }
0x15f5   :  { %3687 = vmatmul.msk.f32.vlgmr.msra.gmra.mxu0 %vm384_vm2, %v3437_v20 }
0x15f6   :  { %3595 = vmatpush.msrb.mxu0 %v3582_v58 }
0x15f8   :  { %3596 = vmatpush.msrb.mxu0 %v3581_v6 }
0x15fa   :  { %3597 = vmatpush.msrb.mxu0 %v3580_v23 }
0x15fc   :  { %3598 = vmatpush.msrb.mxu0 %v3579_v40 }
0x15fe   :  { %3599 = vmatpush.msrb.mxu0 %v3578_v3 }
0x1600   :  { %3600 = vmatpush.msrb.mxu0 %v3577_v51 }
0x1602   :  { %3601 = vmatpush.msrb.mxu0 %v3576_v10 }
0x1604   :  { %3602 = vmatpush.msrb.mxu0 %v3575_v11 }
0x1606   :  { %3603 = vmatpush.msrb.mxu0 %v3574_v55 }
0x1608   :  { %3604 = vmatpush.msrb.mxu0 %v3573_v35 }
0x160a   :  { %3605 = vmatpush.msrb.mxu0 %v3572_v46 }
0x160c   :  { %3606 = vmatpush.msrb.mxu0 %v3571_v26 }
0x1662   :  { %v3478_v59 = vpop.f32.mrf.mxu0 }
0x1663   :  { %v3479_v52 = vadd.f32 %v3478_v59, %v3452_v22 }
0x1665   :  { %v3521_v33 = vadd.f32 %v3479_v52, %v3280_v43 }
0x1667   :  { %v3688_v57 = vmul.f32 -1.442695, %v3521_v33 }
0x1669   :  { %3800 = vpow2.f32 %v3688_v57 }
0x166a   :  { %v3498_v8 = vpop.f32.mrf.mxu0 }
0x166b   :  { %v3499_v60 = vadd.f32 %v3498_v8, %v3453_v44 }
0x166d   :  { %v3541_v47 = vadd.f32 %v3499_v60, %v3300_v2 }
0x166f   :  { %v3801_v36 = vpop.eup %3800  ;;  %v3689_v38 = vmul.f32 -1.442695, %v3541_v47 }
0x1670   :  { %v3525_v16 = vadd.f32 1.0, %v3801_v36 }
0x1671   :  { %3802 = vpow2.f32 %v3689_v38 }
0x1672   :  { %3804 = vrcp.f32 %v3525_v16  ;;  %v3537_v1 = vand.u32 2147483648, %v3525_v16  ;;  %v3535_v34 = vand.u32 2147483647, %v3525_v16  ;;  %vm3531_vm1 = vweird.f32 %v3525_v16  ;;  %v3518_v32 = vpop.f32.mrf.mxu0 }
0x1673   :  { %v3519_v12 = vadd.f32 %v3518_v32, %v3454_v4 }
0x1674   :  { %v3538_v27 = vor.u32 1.1754944e-38, %v3537_v1  ;;  %vm3536_vm7 = vcmp.eq.f32.partialorder %v3535_v34, 8.507059e+37 }
0x1677   :  { %v3803_v17 = vpop.eup %3802 }
0x1678   :  { %v3805_v15 = vpop.eup %3804  ;;  %v3545_v21 = vadd.f32 1.0, %v3803_v17 }
0x1679   :  { %v3527_v54 = vmul.f32 %v3805_v15, %v3525_v16  ;;  %vm3532_vm0 = vweird.f32 %v3805_v15 }
0x167a   :  { %3806 = vrcp.f32 %v3545_v21  ;;  %vm3533_vm2 = vmor %vm3531_vm1, %vm3532_vm0  ;;  %v3557_v61 = vand.u32 2147483648, %v3545_v21  ;;  %v3555_v42 = vand.u32 2147483647, %v3545_v21  ;;  %vm3551_vm9 = vweird.f32 %v3545_v21 }
0x167b   :  { %v3528_v53 = vsub.f32 1.0, %v3527_v54 }
0x167c   :  { %v3558_v24 = vor.u32 1.1754944e-38, %v3557_v61  ;;  %vm3556_vm11 = vcmp.eq.f32.partialorder %v3555_v42, 8.507059e+37 }
0x167d   :  { %v3529_v9 = vmul.f32 %v3805_v15, %v3528_v53 }
0x167f   :  { %v3530_v14 = vadd.f32 %v3805_v15, %v3529_v9 }
0x1680   :  { %v3807_v48 = vpop.eup %3806 }
0x1681   :  { %v3547_v39 = vmul.f32 %v3807_v48, %v3545_v21  ;;  %v3534_v31 = vsel %vm3533_vm2, %v3805_v15, %v3530_v14  ;;  %vm3552_vm8 = vweird.f32 %v3807_v48 }
0x1682   :  { %v3539_v62 = vsel %vm3536_vm7, %v3538_v27, %v3534_v31  ;;  %vm3553_vm10 = vmor %vm3551_vm9, %vm3552_vm8 }
0x1683   :  { %v3548_v41 = vsub.f32 1.0, %v3547_v39  ;;  %v3561_v45 = vmul.f32 %v3539_v62, %v3320_v28 }
0x1685   :  { %v3549_v5 = vmul.f32 %v3807_v48, %v3548_v41  ;;  %v3562_v30 = vadd.f32 %v3561_v45, %v3519_v12 }
0x1687   :  { %v3550_v7 = vadd.f32 %v3807_v48, %v3549_v5  ;;  %3808 = vtanh.f32 %v3562_v30 }
0x1689   :  { %v3554_v20 = vsel %vm3553_vm10, %v3807_v48, %v3550_v7 }
0x168a   :  { %v3559_v19 = vsel %vm3556_vm11, %v3558_v24, %v3554_v20 }
0x168b   :  { %v3564_v29 = vsub.f32 1.0, %v3559_v19  ;;  %v3566_v18 = vmul.f32 %v3559_v19, %v6455_v13 }
0x168d   :  { %v3809_v50 = vpop.eup %3808 }
0x168e   :  { %v3565_v63 = vmul.f32 %v3809_v50, %v3564_v29 }
0x1690   :  { %v3567_v22 = vadd.f32 %v3566_v18, %v3565_v63 }
0x1692   :  { %3568 = vst [vmem:[#allocation2 + $0x7] sm:$0x1] %v3567_v22 }
0x1693   :  { %3569 = vst [vmem:[%s6573_s11] sm:$0x1] %v3567_v22  ;;  %s3627_s11 = sshll.u32 %s3872_s7, 4  ;;  %s3628_s11 = int_to_ptr.vmem [resolvable:$true] %s3627_s11 }
0x1699   :  { %v3570_v49 = vld [vmem:[#allocation2] sm:$0xff] }
0x169a   :  { %3607 = vmatmul.f32.vlgmr.msrb.gmra.mxu0 %v3570_v49 }
0x1717   :  { %v3608_v59 = vpop.f32.mrf.mxu0 }
0x1718   :  { %v3609_v43 = vadd.f32 %v3697_v25, %v3608_v59 }
0x171a   :  { %3611 = vmax.xlane.f32.xlu1 %v3609_v43 }
0x178d   :  { %v3612_v52 = vpop.xlane.xlu1 %3611 }
0x178e   :  { %v3613_v58 = vsub.f32 %v3609_v43, %v3612_v52 }
0x1790   :  { %v3614_v33 = vmul.f32 1.442695, %v3613_v58 }
0x1792   :  { %3810 = vpow2.f32 %v3614_v33 }
0x1798   :  { %v3811_v13 = vpop.eup %3810 }
0x1799   :  { %3616 = vadd.xlane.f32.xlu2 %v3811_v13 }
0x180c   :  { %v3617_v6 = vpop.xlane.xlu2 %3616 }
0x180d   :  { %3812 = vlog2.f32 %v3617_v6 }
0x1813   :  { %v3813_v0 = vpop.eup %3812 }
0x1814   :  { %v3619_v57 = vmul.f32 0.6931472, %v3813_v0 }
0x1816   :  { %v3620_v44 = vsub.f32 %v3613_v58, %v3619_v57 }
0x1818   :  { %3621 = vst [vmem:[#allocation6] sm:$0xff] %v3620_v44 }
0x1819   :  { %3632 = dma.vmem_to_hbm [thread:$0]  %s3628_s11, 128, %s3630_s25, [#allocation5]  }
0x181a   :  { %3864 = dma.done.wait [#allocation5], 128  }
0x181b   :  { %3865 = vsyncadd [#allocation5], 4294967168 }
0x181c   :  { %3641 = vsyncpa [#allocation4], 1 }
0x181d   :  { %3642 = vsyncpa [#allocation5], 1 }

</bundles_post_ra>
